<compile_context>
chip_gen: v5e
topology: v5e:2x2
jax: 0.10.0
libtpu: 0.0.40
codegen_flags: <defaults>
</compile_context>

<pallas_src>
import jax
import jax.numpy as jnp
from jax.experimental import pallas as pl
from jax.experimental.pallas import tpu as pltpu


def _down_kernel(x_ref, w1_ref, s1_ref, b1_ref, w2_ref, s2_ref, b2_ref,
                 o_ref, p1_ref, h1p_ref, p2_ref):
    # x_ref : (B, Hp+2, Wp+2, 4*Cin) pool-packed NHWC tile, zero 1-px halo (compute dtype)
    # w*_ref: (9*Ci, Co)             im2col conv weights (ky*3+kx, ci) major (compute dtype)
    # s*/b* : (1, Co)                folded inference-BN scale / shift (f32)
    # o_ref : (B*Hp*Wp, Cout)        flat (M, C) output slab
    # p1_ref: (B, Hp, Wp, 3*Cin)     per-ky im2col patches, conv1   (VMEM, compute dtype)
    # h1p_ref:(B, Hp+2, Wp+2, Cmid)  padded conv1 activation        (VMEM, compute dtype)
    # p2_ref: (B, Hp, Wp, 3*Cmid)    per-ky im2col patches, conv2   (VMEM, compute dtype)
    B, Hpp, Wpp, C4 = x_ref.shape
    Cin = C4 // 4
    Hp, Wp = Hpp - 2, Wpp - 2
    Cmid = w1_ref.shape[1]
    m = B * Hp * Wp
    cdt = h1p_ref.dtype                       # MXU compute dtype (bf16 or f32)

    # ---- MaxPool2d(2): the 4 window elements are packed along lanes ---------
    x = x_ref[...]
    pooled = jnp.maximum(
        jnp.maximum(x[..., 0 * Cin:1 * Cin], x[..., 1 * Cin:2 * Cin]),
        jnp.maximum(x[..., 2 * Cin:3 * Cin], x[..., 3 * Cin:4 * Cin]))
    # pooled: (B, Hp+2, Wp+2, Cin) with a zero halo ring (from wrapper pre-pad)

    # ---- conv1: ky-split im2col -> 3 GEMMs of K = 3*Cin, f32 accumulation ---
    w1 = w1_ref[...]
    acc1 = None
    for ky in range(3):
        for kx in range(3):
            c0 = kx * Cin
            p1_ref[:, :, :, c0:c0 + Cin] = pooled[:, ky:ky + Hp, kx:kx + Wp, :]
        part = jnp.dot(p1_ref[...].reshape(m, 3 * Cin),
                       w1[ky * 3 * Cin:(ky + 1) * 3 * Cin, :],
                       preferred_element_type=jnp.float32)
        acc1 = part if acc1 is None else acc1 + part
    h1 = jnp.maximum(acc1 * s1_ref[...] + b1_ref[...], 0.0)        # BN + ReLU (f32)

    # ---- stage conv1 output with a zero 1-px halo (conv2's padding) ---------
    # NOTE: the ring is cleared every grid step on purpose.  A once-only clear
    # under pl.when(program_id==0) is unsafe when the "parallel" batch-tile
    # axis is sharded across TensorCores (a core that never runs step 0 would
    # read an uninitialized halo); the 4 small stores are <2% of step traffic.
    h1p_ref[:, 0:1, :, :] = jnp.zeros((B, 1, Wp + 2, Cmid), cdt)
    h1p_ref[:, Hp + 1:Hp + 2, :, :] = jnp.zeros((B, 1, Wp + 2, Cmid), cdt)
    h1p_ref[:, :, 0:1, :] = jnp.zeros((B, Hp + 2, 1, Cmid), cdt)
    h1p_ref[:, :, Wp + 1:Wp + 2, :] = jnp.zeros((B, Hp + 2, 1, Cmid), cdt)
    h1p_ref[:, 1:Hp + 1, 1:Wp + 1, :] = h1.astype(cdt).reshape(B, Hp, Wp, Cmid)

    # ---- conv2: ky-split im2col -> 3 GEMMs of K = 3*Cmid, f32 accumulation --
    w2 = w2_ref[...]
    acc2 = None
    for ky in range(3):
        for kx in range(3):
            c0 = kx * Cmid
            p2_ref[:, :, :, c0:c0 + Cmid] = h1p_ref[:, ky:ky + Hp, kx:kx + Wp, :]
        part = jnp.dot(p2_ref[...].reshape(m, 3 * Cmid),
                       w2[ky * 3 * Cmid:(ky + 1) * 3 * Cmid, :],
                       preferred_element_type=jnp.float32)
        acc2 = part if acc2 is None else acc2 + part
    h2 = jnp.maximum(acc2 * s2_ref[...] + b2_ref[...], 0.0)        # BN + ReLU (f32)
    o_ref[...] = h2.astype(o_ref.dtype)


def _vmem_capacity_bytes():
    """Per-core VMEM capacity; conservative (v7x) fallback if the query fails."""
    try:
        info = pltpu.get_tpu_info()
        cap = int(getattr(info, "vmem_capacity_bytes", 0) or 0)
        if cap > 0:
            return cap
    except Exception:
        pass
    return 64 * 1024 * 1024


def _pick_batch_tile(n, hp, wp, cin, cmid, cout, c_bytes, out_bytes, budget):
    """Largest divisor of n pushing the GEMM M-dim toward ~512 rows while the
    per-step VMEM working set (incl. x2 double-buffered in/out blocks) fits."""
    rows = hp * wp
    halo = (hp + 2) * (wp + 2)
    per_img = (halo * 4 * cin * c_bytes * 2        # pool-packed input block, x2 buffers
               + rows * cout * out_bytes * 2       # output block, x2 buffers
               + rows * 3 * cin * c_bytes          # p1 im2col scratch (ky-split)
               + halo * cmid * c_bytes             # h1p staging scratch
               + rows * 3 * cmid * c_bytes)        # p2 im2col scratch (ky-split)
    const = ((9 * cin * cmid + 9 * cmid * cout) * c_bytes * 2   # weight blocks, x2
             + 4 * (cmid + cout) * 4 * 2)                        # BN scale/shift
    avail = max(budget - const, per_img)
    want = max(1, -(-512 // rows))                 # ceil(512 / rows)
    bt = 1
    for d in range(1, n + 1):
        if n % d == 0 and d <= want and d * per_img <= avail:
            bt = d
    return bt


def down_forward(x_nchw, params, eps=1e-5, compute_dtype=jnp.bfloat16,
                 out_dtype=jnp.float32):
    (w1, g1, be1, m1, v1, w2, g2, be2, m2, v2) = params
    N, Cin, H, W = x_nchw.shape
    Cmid, Cout = w1.shape[0], w2.shape[0]
    if H % 2 or W % 2:
        raise ValueError("Down requires even spatial dims (MaxPool2d(2)).")
    Hp, Wp = H // 2, W // 2
    c_bytes = jnp.dtype(compute_dtype).itemsize
    out_bytes = jnp.dtype(out_dtype).itemsize

    # glue: NCHW -> pool-packed NHWC (2x2 window folded into lanes), pad 1 px.
    # Streamed in the compute dtype (max-pool of already-rounded bf16 values is
    # exact), halving HBM->VMEM DMA bytes for the biggest input on the fast path.
    x_nhwc = jnp.transpose(x_nchw, (0, 2, 3, 1)).astype(compute_dtype)
    x_pk = x_nhwc.reshape(N, Hp, 2, Wp, 2, Cin)
    x_pk = jnp.transpose(x_pk, (0, 1, 3, 2, 4, 5)).reshape(N, Hp, Wp, 4 * Cin)
    x_pad = jnp.pad(x_pk, ((0, 0), (1, 1), (1, 1), (0, 0)))

    # fold inference-mode BatchNorm into per-channel scale / shift (f32).
    inv1 = g1 / jnp.sqrt(v1 + eps)
    inv2 = g2 / jnp.sqrt(v2 + eps)
    s1 = inv1.reshape(1, Cmid).astype(jnp.float32)
    b1 = (be1 - m1 * inv1).reshape(1, Cmid).astype(jnp.float32)
    s2 = inv2.reshape(1, Cout).astype(jnp.float32)
    b2 = (be2 - m2 * inv2).reshape(1, Cout).astype(jnp.float32)

    # conv weights OIHW -> im2col rows ((ky*3+kx)*Ci + ci) x co, MXU dtype.
    w1k = jnp.transpose(w1, (2, 3, 1, 0)).reshape(9 * Cin, Cmid).astype(compute_dtype)
    w2k = jnp.transpose(w2, (2, 3, 1, 0)).reshape(9 * Cmid, Cout).astype(compute_dtype)

    # generation-aware VMEM budget (~100 MiB on v5e/v6e, ~50 MiB on v7x).
    cap = _vmem_capacity_bytes()
    budget = int(cap * 0.72)
    vmem_limit = int(cap * 0.80)

    bt = _pick_batch_tile(N, Hp, Wp, Cin, Cmid, Cout, c_bytes, out_bytes, budget)
    m = bt * Hp * Wp
    grid = (N // bt,)

    out2d = pl.pallas_call(
        _down_kernel,
        out_shape=jax.ShapeDtypeStruct((N * Hp * Wp, Cout), out_dtype),
        grid_spec=pltpu.PrefetchScalarGridSpec(
            num_scalar_prefetch=0,
            grid=grid,
            in_specs=[
                pl.BlockSpec((bt, Hp + 2, Wp + 2, 4 * Cin), lambda n: (n, 0, 0, 0)),
                pl.BlockSpec((9 * Cin, Cmid), lambda n: (0, 0)),
                pl.BlockSpec((1, Cmid), lambda n: (0, 0)),
                pl.BlockSpec((1, Cmid), lambda n: (0, 0)),
                pl.BlockSpec((9 * Cmid, Cout), lambda n: (0, 0)),
                pl.BlockSpec((1, Cout), lambda n: (0, 0)),
                pl.BlockSpec((1, Cout), lambda n: (0, 0)),
            ],
            out_specs=pl.BlockSpec((m, Cout), lambda n: (n, 0)),
            scratch_shapes=[
                pltpu.VMEM((bt, Hp, Wp, 3 * Cin), compute_dtype),
                pltpu.VMEM((bt, Hp + 2, Wp + 2, Cmid), compute_dtype),
                pltpu.VMEM((bt, Hp, Wp, 3 * Cmid), compute_dtype),
            ]),
        compiler_params=pltpu.CompilerParams(
            dimension_semantics=("parallel",),        # batch-tile axis -> TC sharding
            vmem_limit_bytes=vmem_limit),
    )(x_pad, w1k, s1, b1, w2k, s2, b2)

    out = out2d.reshape(N, Hp, Wp, Cout).astype(jnp.float32)
    return jnp.transpose(out, (0, 3, 1, 2))            # back to NCHW


def ref_forward(x, w1, g1, be1, m1, v1, w2, g2, be2, m2, v2, eps=1e-5):
    """Plain-JAX reference matching PyTorch Down (inference-mode BN)."""
    dn = ('NCHW', 'OIHW', 'NCHW')
    y = jax.lax.reduce_window(x, -jnp.inf, jax.lax.max,
                              (1, 1, 2, 2), (1, 1, 2, 2), 'VALID')
    y = jax.lax.conv_general_dilated(y, w1, (1, 1), 'SAME', dimension_numbers=dn)
    y = (y - m1[None, :, None, None]) / jnp.sqrt(v1 + eps)[None, :, None, None] \
        * g1[None, :, None, None] + be1[None, :, None, None]
    y = jnp.maximum(y, 0.0)
    y = jax.lax.conv_general_dilated(y, w2, (1, 1), 'SAME', dimension_numbers=dn)
    y = (y - m2[None, :, None, None]) / jnp.sqrt(v2 + eps)[None, :, None, None] \
        * g2[None, :, None, None] + be2[None, :, None, None]
    y = jnp.maximum(y, 0.0)
    return y


if __name__ == "__main__":
    key = jax.random.PRNGKey(0)
    N, Cin, H, W = 2, 4, 16, 16
    Cout = 8  # Down(4, 8): both convs in DoubleConv output 8 channels

    ks = jax.random.split(key, 12)
    x = jax.random.normal(ks[0], (N, Cin, H, W), jnp.float32)

    w1 = jax.random.normal(ks[1], (Cout, Cin, 3, 3), jnp.float32) * 0.2
    g1 = jax.random.uniform(ks[2], (Cout,), jnp.float32, 0.5, 1.5)
    be1 = jax.random.normal(ks[3], (Cout,), jnp.float32) * 0.1
    m1 = jax.random.normal(ks[4], (Cout,), jnp.float32) * 0.1
    v1 = jax.random.uniform(ks[5], (Cout,), jnp.float32, 0.5, 1.5)

    w2 = jax.random.normal(ks[6], (Cout, Cout, 3, 3), jnp.float32) * 0.2
    g2 = jax.random.uniform(ks[7], (Cout,), jnp.float32, 0.5, 1.5)
    be2 = jax.random.normal(ks[8], (Cout,), jnp.float32) * 0.1
    m2 = jax.random.normal(ks[9], (Cout,), jnp.float32) * 0.1
    v2 = jax.random.uniform(ks[10], (Cout,), jnp.float32, 0.5, 1.5)

    params = (w1, g1, be1, m1, v1, w2, g2, be2, m2, v2)

    ref = ref_forward(x, *params)

    # exact-precision check path (f32 MXU inputs / f32 scratches)
    out_f32 = jax.block_until_ready(down_forward(x, params, compute_dtype=jnp.float32))
    # shipping path: bf16 MXU inputs + bf16 scratches, f32 accumulation + BN/ReLU
    out_bf16 = jax.block_until_ready(down_forward(x, params, compute_dtype=jnp.bfloat16))

    assert out_f32.shape == ref.shape == (N, Cout, H // 2, W // 2), out_f32.shape
    err32 = float(jnp.max(jnp.abs(out_f32 - ref)))
    assert err32 < 2e-4, f"f32 path: max abs error too large: {err32}"

    # tighter-than-before bf16 validation: max-error bound + mean-error bound
    ref_max = float(jnp.max(jnp.abs(ref)))
    ref_mean = float(jnp.mean(jnp.abs(ref)))
    diff = jnp.abs(out_bf16 - ref)
    err_max = float(jnp.max(diff))
    err_mean = float(jnp.mean(diff))
    assert err_max < 5e-2 * ref_max + 5e-2, f"bf16 path: max abs error too large: {err_max}"
    assert err_mean < 3e-2 * (ref_mean + 1.0), f"bf16 path: mean abs error too large: {err_mean}"

    print("KERNEL_OK")
</pallas_src>

<mosaic_0001>
module attributes {stable_mosaic.version = 11 : i64} {
  func.func @_down_kernel(%arg0: i32, %arg1: memref<2x10x10x16xf32, #tpu.memory_space<vmem>>, %arg2: memref<36x8xf32, #tpu.memory_space<vmem>>, %arg3: memref<1x8xf32, #tpu.memory_space<vmem>>, %arg4: memref<1x8xf32, #tpu.memory_space<vmem>>, %arg5: memref<72x8xf32, #tpu.memory_space<vmem>>, %arg6: memref<1x8xf32, #tpu.memory_space<vmem>>, %arg7: memref<1x8xf32, #tpu.memory_space<vmem>>, %arg8: memref<128x8xf32, #tpu.memory_space<vmem>>, %arg9: memref<2x8x8x12xf32, #tpu.memory_space<vmem>>, %arg10: memref<2x10x10x8xf32, #tpu.memory_space<vmem>>, %arg11: memref<2x8x8x24xf32, #tpu.memory_space<vmem>>) attributes {dimension_semantics = [#tpu.dimension_semantics<parallel>], iteration_bounds = array<i64: 1>, scalar_prefetch = 0 : i64, scratch_operands = 3 : i64, tpu.core_type = #tpu.core_type<tc>, window_params = [{transform_indices = @transform_0, window_bounds = array<i64: 2, 10, 10, 16>}, {pipeline_mode = #tpu.pipeline_mode<synchronous>, transform_indices = @transform_1, window_bounds = array<i64: 36, 8>}, {pipeline_mode = #tpu.pipeline_mode<synchronous>, transform_indices = @transform_2, window_bounds = array<i64: 1, 8>}, {pipeline_mode = #tpu.pipeline_mode<synchronous>, transform_indices = @transform_3, window_bounds = array<i64: 1, 8>}, {pipeline_mode = #tpu.pipeline_mode<synchronous>, transform_indices = @transform_4, window_bounds = array<i64: 72, 8>}, {pipeline_mode = #tpu.pipeline_mode<synchronous>, transform_indices = @transform_5, window_bounds = array<i64: 1, 8>}, {pipeline_mode = #tpu.pipeline_mode<synchronous>, transform_indices = @transform_6, window_bounds = array<i64: 1, 8>}, {transform_indices = @transform_7, window_bounds = array<i64: 128, 8>}]} {
    %c0 = arith.constant 0 : index
    %c0_0 = arith.constant 0 : index
    %c0_1 = arith.constant 0 : index
    %c0_2 = arith.constant 0 : index
    %0 = vector.load %arg1[%c0, %c0_0, %c0_1, %c0_2] : memref<2x10x10x16xf32, #tpu.memory_space<vmem>>, vector<2x10x10x16xf32>
    %1 = vector.extract_strided_slice %0 {offsets = [0, 0, 0, 0], sizes = [2, 10, 10, 4], strides = [1, 1, 1, 1]} : vector<2x10x10x16xf32> to vector<2x10x10x4xf32>
    %2 = vector.extract_strided_slice %0 {offsets = [0, 0, 0, 4], sizes = [2, 10, 10, 4], strides = [1, 1, 1, 1]} : vector<2x10x10x16xf32> to vector<2x10x10x4xf32>
    %3 = arith.maximumf %1, %2 : vector<2x10x10x4xf32>
    %4 = vector.extract_strided_slice %0 {offsets = [0, 0, 0, 8], sizes = [2, 10, 10, 4], strides = [1, 1, 1, 1]} : vector<2x10x10x16xf32> to vector<2x10x10x4xf32>
    %5 = vector.extract_strided_slice %0 {offsets = [0, 0, 0, 12], sizes = [2, 10, 10, 4], strides = [1, 1, 1, 1]} : vector<2x10x10x16xf32> to vector<2x10x10x4xf32>
    %6 = arith.maximumf %4, %5 : vector<2x10x10x4xf32>
    %7 = arith.maximumf %3, %6 : vector<2x10x10x4xf32>
    %c0_3 = arith.constant 0 : index
    %c0_4 = arith.constant 0 : index
    %8 = vector.load %arg2[%c0_3, %c0_4] : memref<36x8xf32, #tpu.memory_space<vmem>>, vector<36x8xf32>
    %9 = vector.extract_strided_slice %7 {offsets = [0, 0, 0, 0], sizes = [2, 8, 8, 4], strides = [1, 1, 1, 1]} : vector<2x10x10x4xf32> to vector<2x8x8x4xf32>
    %c0_5 = arith.constant 0 : index
    %c0_6 = arith.constant 0 : index
    %c0_7 = arith.constant 0 : index
    %c0_8 = arith.constant 0 : index
    %10 = vector.load %arg9[%c0_5, %c0_6, %c0_7, %c0_8] : memref<2x8x8x12xf32, #tpu.memory_space<vmem>>, vector<2x8x8x4xf32>
    tpu.vector_store %arg9[%c0_5, %c0_6, %c0_7, %c0_8], %9 {strides = array<i32>} : memref<2x8x8x12xf32, #tpu.memory_space<vmem>>, vector<2x8x8x4xf32>,
    %11 = vector.extract_strided_slice %7 {offsets = [0, 0, 1, 0], sizes = [2, 8, 8, 4], strides = [1, 1, 1, 1]} : vector<2x10x10x4xf32> to vector<2x8x8x4xf32>
    %c0_9 = arith.constant 0 : index
    %c0_10 = arith.constant 0 : index
    %c0_11 = arith.constant 0 : index
    %c4 = arith.constant 4 : index
    %12 = vector.load %arg9[%c0_9, %c0_10, %c0_11, %c4] : memref<2x8x8x12xf32, #tpu.memory_space<vmem>>, vector<2x8x8x4xf32>
    tpu.vector_store %arg9[%c0_9, %c0_10, %c0_11, %c4], %11 {strides = array<i32>} : memref<2x8x8x12xf32, #tpu.memory_space<vmem>>, vector<2x8x8x4xf32>,
    %13 = vector.extract_strided_slice %7 {offsets = [0, 0, 2, 0], sizes = [2, 8, 8, 4], strides = [1, 1, 1, 1]} : vector<2x10x10x4xf32> to vector<2x8x8x4xf32>
    %c0_12 = arith.constant 0 : index
    %c0_13 = arith.constant 0 : index
    %c0_14 = arith.constant 0 : index
    %c8 = arith.constant 8 : index
    %14 = vector.load %arg9[%c0_12, %c0_13, %c0_14, %c8] : memref<2x8x8x12xf32, #tpu.memory_space<vmem>>, vector<2x8x8x4xf32>
    tpu.vector_store %arg9[%c0_12, %c0_13, %c0_14, %c8], %13 {strides = array<i32>} : memref<2x8x8x12xf32, #tpu.memory_space<vmem>>, vector<2x8x8x4xf32>,
    %c0_15 = arith.constant 0 : index
    %c0_16 = arith.constant 0 : index
    %c0_17 = arith.constant 0 : index
    %c0_18 = arith.constant 0 : index
    %15 = vector.load %arg9[%c0_15, %c0_16, %c0_17, %c0_18] : memref<2x8x8x12xf32, #tpu.memory_space<vmem>>, vector<2x8x8x12xf32>
    %16 = vector.shape_cast %15 : vector<2x8x8x12xf32> to vector<128x12xf32>
    %17 = vector.extract_strided_slice %8 {offsets = [0, 0], sizes = [12, 8], strides = [1, 1]} : vector<36x8xf32> to vector<12x8xf32>
    %cst = arith.constant dense<0.000000e+00> : vector<128x8xf32>
    %18 = tpu.matmul %16, %17, %cst {dimension_numbers = #tpu.dot_dimension_numbers<[1], [0], [0], [1], [0, 0, 1, 1], [], []>} : vector<128x12xf32>, vector<12x8xf32>, vector<128x8xf32> -> vector<128x8xf32>
    %19 = vector.extract_strided_slice %7 {offsets = [0, 1, 0, 0], sizes = [2, 8, 8, 4], strides = [1, 1, 1, 1]} : vector<2x10x10x4xf32> to vector<2x8x8x4xf32>
    %c0_19 = arith.constant 0 : index
    %c0_20 = arith.constant 0 : index
    %c0_21 = arith.constant 0 : index
    %c0_22 = arith.constant 0 : index
    %20 = vector.load %arg9[%c0_19, %c0_20, %c0_21, %c0_22] : memref<2x8x8x12xf32, #tpu.memory_space<vmem>>, vector<2x8x8x4xf32>
    tpu.vector_store %arg9[%c0_19, %c0_20, %c0_21, %c0_22], %19 {strides = array<i32>} : memref<2x8x8x12xf32, #tpu.memory_space<vmem>>, vector<2x8x8x4xf32>,
    %21 = vector.extract_strided_slice %7 {offsets = [0, 1, 1, 0], sizes = [2, 8, 8, 4], strides = [1, 1, 1, 1]} : vector<2x10x10x4xf32> to vector<2x8x8x4xf32>
    %c0_23 = arith.constant 0 : index
    %c0_24 = arith.constant 0 : index
    %c0_25 = arith.constant 0 : index
    %c4_26 = arith.constant 4 : index
    %22 = vector.load %arg9[%c0_23, %c0_24, %c0_25, %c4_26] : memref<2x8x8x12xf32, #tpu.memory_space<vmem>>, vector<2x8x8x4xf32>
    tpu.vector_store %arg9[%c0_23, %c0_24, %c0_25, %c4_26], %21 {strides = array<i32>} : memref<2x8x8x12xf32, #tpu.memory_space<vmem>>, vector<2x8x8x4xf32>,
    %23 = vector.extract_strided_slice %7 {offsets = [0, 1, 2, 0], sizes = [2, 8, 8, 4], strides = [1, 1, 1, 1]} : vector<2x10x10x4xf32> to vector<2x8x8x4xf32>
    %c0_27 = arith.constant 0 : index
    %c0_28 = arith.constant 0 : index
    %c0_29 = arith.constant 0 : index
    %c8_30 = arith.constant 8 : index
    %24 = vector.load %arg9[%c0_27, %c0_28, %c0_29, %c8_30] : memref<2x8x8x12xf32, #tpu.memory_space<vmem>>, vector<2x8x8x4xf32>
    tpu.vector_store %arg9[%c0_27, %c0_28, %c0_29, %c8_30], %23 {strides = array<i32>} : memref<2x8x8x12xf32, #tpu.memory_space<vmem>>, vector<2x8x8x4xf32>,
    %c0_31 = arith.constant 0 : index
    %c0_32 = arith.constant 0 : index
    %c0_33 = arith.constant 0 : index
    %c0_34 = arith.constant 0 : index
    %25 = vector.load %arg9[%c0_31, %c0_32, %c0_33, %c0_34] : memref<2x8x8x12xf32, #tpu.memory_space<vmem>>, vector<2x8x8x12xf32>
    %26 = vector.shape_cast %25 : vector<2x8x8x12xf32> to vector<128x12xf32>
    %27 = vector.extract_strided_slice %8 {offsets = [12, 0], sizes = [12, 8], strides = [1, 1]} : vector<36x8xf32> to vector<12x8xf32>
    %cst_35 = arith.constant dense<0.000000e+00> : vector<128x8xf32>
    %28 = tpu.matmul %26, %27, %cst_35 {dimension_numbers = #tpu.dot_dimension_numbers<[1], [0], [0], [1], [0, 0, 1, 1], [], []>} : vector<128x12xf32>, vector<12x8xf32>, vector<128x8xf32> -> vector<128x8xf32>
    %29 = arith.addf %18, %28 : vector<128x8xf32>
    %30 = vector.extract_strided_slice %7 {offsets = [0, 2, 0, 0], sizes = [2, 8, 8, 4], strides = [1, 1, 1, 1]} : vector<2x10x10x4xf32> to vector<2x8x8x4xf32>
    %c0_36 = arith.constant 0 : index
    %c0_37 = arith.constant 0 : index
    %c0_38 = arith.constant 0 : index
    %c0_39 = arith.constant 0 : index
    %31 = vector.load %arg9[%c0_36, %c0_37, %c0_38, %c0_39] : memref<2x8x8x12xf32, #tpu.memory_space<vmem>>, vector<2x8x8x4xf32>
    tpu.vector_store %arg9[%c0_36, %c0_37, %c0_38, %c0_39], %30 {strides = array<i32>} : memref<2x8x8x12xf32, #tpu.memory_space<vmem>>, vector<2x8x8x4xf32>,
    %32 = vector.extract_strided_slice %7 {offsets = [0, 2, 1, 0], sizes = [2, 8, 8, 4], strides = [1, 1, 1, 1]} : vector<2x10x10x4xf32> to vector<2x8x8x4xf32>
    %c0_40 = arith.constant 0 : index
    %c0_41 = arith.constant 0 : index
    %c0_42 = arith.constant 0 : index
    %c4_43 = arith.constant 4 : index
    %33 = vector.load %arg9[%c0_40, %c0_41, %c0_42, %c4_43] : memref<2x8x8x12xf32, #tpu.memory_space<vmem>>, vector<2x8x8x4xf32>
    tpu.vector_store %arg9[%c0_40, %c0_41, %c0_42, %c4_43], %32 {strides = array<i32>} : memref<2x8x8x12xf32, #tpu.memory_space<vmem>>, vector<2x8x8x4xf32>,
    %34 = vector.extract_strided_slice %7 {offsets = [0, 2, 2, 0], sizes = [2, 8, 8, 4], strides = [1, 1, 1, 1]} : vector<2x10x10x4xf32> to vector<2x8x8x4xf32>
    %c0_44 = arith.constant 0 : index
    %c0_45 = arith.constant 0 : index
    %c0_46 = arith.constant 0 : index
    %c8_47 = arith.constant 8 : index
    %35 = vector.load %arg9[%c0_44, %c0_45, %c0_46, %c8_47] : memref<2x8x8x12xf32, #tpu.memory_space<vmem>>, vector<2x8x8x4xf32>
    tpu.vector_store %arg9[%c0_44, %c0_45, %c0_46, %c8_47], %34 {strides = array<i32>} : memref<2x8x8x12xf32, #tpu.memory_space<vmem>>, vector<2x8x8x4xf32>,
    %c0_48 = arith.constant 0 : index
    %c0_49 = arith.constant 0 : index
    %c0_50 = arith.constant 0 : index
    %c0_51 = arith.constant 0 : index
    %36 = vector.load %arg9[%c0_48, %c0_49, %c0_50, %c0_51] : memref<2x8x8x12xf32, #tpu.memory_space<vmem>>, vector<2x8x8x12xf32>
    %37 = vector.shape_cast %36 : vector<2x8x8x12xf32> to vector<128x12xf32>
    %38 = vector.extract_strided_slice %8 {offsets = [24, 0], sizes = [12, 8], strides = [1, 1]} : vector<36x8xf32> to vector<12x8xf32>
    %cst_52 = arith.constant dense<0.000000e+00> : vector<128x8xf32>
    %39 = tpu.matmul %37, %38, %cst_52 {dimension_numbers = #tpu.dot_dimension_numbers<[1], [0], [0], [1], [0, 0, 1, 1], [], []>} : vector<128x12xf32>, vector<12x8xf32>, vector<128x8xf32> -> vector<128x8xf32>
    %40 = arith.addf %29, %39 : vector<128x8xf32>
    %c0_53 = arith.constant 0 : index
    %c0_54 = arith.constant 0 : index
    %41 = vector.load %arg3[%c0_53, %c0_54] : memref<1x8xf32, #tpu.memory_space<vmem>>, vector<1x8xf32>
    %42 = vector.broadcast %41 : vector<1x8xf32> to vector<128x8xf32>
    %43 = arith.mulf %40, %42 : vector<128x8xf32>
    %c0_55 = arith.constant 0 : index
    %c0_56 = arith.constant 0 : index
    %44 = vector.load %arg4[%c0_55, %c0_56] : memref<1x8xf32, #tpu.memory_space<vmem>>, vector<1x8xf32>
    %45 = vector.broadcast %44 : vector<1x8xf32> to vector<128x8xf32>
    %46 = arith.addf %43, %45 : vector<128x8xf32>
    %cst_57 = arith.constant 0.000000e+00 : f32
    %47 = vector.broadcast %cst_57 : f32 to vector<128x8xf32>
    %48 = arith.maximumf %46, %47 : vector<128x8xf32>
    %cst_58 = arith.constant 0.000000e+00 : f32
    %49 = vector.broadcast %cst_58 : f32 to vector<2x1x10x8xf32>
    %c0_59 = arith.constant 0 : index
    %c0_60 = arith.constant 0 : index
    %c0_61 = arith.constant 0 : index
    %c0_62 = arith.constant 0 : index
    %50 = vector.load %arg10[%c0_59, %c0_60, %c0_61, %c0_62] : memref<2x10x10x8xf32, #tpu.memory_space<vmem>>, vector<2x1x10x8xf32>
    tpu.vector_store %arg10[%c0_59, %c0_60, %c0_61, %c0_62], %49 {strides = array<i32>} : memref<2x10x10x8xf32, #tpu.memory_space<vmem>>, vector<2x1x10x8xf32>,
    %cst_63 = arith.constant 0.000000e+00 : f32
    %51 = vector.broadcast %cst_63 : f32 to vector<2x1x10x8xf32>
    %c0_64 = arith.constant 0 : index
    %c9 = arith.constant 9 : index
    %c0_65 = arith.constant 0 : index
    %c0_66 = arith.constant 0 : index
    %52 = vector.load %arg10[%c0_64, %c9, %c0_65, %c0_66] : memref<2x10x10x8xf32, #tpu.memory_space<vmem>>, vector<2x1x10x8xf32>
    tpu.vector_store %arg10[%c0_64, %c9, %c0_65, %c0_66], %51 {strides = array<i32>} : memref<2x10x10x8xf32, #tpu.memory_space<vmem>>, vector<2x1x10x8xf32>,
    %cst_67 = arith.constant 0.000000e+00 : f32
    %53 = vector.broadcast %cst_67 : f32 to vector<2x10x1x8xf32>
    %c0_68 = arith.constant 0 : index
    %c0_69 = arith.constant 0 : index
    %c0_70 = arith.constant 0 : index
    %c0_71 = arith.constant 0 : index
    %54 = vector.load %arg10[%c0_68, %c0_69, %c0_70, %c0_71] : memref<2x10x10x8xf32, #tpu.memory_space<vmem>>, vector<2x10x1x8xf32>
    tpu.vector_store %arg10[%c0_68, %c0_69, %c0_70, %c0_71], %53 {strides = array<i32>} : memref<2x10x10x8xf32, #tpu.memory_space<vmem>>, vector<2x10x1x8xf32>,
    %cst_72 = arith.constant 0.000000e+00 : f32
    %55 = vector.broadcast %cst_72 : f32 to vector<2x10x1x8xf32>
    %c0_73 = arith.constant 0 : index
    %c0_74 = arith.constant 0 : index
    %c9_75 = arith.constant 9 : index
    %c0_76 = arith.constant 0 : index
    %56 = vector.load %arg10[%c0_73, %c0_74, %c9_75, %c0_76] : memref<2x10x10x8xf32, #tpu.memory_space<vmem>>, vector<2x10x1x8xf32>
    tpu.vector_store %arg10[%c0_73, %c0_74, %c9_75, %c0_76], %55 {strides = array<i32>} : memref<2x10x10x8xf32, #tpu.memory_space<vmem>>, vector<2x10x1x8xf32>,
    %57 = vector.shape_cast %48 : vector<128x8xf32> to vector<2x8x8x8xf32>
    %c0_77 = arith.constant 0 : index
    %c1 = arith.constant 1 : index
    %c1_78 = arith.constant 1 : index
    %c0_79 = arith.constant 0 : index
    %58 = vector.load %arg10[%c0_77, %c1, %c1_78, %c0_79] : memref<2x10x10x8xf32, #tpu.memory_space<vmem>>, vector<2x8x8x8xf32>
    tpu.vector_store %arg10[%c0_77, %c1, %c1_78, %c0_79], %57 {strides = array<i32>} : memref<2x10x10x8xf32, #tpu.memory_space<vmem>>, vector<2x8x8x8xf32>,
    %c0_80 = arith.constant 0 : index
    %c0_81 = arith.constant 0 : index
    %59 = vector.load %arg5[%c0_80, %c0_81] : memref<72x8xf32, #tpu.memory_space<vmem>>, vector<72x8xf32>
    %c0_82 = arith.constant 0 : index
    %c0_83 = arith.constant 0 : index
    %c0_84 = arith.constant 0 : index
    %c0_85 = arith.constant 0 : index
    %60 = vector.load %arg10[%c0_82, %c0_83, %c0_84, %c0_85] : memref<2x10x10x8xf32, #tpu.memory_space<vmem>>, vector<2x8x8x8xf32>
    %c0_86 = arith.constant 0 : index
    %c0_87 = arith.constant 0 : index
    %c0_88 = arith.constant 0 : index
    %c0_89 = arith.constant 0 : index
    %61 = vector.load %arg11[%c0_86, %c0_87, %c0_88, %c0_89] : memref<2x8x8x24xf32, #tpu.memory_space<vmem>>, vector<2x8x8x8xf32>
    tpu.vector_store %arg11[%c0_86, %c0_87, %c0_88, %c0_89], %60 {strides = array<i32>} : memref<2x8x8x24xf32, #tpu.memory_space<vmem>>, vector<2x8x8x8xf32>,
    %c0_90 = arith.constant 0 : index
    %c0_91 = arith.constant 0 : index
    %c1_92 = arith.constant 1 : index
    %c0_93 = arith.constant 0 : index
    %62 = vector.load %arg10[%c0_90, %c0_91, %c1_92, %c0_93] : memref<2x10x10x8xf32, #tpu.memory_space<vmem>>, vector<2x8x8x8xf32>
    %c0_94 = arith.constant 0 : index
    %c0_95 = arith.constant 0 : index
    %c0_96 = arith.constant 0 : index
    %c8_97 = arith.constant 8 : index
    %63 = vector.load %arg11[%c0_94, %c0_95, %c0_96, %c8_97] : memref<2x8x8x24xf32, #tpu.memory_space<vmem>>, vector<2x8x8x8xf32>
    tpu.vector_store %arg11[%c0_94, %c0_95, %c0_96, %c8_97], %62 {strides = array<i32>} : memref<2x8x8x24xf32, #tpu.memory_space<vmem>>, vector<2x8x8x8xf32>,
    %c0_98 = arith.constant 0 : index
    %c0_99 = arith.constant 0 : index
    %c2 = arith.constant 2 : index
    %c0_100 = arith.constant 0 : index
    %64 = vector.load %arg10[%c0_98, %c0_99, %c2, %c0_100] : memref<2x10x10x8xf32, #tpu.memory_space<vmem>>, vector<2x8x8x8xf32>
    %c0_101 = arith.constant 0 : index
    %c0_102 = arith.constant 0 : index
    %c0_103 = arith.constant 0 : index
    %c16 = arith.constant 16 : index
    %65 = vector.load %arg11[%c0_101, %c0_102, %c0_103, %c16] : memref<2x8x8x24xf32, #tpu.memory_space<vmem>>, vector<2x8x8x8xf32>
    tpu.vector_store %arg11[%c0_101, %c0_102, %c0_103, %c16], %64 {strides = array<i32>} : memref<2x8x8x24xf32, #tpu.memory_space<vmem>>, vector<2x8x8x8xf32>,
    %c0_104 = arith.constant 0 : index
    %c0_105 = arith.constant 0 : index
    %c0_106 = arith.constant 0 : index
    %c0_107 = arith.constant 0 : index
    %66 = vector.load %arg11[%c0_104, %c0_105, %c0_106, %c0_107] : memref<2x8x8x24xf32, #tpu.memory_space<vmem>>, vector<2x8x8x24xf32>
    %67 = vector.shape_cast %66 : vector<2x8x8x24xf32> to vector<128x24xf32>
    %68 = vector.extract_strided_slice %59 {offsets = [0, 0], sizes = [24, 8], strides = [1, 1]} : vector<72x8xf32> to vector<24x8xf32>
    %cst_108 = arith.constant dense<0.000000e+00> : vector<128x8xf32>
    %69 = tpu.matmul %67, %68, %cst_108 {dimension_numbers = #tpu.dot_dimension_numbers<[1], [0], [0], [1], [0, 0, 1, 1], [], []>} : vector<128x24xf32>, vector<24x8xf32>, vector<128x8xf32> -> vector<128x8xf32>
    %c0_109 = arith.constant 0 : index
    %c1_110 = arith.constant 1 : index
    %c0_111 = arith.constant 0 : index
    %c0_112 = arith.constant 0 : index
    %70 = vector.load %arg10[%c0_109, %c1_110, %c0_111, %c0_112] : memref<2x10x10x8xf32, #tpu.memory_space<vmem>>, vector<2x8x8x8xf32>
    %c0_113 = arith.constant 0 : index
    %c0_114 = arith.constant 0 : index
    %c0_115 = arith.constant 0 : index
    %c0_116 = arith.constant 0 : index
    %71 = vector.load %arg11[%c0_113, %c0_114, %c0_115, %c0_116] : memref<2x8x8x24xf32, #tpu.memory_space<vmem>>, vector<2x8x8x8xf32>
    tpu.vector_store %arg11[%c0_113, %c0_114, %c0_115, %c0_116], %70 {strides = array<i32>} : memref<2x8x8x24xf32, #tpu.memory_space<vmem>>, vector<2x8x8x8xf32>,
    %c0_117 = arith.constant 0 : index
    %c1_118 = arith.constant 1 : index
    %c1_119 = arith.constant 1 : index
    %c0_120 = arith.constant 0 : index
    %72 = vector.load %arg10[%c0_117, %c1_118, %c1_119, %c0_120] : memref<2x10x10x8xf32, #tpu.memory_space<vmem>>, vector<2x8x8x8xf32>
    %c0_121 = arith.constant 0 : index
    %c0_122 = arith.constant 0 : index
    %c0_123 = arith.constant 0 : index
    %c8_124 = arith.constant 8 : index
    %73 = vector.load %arg11[%c0_121, %c0_122, %c0_123, %c8_124] : memref<2x8x8x24xf32, #tpu.memory_space<vmem>>, vector<2x8x8x8xf32>
    tpu.vector_store %arg11[%c0_121, %c0_122, %c0_123, %c8_124], %72 {strides = array<i32>} : memref<2x8x8x24xf32, #tpu.memory_space<vmem>>, vector<2x8x8x8xf32>,
    %c0_125 = arith.constant 0 : index
    %c1_126 = arith.constant 1 : index
    %c2_127 = arith.constant 2 : index
    %c0_128 = arith.constant 0 : index
    %74 = vector.load %arg10[%c0_125, %c1_126, %c2_127, %c0_128] : memref<2x10x10x8xf32, #tpu.memory_space<vmem>>, vector<2x8x8x8xf32>
    %c0_129 = arith.constant 0 : index
    %c0_130 = arith.constant 0 : index
    %c0_131 = arith.constant 0 : index
    %c16_132 = arith.constant 16 : index
    %75 = vector.load %arg11[%c0_129, %c0_130, %c0_131, %c16_132] : memref<2x8x8x24xf32, #tpu.memory_space<vmem>>, vector<2x8x8x8xf32>
    tpu.vector_store %arg11[%c0_129, %c0_130, %c0_131, %c16_132], %74 {strides = array<i32>} : memref<2x8x8x24xf32, #tpu.memory_space<vmem>>, vector<2x8x8x8xf32>,
    %c0_133 = arith.constant 0 : index
    %c0_134 = arith.constant 0 : index
    %c0_135 = arith.constant 0 : index
    %c0_136 = arith.constant 0 : index
    %76 = vector.load %arg11[%c0_133, %c0_134, %c0_135, %c0_136] : memref<2x8x8x24xf32, #tpu.memory_space<vmem>>, vector<2x8x8x24xf32>
    %77 = vector.shape_cast %76 : vector<2x8x8x24xf32> to vector<128x24xf32>
    %78 = vector.extract_strided_slice %59 {offsets = [24, 0], sizes = [24, 8], strides = [1, 1]} : vector<72x8xf32> to vector<24x8xf32>
    %cst_137 = arith.constant dense<0.000000e+00> : vector<128x8xf32>
    %79 = tpu.matmul %77, %78, %cst_137 {dimension_numbers = #tpu.dot_dimension_numbers<[1], [0], [0], [1], [0, 0, 1, 1], [], []>} : vector<128x24xf32>, vector<24x8xf32>, vector<128x8xf32> -> vector<128x8xf32>
    %80 = arith.addf %69, %79 : vector<128x8xf32>
    %c0_138 = arith.constant 0 : index
    %c2_139 = arith.constant 2 : index
    %c0_140 = arith.constant 0 : index
    %c0_141 = arith.constant 0 : index
    %81 = vector.load %arg10[%c0_138, %c2_139, %c0_140, %c0_141] : memref<2x10x10x8xf32, #tpu.memory_space<vmem>>, vector<2x8x8x8xf32>
    %c0_142 = arith.constant 0 : index
    %c0_143 = arith.constant 0 : index
    %c0_144 = arith.constant 0 : index
    %c0_145 = arith.constant 0 : index
    %82 = vector.load %arg11[%c0_142, %c0_143, %c0_144, %c0_145] : memref<2x8x8x24xf32, #tpu.memory_space<vmem>>, vector<2x8x8x8xf32>
    tpu.vector_store %arg11[%c0_142, %c0_143, %c0_144, %c0_145], %81 {strides = array<i32>} : memref<2x8x8x24xf32, #tpu.memory_space<vmem>>, vector<2x8x8x8xf32>,
    %c0_146 = arith.constant 0 : index
    %c2_147 = arith.constant 2 : index
    %c1_148 = arith.constant 1 : index
    %c0_149 = arith.constant 0 : index
    %83 = vector.load %arg10[%c0_146, %c2_147, %c1_148, %c0_149] : memref<2x10x10x8xf32, #tpu.memory_space<vmem>>, vector<2x8x8x8xf32>
    %c0_150 = arith.constant 0 : index
    %c0_151 = arith.constant 0 : index
    %c0_152 = arith.constant 0 : index
    %c8_153 = arith.constant 8 : index
    %84 = vector.load %arg11[%c0_150, %c0_151, %c0_152, %c8_153] : memref<2x8x8x24xf32, #tpu.memory_space<vmem>>, vector<2x8x8x8xf32>
    tpu.vector_store %arg11[%c0_150, %c0_151, %c0_152, %c8_153], %83 {strides = array<i32>} : memref<2x8x8x24xf32, #tpu.memory_space<vmem>>, vector<2x8x8x8xf32>,
    %c0_154 = arith.constant 0 : index
    %c2_155 = arith.constant 2 : index
    %c2_156 = arith.constant 2 : index
    %c0_157 = arith.constant 0 : index
    %85 = vector.load %arg10[%c0_154, %c2_155, %c2_156, %c0_157] : memref<2x10x10x8xf32, #tpu.memory_space<vmem>>, vector<2x8x8x8xf32>
    %c0_158 = arith.constant 0 : index
    %c0_159 = arith.constant 0 : index
    %c0_160 = arith.constant 0 : index
    %c16_161 = arith.constant 16 : index
    %86 = vector.load %arg11[%c0_158, %c0_159, %c0_160, %c16_161] : memref<2x8x8x24xf32, #tpu.memory_space<vmem>>, vector<2x8x8x8xf32>
    tpu.vector_store %arg11[%c0_158, %c0_159, %c0_160, %c16_161], %85 {strides = array<i32>} : memref<2x8x8x24xf32, #tpu.memory_space<vmem>>, vector<2x8x8x8xf32>,
    %c0_162 = arith.constant 0 : index
    %c0_163 = arith.constant 0 : index
    %c0_164 = arith.constant 0 : index
    %c0_165 = arith.constant 0 : index
    %87 = vector.load %arg11[%c0_162, %c0_163, %c0_164, %c0_165] : memref<2x8x8x24xf32, #tpu.memory_space<vmem>>, vector<2x8x8x24xf32>
    %88 = vector.shape_cast %87 : vector<2x8x8x24xf32> to vector<128x24xf32>
    %89 = vector.extract_strided_slice %59 {offsets = [48, 0], sizes = [24, 8], strides = [1, 1]} : vector<72x8xf32> to vector<24x8xf32>
    %cst_166 = arith.constant dense<0.000000e+00> : vector<128x8xf32>
    %90 = tpu.matmul %88, %89, %cst_166 {dimension_numbers = #tpu.dot_dimension_numbers<[1], [0], [0], [1], [0, 0, 1, 1], [], []>} : vector<128x24xf32>, vector<24x8xf32>, vector<128x8xf32> -> vector<128x8xf32>
    %91 = arith.addf %80, %90 : vector<128x8xf32>
    %c0_167 = arith.constant 0 : index
    %c0_168 = arith.constant 0 : index
    %92 = vector.load %arg6[%c0_167, %c0_168] : memref<1x8xf32, #tpu.memory_space<vmem>>, vector<1x8xf32>
    %93 = vector.broadcast %92 : vector<1x8xf32> to vector<128x8xf32>
    %94 = arith.mulf %91, %93 : vector<128x8xf32>
    %c0_169 = arith.constant 0 : index
    %c0_170 = arith.constant 0 : index
    %95 = vector.load %arg7[%c0_169, %c0_170] : memref<1x8xf32, #tpu.memory_space<vmem>>, vector<1x8xf32>
    %96 = vector.broadcast %95 : vector<1x8xf32> to vector<128x8xf32>
    %97 = arith.addf %94, %96 : vector<128x8xf32>
    %cst_171 = arith.constant 0.000000e+00 : f32
    %98 = vector.broadcast %cst_171 : f32 to vector<128x8xf32>
    %99 = arith.maximumf %97, %98 : vector<128x8xf32>
    %c0_172 = arith.constant 0 : index
    %c0_173 = arith.constant 0 : index
    %100 = vector.load %arg8[%c0_172, %c0_173] : memref<128x8xf32, #tpu.memory_space<vmem>>, vector<128x8xf32>
    tpu.vector_store %arg8[%c0_172, %c0_173], %99 {strides = array<i32>} : memref<128x8xf32, #tpu.memory_space<vmem>>, vector<128x8xf32>,
    return
  }
  func.func @transform_0(%arg0: i32) -> (i32, i32, i32, i32) {
    %c0_i32 = arith.constant 0 : i32
    %c0_i32_0 = arith.constant 0 : i32
    %c0_i32_1 = arith.constant 0 : i32
    %c0_i32_2 = arith.constant 0 : i32
    return %arg0, %c0_i32, %c0_i32_0, %c0_i32_1 : i32, i32, i32, i32
  }
  func.func @transform_1(%arg0: i32) -> (i32, i32) {
    %c0_i32 = arith.constant 0 : i32
    %c0_i32_0 = arith.constant 0 : i32
    %c0_i32_1 = arith.constant 0 : i32
    return %c0_i32, %c0_i32_0 : i32, i32
  }
  func.func @transform_2(%arg0: i32) -> (i32, i32) {
    %c0_i32 = arith.constant 0 : i32
    %c0_i32_0 = arith.constant 0 : i32
    %c0_i32_1 = arith.constant 0 : i32
    return %c0_i32, %c0_i32_0 : i32, i32
  }
  func.func @transform_3(%arg0: i32) -> (i32, i32) {
    %c0_i32 = arith.constant 0 : i32
    %c0_i32_0 = arith.constant 0 : i32
    %c0_i32_1 = arith.constant 0 : i32
    return %c0_i32, %c0_i32_0 : i32, i32
  }
  func.func @transform_4(%arg0: i32) -> (i32, i32) {
    %c0_i32 = arith.constant 0 : i32
    %c0_i32_0 = arith.constant 0 : i32
    %c0_i32_1 = arith.constant 0 : i32
    return %c0_i32, %c0_i32_0 : i32, i32
  }
  func.func @transform_5(%arg0: i32) -> (i32, i32) {
    %c0_i32 = arith.constant 0 : i32
    %c0_i32_0 = arith.constant 0 : i32
    %c0_i32_1 = arith.constant 0 : i32
    return %c0_i32, %c0_i32_0 : i32, i32
  }
  func.func @transform_6(%arg0: i32) -> (i32, i32) {
    %c0_i32 = arith.constant 0 : i32
    %c0_i32_0 = arith.constant 0 : i32
    %c0_i32_1 = arith.constant 0 : i32
    return %c0_i32, %c0_i32_0 : i32, i32
  }
  func.func @transform_7(%arg0: i32) -> (i32, i32) {
    %c0_i32 = arith.constant 0 : i32
    %c0_i32_0 = arith.constant 0 : i32
    return %arg0, %c0_i32 : i32, i32
  }
}

</mosaic_0001>

<bundles_post_ra>
// kernel: tpu_custom_call.1
= control target key start
LH: loop header
LB: loop body
LE: loop exit
PB: predicated region body
PF: predicated region fallthrough
CT: control target
= control target key end

     0   :  { %s2820_s30 = smov 124   ;;  %s2821_s16 = smov 120   ;;  %vm471_vm0 = vcmask 31744   ;;  %vm616_vm1 = vcmask 64545   ;;  %vm746_vm2 = vcmask 97346   ;;  %vm922_vm3 = vcmask 1043456   ;;  %s4698_s0 = inlined_call_operand.vmem [shape: f32[2,10,10,16], index: 0, kind: input, shape index: {}]   ;;  %s4699_s1 = inlined_call_operand.vmem [shape: f32[36,8], index: 1, kind: input, shape index: {}]   ;;  %s4700_s2 = inlined_call_operand.vmem [shape: f32[1,8], index: 2, kind: input, shape index: {}]   ;;  %s4701_s3 = inlined_call_operand.vmem [shape: f32[1,8], index: 3, kind: input, shape index: {}]   ;;  %s4702_s4 = inlined_call_operand.vmem [shape: f32[72,8], index: 4, kind: input, shape index: {}]   ;;  %s4703_s5 = inlined_call_operand.vmem [shape: f32[1,8], index: 5, kind: input, shape index: {}]   ;;  %s4704_s6 = inlined_call_operand.vmem [shape: f32[1,8], index: 6, kind: input, shape index: {}]   ;;  %s4705_s7 = inlined_call_operand.vmem [shape: f32[128,8], index: 7, kind: output, shape index: {}]  }
   0x1   :  { %v2869_v0 = vld [vmem:[%s4698_s0 + $0x20] sm:$0xff]  ;;  %v2874_v1 = vld [vmem:[%s4698_s0 + $0x10] sm:$0xff]  ;;  %v2890_v3 = vld [vmem:[%s4698_s0 + $0x28] sm:$0x3]  ;;  %s2823_s17 = smov 4   ;;  %vm618_vm4 = vcmask 57376  }
   0x2   :  { %v2879_v2 = vld [vmem:[%s4698_s0] sm:$0xff]  ;;  %114 = vrot.lane.b32.xlu2 %v2869_v0, %s2820_s30  ;;  %110 = vrot.lane.b32.xlu1 %v2874_v1, %s2820_s30  ;;  %v2895_v4 = vld [vmem:[%s4698_s0 + $0x18] sm:$0x3]  ;;  %vm748_vm5 = vcmask 91200   ;;  %vm927_vm6 = vcmask 97280   ;;  %vm1470_vm7 = vcmask 64512  }
   0x3   :  { %106 = vrot.lane.b32.xlu0 %v2879_v2, %s2820_s30  ;;  %v2900_v5 = vld [vmem:[%s4698_s0 + $0x8] sm:$0x3]  ;;  %v2911_v6 = vld [vmem:[%s4698_s0 + $0x40] sm:$0xff]  ;;  %v2916_v7 = vld [vmem:[%s4698_s0 + $0x38] sm:$0x3]  ;;  %vm1472_vm8 = vcmask 58368  }
   0x4   :  { %v2921_v8 = vld [vmem:[%s4698_s0 + $0x30] sm:$0xff]  ;;  %v2932_v9 = vld [vmem:[%s4698_s0 + $0x58] sm:$0x3]  ;;  %v2942_v11 = vld [vmem:[%s4698_s0 + $0x48] sm:$0x3]  ;;  %vm1481_vm9 = vcmask 57344  }
   0x5   :  { %v2937_v10 = vld [vmem:[%s4698_s0 + $0x50] sm:$0xff]  ;;  %v2958_v13 = vld [vmem:[%s4698_s0 + $0x68] sm:$0x3]  ;;  %v2963_v14 = vld [vmem:[%s4698_s0 + $0x60] sm:$0xff]  ;;  %s2825_s12 = smov 16   ;;  %vm1660_vm10 = vcmask 130112  }
   0x6   :  { %v2953_v12 = vld [vmem:[%s4698_s0 + $0x70] sm:$0xff]  ;;  %v2974_v15 = vld [vmem:[%s4698_s0 + $0x88] sm:$0x3]  ;;  %v2979_v16 = vld [vmem:[%s4698_s0 + $0x80] sm:$0xff]  ;;  %vm1757_vm11 = vcmask 195712   ;;  %vm2030_vm12 = vcmask 195584  }
   0x7   :  { %v2984_v17 = vld [vmem:[%s4698_s0 + $0x78] sm:$0x3]  ;;  %v2995_v18 = vld [vmem:[%s4698_s0 + $0xa0] sm:$0xff]  ;;  %v3005_v20 = vld [vmem:[%s4698_s0 + $0x90] sm:$0xff] }
   0x8   :  { %v3000_v19 = vld [vmem:[%s4698_s0 + $0x98] sm:$0x3]  ;;  %v3016_v21 = vld [vmem:[%s4698_s0 + $0xb0] sm:$0xff]  ;;  %v3026_v23 = vld [vmem:[%s4698_s0 + $0xa8] sm:$0x3] }
   0x9   :  { %v3021_v22 = vld [vmem:[%s4698_s0 + $0xb8] sm:$0x3]  ;;  %v3037_v24 = vld [vmem:[%s4698_s0 + $0xc8] sm:$0x3]  ;;  %v3042_v25 = vld [vmem:[%s4698_s0 + $0xd0] sm:$0xff] }
   0xa   :  { %116 = vrot.lane.b32.xlu2 %v2890_v3, %s2820_s30  ;;  %112 = vrot.lane.b32.xlu1 %v2895_v4, %s2820_s30  ;;  %v3047_v26 = vld [vmem:[%s4698_s0 + $0xc0] sm:$0xff]  ;;  %v3063_v28 = vld [vmem:[%s4698_s0 + $0xe8] sm:$0x3] }
   0xb   :  { %108 = vrot.lane.b32.xlu0 %v2900_v5, %s2820_s30  ;;  %v3058_v27 = vld [vmem:[%s4698_s0 + $0xe0] sm:$0xff]  ;;  %v3068_v29 = vld [vmem:[%s4698_s0 + $0xd8] sm:$0x3]  ;;  %v3089_v32 = vld [vmem:[%s4698_s0 + $0xf0] sm:$0xff] }
   0xc   :  { %v3079_v30 = vld [vmem:[%s4698_s0 + $0xf8] sm:$0x3]  ;;  %v3084_v31 = vld [vmem:[%s4698_s0 + $0x100] sm:$0xff]  ;;  %v3100_v33 = vld [vmem:[%s4698_s0 + $0x110] sm:$0xff] }
   0xd   :  { %v3105_v34 = vld [vmem:[%s4698_s0 + $0x118] sm:$0x3]  ;;  %v3110_v35 = vld [vmem:[%s4698_s0 + $0x108] sm:$0x3]  ;;  %v64_v38 = vld [vmem:[%s4698_s0 + $0x130] sm:$0xff] }
   0xe   :  { %v3121_v37 = vld [vmem:[%s4698_s0 + $0x128] sm:$0x3]  ;;  %v3129_v39 = vld [vmem:[%s4698_s0 + $0x120] sm:$0xff]  ;;  %v65_v41 = vld [vmem:[%s4698_s0 + $0x138] sm:$0x3] }
  0x12   :  { %122 = vrot.lane.b32.xlu2 %v2911_v6, %s2820_s30  ;;  %120 = vrot.lane.b32.xlu1 %v2916_v7, %s2820_s30 }
  0x13   :  { %118 = vrot.lane.b32.xlu0 %v2921_v8, %s2820_s30 }
  0x1a   :  { %128 = vrot.lane.b32.xlu2 %v2932_v9, %s2820_s30  ;;  %126 = vrot.lane.b32.xlu1 %v2937_v10, %s2820_s30 }
  0x1b   :  { %124 = vrot.lane.b32.xlu0 %v2942_v11, %s2820_s30 }
  0x22   :  { %134 = vrot.lane.b32.xlu2 %v2953_v12, %s2820_s30  ;;  %132 = vrot.lane.b32.xlu1 %v2958_v13, %s2820_s30 }
  0x23   :  { %130 = vrot.lane.b32.xlu0 %v2963_v14, %s2820_s30 }
  0x2a   :  { %140 = vrot.lane.b32.xlu2 %v2974_v15, %s2820_s30  ;;  %138 = vrot.lane.b32.xlu1 %v2979_v16, %s2820_s30 }
  0x2b   :  { %136 = vrot.lane.b32.xlu0 %v2984_v17, %s2820_s30 }
  0x32   :  { %146 = vrot.lane.b32.xlu2 %v2995_v18, %s2820_s30  ;;  %144 = vrot.lane.b32.xlu1 %v3000_v19, %s2820_s30 }
  0x33   :  { %142 = vrot.lane.b32.xlu0 %v3005_v20, %s2820_s30 }
  0x3a   :  { %150 = vrot.lane.b32.xlu1 %v3016_v21, %s2820_s30  ;;  %152 = vrot.lane.b32.xlu2 %v3021_v22, %s2820_s30 }
  0x3b   :  { %148 = vrot.lane.b32.xlu0 %v3026_v23, %s2820_s30 }
  0x42   :  { %156 = vrot.lane.b32.xlu1 %v3037_v24, %s2820_s30  ;;  %158 = vrot.lane.b32.xlu2 %v3042_v25, %s2820_s30 }
  0x43   :  { %154 = vrot.lane.b32.xlu0 %v3047_v26, %s2820_s30 }
  0x4a   :  { %162 = vrot.lane.b32.xlu1 %v3058_v27, %s2820_s30  ;;  %164 = vrot.lane.b32.xlu2 %v3063_v28, %s2820_s30 }
  0x4b   :  { %160 = vrot.lane.b32.xlu0 %v3068_v29, %s2820_s30 }
  0x52   :  { %168 = vrot.lane.b32.xlu1 %v3079_v30, %s2820_s30  ;;  %170 = vrot.lane.b32.xlu2 %v3084_v31, %s2820_s30 }
  0x53   :  { %166 = vrot.lane.b32.xlu0 %v3089_v32, %s2820_s30 }
  0x5a   :  { %174 = vrot.lane.b32.xlu1 %v3100_v33, %s2820_s30  ;;  %176 = vrot.lane.b32.xlu2 %v3105_v34, %s2820_s30 }
  0x5b   :  { %172 = vrot.lane.b32.xlu0 %v3110_v35, %s2820_s30 }
  0x5c   :  { %v115_v36 = vpop.permute.xlu2 %114 }
  0x5d   :  { %v3172_v57 = vmax.f32 %v2869_v0, %v115_v36 }
  0x62   :  { %180 = vrot.lane.b32.xlu1 %v3121_v37, %s2820_s30  ;;  %182 = vrot.lane.b32.xlu2 %v64_v38, %s2820_s30 }
  0x63   :  { %178 = vrot.lane.b32.xlu0 %v3129_v39, %s2820_s30 }
  0x64   :  { %v117_v40 = vpop.permute.xlu2 %116 }
  0x65   :  { %v3153_v48 = vmax.f32 %v2890_v3, %v117_v40 }
  0x6b   :  { %184 = vrot.lane.b32.xlu0 %v65_v41, %s2820_s30  ;;  %s2822_s30 = smov 8  }
  0x6c   :  { %v123_v42 = vpop.permute.xlu2 %122 }
  0x74   :  { %v3140_v43 = vpop.permute.xlu2 %128  ;;  %v111_v44 = vpop.permute.xlu1 %110 }
  0x75   :  { %v3143_v45 = vmax.f32 %v2874_v1, %v111_v44  ;;  %v107_v46 = vpop.permute.xlu0 %106 }
  0x76   :  { %v3146_v47 = vmax.f32 %v2879_v2, %v107_v46  ;;  %v3196_v2 = vmax.f32 %v2911_v6, %v123_v42 }
  0x77   :  { %310 = vrot.lane.b32.xlu0 %v3143_v45, %s2821_s16 }
  0x78   :  { %306 = vrot.lane.b32.xlu1 %v3146_v47, %s2821_s16 }
  0x7c   :  { %v3155_v49 = vpop.permute.xlu2 %134  ;;  %v113_v50 = vpop.permute.xlu1 %112 }
  0x7d   :  { %v3158_v51 = vmax.f32 %v2895_v4, %v113_v50  ;;  %v109_v52 = vpop.permute.xlu0 %108 }
  0x7e   :  { %v3161_v53 = vmax.f32 %v2900_v5, %v109_v52 }
  0x7f   :  { %316 = vrot.lane.b32.xlu0 %v3153_v48, %s2821_s16 }
  0x80   :  { %312 = vrot.lane.b32.xlu1 %v3158_v51, %s2821_s16  ;;  %308 = vrot.lane.b32.xlu2 %v3161_v53, %s2821_s16 }
  0x84   :  { %v3169_v54 = vpop.permute.xlu2 %140  ;;  %v121_v55 = vpop.permute.xlu1 %120 }
  0x85   :  { %v119_v56 = vpop.permute.xlu0 %118  ;;  %v3182_v59 = vmax.f32 %v2916_v7, %v121_v55 }
  0x86   :  { %v3175_v58 = vmax.f32 %v2921_v8, %v119_v56 }
  0x88   :  { %314 = vrot.lane.b32.xlu2 %v3172_v57, %s2821_s16  ;;  %318 = vrot.lane.b32.xlu1 %v3175_v58, %s2821_s16 }
  0x8c   :  { %v147_v60 = vpop.permute.xlu2 %146  ;;  %v127_v61 = vpop.permute.xlu1 %126 }
  0x8d   :  { %v3185_v62 = vmax.f32 %v2995_v18, %v147_v60  ;;  %v125_v63 = vpop.permute.xlu0 %124 }
  0x8f   :  { %346 = vrot.lane.b32.xlu0 %v3185_v62, %s2821_s16 }
  0x90   :  { %320 = vrot.lane.b32.xlu2 %v3182_v59, %s2821_s16 }
  0x94   :  { %v3191_v0 = vpop.permute.xlu1 %132  ;;  %v153_v5 = vpop.permute.xlu2 %152 }
  0x95   :  { %v3193_v1 = vpop.permute.xlu0 %130  ;;  %v3219_v42 = vmax.f32 %v3021_v22, %v153_v5 }
  0x98   :  { %322 = vrot.lane.b32.xlu2 %v3196_v2, %s2821_s16 }
  0x9c   :  { %v3200_v3 = vpop.permute.xlu1 %138  ;;  %v159_v18 = vpop.permute.xlu2 %158 }
  0x9d   :  { %v3202_v4 = vpop.permute.xlu0 %136  ;;  %v3234_v22 = vmax.f32 %v3042_v25, %v159_v18 }
  0xa4   :  { %v3204_v7 = vpop.permute.xlu1 %144  ;;  %v165_v41 = vpop.permute.xlu2 %164 }
  0xa5   :  { %v3206_v8 = vpop.permute.xlu0 %142  ;;  %v3252_v56 = vmax.f32 %v3063_v28, %v165_v41 }
  0xac   :  { %v151_v36 = vpop.permute.xlu1 %150 }
  0xad   :  { %v3209_v38 = vmax.f32 %v3016_v21, %v151_v36  ;;  %v149_v40 = vpop.permute.xlu0 %148 }
  0xae   :  { %v3212_v6 = vmax.f32 %v3026_v23, %v149_v40  ;;  %v171_v23 = vpop.permute.xlu2 %170 }
  0xaf   :  { %350 = vrot.lane.b32.xlu0 %v3209_v38, %s2821_s16 }
  0xb0   :  { %348 = vrot.lane.b32.xlu1 %v3212_v6, %s2821_s16 }
  0xb4   :  { %v157_v44 = vpop.permute.xlu1 %156 }
  0xb5   :  { %v3222_v46 = vmax.f32 %v3037_v24, %v157_v44  ;;  %v155_v21 = vpop.permute.xlu0 %154  ;;  %v3237_v24 = vmax.f32 %v2942_v11, %v125_v63 }
  0xb6   :  { %v3225_v50 = vmax.f32 %v3047_v26, %v155_v21  ;;  %v177_v60 = vpop.permute.xlu2 %176 }
  0xb7   :  { %356 = vrot.lane.b32.xlu0 %v3222_v46, %s2821_s16 }
  0xb8   :  { %352 = vrot.lane.b32.xlu1 %v3219_v42, %s2821_s16  ;;  %354 = vrot.lane.b32.xlu2 %v3225_v50, %s2821_s16 }
  0xbc   :  { %v163_v55 = vpop.permute.xlu1 %162 }
  0xbd   :  { %v161_v52 = vpop.permute.xlu0 %160  ;;  %v3249_v25 = vmax.f32 %v3058_v27, %v163_v55 }
  0xbe   :  { %v3240_v26 = vmax.f32 %v3068_v29, %v161_v52  ;;  %v3255_v29 = vmax.f32 %v2937_v10, %v127_v61  ;;  %v3273_v10 = vpop.permute.xlu2 %182  ;;  %v3276_v61 = vmax.f32 %v3084_v31, %v171_v23  ;;  %v3293_v31 = vmax.f32 %v3105_v34, %v177_v60 }
  0xc0   :  { %324 = vrot.lane.b32.xlu1 %v3237_v24, %s2821_s16  ;;  %358 = vrot.lane.b32.xlu2 %v3234_v22, %s2821_s16 }
  0xc1   :  { %360 = vrot.lane.b32.xlu0 %v3240_v26, %s2821_s16 }
  0xc4   :  { %v169_v63 = vpop.permute.xlu1 %168 }
  0xc5   :  { %v167_v11 = vpop.permute.xlu0 %166  ;;  %v3267_v28 = vmax.f32 %v3079_v30, %v169_v63 }
  0xc6   :  { %v3264_v27 = vmax.f32 %v3089_v32, %v167_v11 }
  0xc8   :  { %326 = vrot.lane.b32.xlu1 %v3255_v29, %s2821_s16  ;;  %362 = vrot.lane.b32.xlu2 %v3249_v25, %s2821_s16 }
  0xc9   :  { %364 = vrot.lane.b32.xlu0 %v3252_v56, %s2821_s16 }
  0xcc   :  { %v175_v30 = vpop.permute.xlu1 %174 }
  0xcd   :  { %v173_v5 = vpop.permute.xlu0 %172 }
  0xce   :  { %v3279_v18 = vmax.f32 %v3110_v35, %v173_v5  ;;  %v3296_v35 = vmax.f32 %v3100_v33, %v175_v30 }
  0xd0   :  { %368 = vrot.lane.b32.xlu2 %v3267_v28, %s2821_s16  ;;  %366 = vrot.lane.b32.xlu1 %v3264_v27, %s2821_s16 }
  0xd4   :  { %v181_v41 = vpop.permute.xlu1 %180 }
  0xd5   :  { %v179_v32 = vpop.permute.xlu0 %178  ;;  %v3308_v34 = vmax.f32 %v3121_v37, %v181_v41 }
  0xd6   :  { %v3282_v36 = vmax.f32 %v3129_v39, %v179_v32 }
  0xd8   :  { %370 = vrot.lane.b32.xlu1 %v3276_v61, %s2821_s16  ;;  %372 = vrot.lane.b32.xlu2 %v3279_v18, %s2821_s16 }
  0xd9   :  { %378 = vrot.lane.b32.xlu0 %v3282_v36, %s2821_s16 }
  0xda   :  { %v3290_v40 = vpop.permute.xlu2 %308 }
  0xdd   :  { %v3298_v39 = vpop.permute.xlu0 %184 }
  0xe0   :  { %374 = vrot.lane.b32.xlu1 %v3296_v35, %s2821_s16  ;;  %376 = vrot.lane.b32.xlu2 %v3293_v31, %s2821_s16 }
  0xe2   :  { %v315_v44 = vpop.permute.xlu2 %314 }
  0xe3   :  { %v3305_v21 = vmax.f32 %v3172_v57, %v315_v44 }
  0xe5   :  { %474 = vst.msk [vmem:[#allocation2 + $0x10] sm:$0xff] %vm471_vm0, %v3305_v21 }
  0xe8   :  { %380 = vrot.lane.b32.xlu1 %v3308_v34, %s2821_s16 }
  0xe9   :  { %v311_v33 = vpop.permute.xlu0 %310 }
  0xea   :  { %v307_v23 = vpop.permute.xlu1 %306  ;;  %v3314_v52 = vpop.permute.xlu2 %320  ;;  %v3317_v55 = vmax.f32 %v3143_v45, %v311_v33 }
  0xeb   :  { %v3320_v11 = vmax.f32 %v3146_v47, %v307_v23 }
  0xec   :  { %473 = vst.msk [vmem:[#allocation2 + $0x8] sm:$0xff] %vm471_vm0, %v3317_v55 }
  0xed   :  { %472 = vst.msk [vmem:[#allocation2] sm:$0xff] %vm471_vm0, %v3320_v11 }
  0xf1   :  { %v3333_v45 = vpop.permute.xlu0 %316 }
  0xf2   :  { %v3326_v37 = vpop.permute.xlu1 %312  ;;  %v323_v57 = vpop.permute.xlu2 %322 }
  0xf3   :  { %v3329_v60 = vmax.f32 %v3196_v2, %v323_v57 }
  0xf5   :  { %476 = vst.msk [vmem:[#allocation2 + $0x20] sm:$0xff] %vm471_vm0, %v3329_v60 }
  0xfa   :  { %v319_v63 = vpop.permute.xlu1 %318 }
  0xfb   :  { %v3336_v47 = vmax.f32 %v3175_v58, %v319_v63 }
  0xfd   :  { %475 = vst.msk [vmem:[#allocation2 + $0x18] sm:$0xff] %vm471_vm0, %v3336_v47 }
 0x101   :  { %v347_v5 = vpop.permute.xlu0 %346 }
 0x102   :  { %v446_v32 = vmax.f32 %v3185_v62, %v347_v5 }
 0x104   :  { %682 = vrot.lane.b32.xlu2 %v446_v32, %s2822_s30  ;;  %552 = vrot.lane.b32.xlu0 %v446_v32, %s2823_s17  ;;  %480 = vst.msk [vmem:[#allocation2 + $0x40] sm:$0xff] %vm471_vm0, %v446_v32 }
 0x112   :  { %v355_v2 = vpop.permute.xlu2 %354 }
 0x113   :  { %v3345_v30 = vmax.f32 %v3225_v50, %v355_v2 }
 0x115   :  { %482 = vst.msk [vmem:[#allocation2 + $0x50] sm:$0xff] %vm471_vm0, %v3345_v30 }
 0x11a   :  { %v359_v58 = vpop.permute.xlu2 %358 }
 0x11b   :  { %v3350_v41 = vmax.f32 %v3234_v22, %v359_v58 }
 0x11d   :  { %483 = vst.msk [vmem:[#allocation2 + $0x58] sm:$0xff] %vm471_vm0, %v3350_v41 }
 0x121   :  { %v351_v62 = vpop.permute.xlu0 %350 }
 0x122   :  { %v349_v44 = vpop.permute.xlu1 %348  ;;  %v363_v33 = vpop.permute.xlu2 %362  ;;  %v3355_v23 = vmax.f32 %v3209_v38, %v351_v62 }
 0x123   :  { %v447_v57 = vmax.f32 %v3212_v6, %v349_v44  ;;  %v3359_v50 = vmax.f32 %v3249_v25, %v363_v33 }
 0x124   :  { %686 = vrot.lane.b32.xlu2 %v3355_v23, %s2822_s30  ;;  %481 = vst.msk [vmem:[#allocation2 + $0x48] sm:$0xff] %vm471_vm0, %v3355_v23 }
 0x125   :  { %554 = vrot.lane.b32.xlu1 %v447_v57, %s2823_s17  ;;  %684 = vrot.lane.b32.xlu0 %v447_v57, %s2822_s30  ;;  %484 = vst.msk [vmem:[#allocation2 + $0x60] sm:$0xff] %vm471_vm0, %v3359_v50 }
 0x129   :  { %v357_v38 = vpop.permute.xlu0 %356 }
 0x12a   :  { %v353_v22 = vpop.permute.xlu1 %352  ;;  %v451_v63 = vmax.f32 %v3222_v46, %v357_v38 }
 0x12b   :  { %v449_v6 = vmax.f32 %v3219_v42, %v353_v22 }
 0x12c   :  { %690 = vrot.lane.b32.xlu2 %v3345_v30, %s2822_s30 }
 0x12d   :  { %558 = vrot.lane.b32.xlu1 %v449_v6, %s2823_s17  ;;  %556 = vrot.lane.b32.xlu0 %v3355_v23, %s2823_s17 }
 0x132   :  { %v3375_v25 = vpop.permute.xlu1 %324 }
 0x133   :  { %v361_v5 = vpop.permute.xlu0 %360 }
 0x134   :  { %v453_v32 = vmax.f32 %v3240_v26, %v361_v5 }
 0x135   :  { %688 = vrot.lane.b32.xlu0 %v449_v6, %s2822_s30  ;;  %562 = vrot.lane.b32.xlu1 %v451_v63, %s2823_s17  ;;  %v467_v6 = vld [vmem:[%s4699_s1 + $0x8] sm:$0xff] }
 0x136   :  { %566 = vrot.lane.b32.xlu2 %v453_v32, %s2823_s17  ;;  %2804 = vmatpush.msk.msra.mxu3 %vm922_vm3, %v467_v6 }
 0x137   :  { %2720 = vmatpush.msk.msra.mxu1 %vm922_vm3, %v467_v6 }
 0x13a   :  { %v327_v42 = vpop.permute.xlu1 %326 }
 0x13b   :  { %v3383_v2 = vmax.f32 %v3255_v29, %v327_v42  ;;  %v365_v46 = vpop.permute.xlu0 %364 }
 0x13c   :  { %v455_v29 = vmax.f32 %v3252_v56, %v365_v46  ;;  %v369_v56 = vpop.permute.xlu2 %368 }
 0x13d   :  { %560 = vrot.lane.b32.xlu0 %v3345_v30, %s2823_s17  ;;  %564 = vrot.lane.b32.xlu1 %v3350_v41, %s2823_s17  ;;  %477 = vst.msk [vmem:[#allocation2 + $0x28] sm:$0xff] %vm471_vm0, %v3383_v2  ;;  %v457_v57 = vmax.f32 %v3267_v28, %v369_v56  ;;  %v3430_v28 = vmax.f32 %v2932_v9, %v3140_v43 }
 0x13e   :  { %694 = vrot.lane.b32.xlu2 %v3350_v41, %s2822_s30 }
 0x142   :  { %v367_v26 = vpop.permute.xlu1 %366 }
 0x143   :  { %v3394_v58 = vmax.f32 %v3264_v27, %v367_v26 }
 0x145   :  { %692 = vrot.lane.b32.xlu0 %v451_v63, %s2822_s30  ;;  %568 = vrot.lane.b32.xlu1 %v3359_v50, %s2823_s17  ;;  %485 = vst.msk [vmem:[#allocation2 + $0x68] sm:$0xff] %vm471_vm0, %v3394_v58  ;;  %v923_v63 = vrot.slane %v467_v6, 4 }
 0x146   :  { %570 = vrot.lane.b32.xlu2 %v455_v29, %s2823_s17 }
 0x14a   :  { %v371_v62 = vpop.permute.xlu1 %370 }
 0x14b   :  { %v3404_v44 = vmax.f32 %v3276_v61, %v371_v62  ;;  %v373_v61 = vpop.permute.xlu2 %372  ;;  %v379_v9 = vpop.permute.xlu0 %378 }
 0x14c   :  { %v459_v38 = vmax.f32 %v3279_v18, %v373_v61  ;;  %v427_v18 = vmax.f32 %v3161_v53, %v3290_v40  ;;  %v3453_v40 = vmax.f32 %v2963_v14, %v3193_v1  ;;  %v429_v14 = vmax.f32 %v3158_v51, %v3326_v37 }
 0x14d   :  { %696 = vrot.lane.b32.xlu0 %v453_v32, %s2822_s30  ;;  %700 = vrot.lane.b32.xlu1 %v455_v29, %s2822_s30  ;;  %486 = vst.msk [vmem:[#allocation2 + $0x70] sm:$0xff] %vm471_vm0, %v3404_v44  ;;  %v3482_v5 = vmax.f32 %v3282_v36, %v379_v9  ;;  %v468_v32 = vld [vmem:[%s4699_s1 + $0x10] sm:$0xff] }
 0x14e   :  { %572 = vrot.lane.b32.xlu2 %v3394_v58, %s2823_s17  ;;  %v924_v37 = vrot.slane %v468_v32, 4 }
 0x150   :  { %2802 = vmatpush.msk.msra.mxu2 %vm922_vm3, %v924_v37  ;;  %v925_v36 = vsel %vm922_vm3, %v923_v63, %v924_v37  ;;  %2703 = vmatpush.msk.msra.mxu0 %vm922_vm3, %v924_v37 }
 0x152   :  { %v375_v27 = vpop.permute.xlu1 %374  ;;  %2803 = vmatpush.msra.mxu2 %v925_v36  ;;  %993 = vmatpush.msra.mxu0 %v925_v36 }
 0x153   :  { %v3413_v33 = vmax.f32 %v3296_v35, %v375_v27  ;;  %v377_v35 = vpop.permute.xlu2 %376 }
 0x154   :  { %v461_v43 = vmax.f32 %v3293_v31, %v377_v35  ;;  %v3457_v31 = vmax.f32 %v2958_v13, %v3191_v0  ;;  %v466_v13 = vld [vmem:[%s4699_s1] sm:$0xff]  ;;  %v435_v35 = vmax.f32 %v3237_v24, %v3375_v25 }
 0x155   :  { %698 = vrot.lane.b32.xlu0 %v3359_v50, %s2822_s30  ;;  %702 = vrot.lane.b32.xlu1 %v3394_v58, %s2822_s30  ;;  %487 = vst.msk [vmem:[#allocation2 + $0x78] sm:$0xff] %vm471_vm0, %v3413_v33 }
 0x156   :  { %704 = vrot.lane.b32.xlu2 %v457_v57, %s2822_s30  ;;  %2805 = vmatpush.msra.mxu3 %v466_v13 }
 0x157   :  { %1108 = vmatpush.msra.mxu1 %v466_v13 }
 0x15a   :  { %v381_v1 = vpop.permute.xlu1 %380 }
 0x15b   :  { %v463_v51 = vmax.f32 %v3308_v34, %v381_v1  ;;  %v3502_v34 = vmax.f32 %v2953_v12, %v3155_v49  ;;  %v431_v12 = vmax.f32 %v3153_v48, %v3333_v45  ;;  %v3528_v48 = vmax.f32 %v2984_v17, %v3202_v4 }
 0x15d   :  { %574 = vrot.lane.b32.xlu0 %v457_v57, %s2823_s17  ;;  %578 = vrot.lane.b32.xlu1 %v459_v38, %s2823_s17  ;;  %v3554_v57 = vmax.f32 %v2974_v15, %v3169_v54 }
 0x15e   :  { %706 = vrot.lane.b32.xlu2 %v3404_v44, %s2822_s30  ;;  %v683_v22 = vpop.permute.xlu2 %682 }
 0x165   :  { %576 = vrot.lane.b32.xlu0 %v3404_v44, %s2823_s17  ;;  %328 = vrot.lane.b32.xlu1 %v3430_v28, %s2821_s16 }
 0x166   :  { %520 = vrot.lane.b32.xlu2 %v3320_v11, %s2823_s17 }
 0x16d   :  { %708 = vrot.lane.b32.xlu0 %v459_v38, %s2822_s30  ;;  %650 = vrot.lane.b32.xlu1 %v3320_v11, %s2822_s30 }
 0x16e   :  { %652 = vrot.lane.b32.xlu2 %v427_v18, %s2822_s30 }
 0x175   :  { %522 = vrot.lane.b32.xlu0 %v427_v18, %s2823_s17  ;;  %582 = vrot.lane.b32.xlu1 %v461_v43, %s2823_s17 }
 0x176   :  { %710 = vrot.lane.b32.xlu2 %v3413_v33, %s2822_s30  ;;  %v553_v53 = vpop.permute.xlu0 %552 }
 0x177   :  { %634 = vst.msk [vmem:[#allocation2 + $0x3f] sm:$0xfe] %vm616_vm1, %v553_v53 }
 0x178   :  { %764 = vst.msk [vmem:[#allocation2 + $0x3e] sm:$0xfc] %vm746_vm2, %v683_v22 }
 0x17d   :  { %580 = vrot.lane.b32.xlu0 %v3413_v33, %s2823_s17  ;;  %330 = vrot.lane.b32.xlu1 %v3453_v40, %s2821_s16 }
 0x17e   :  { %332 = vrot.lane.b32.xlu2 %v3457_v31, %s2821_s16  ;;  %v687_v11 = vpop.permute.xlu2 %686 }
 0x185   :  { %712 = vrot.lane.b32.xlu0 %v461_v43, %s2822_s30  ;;  %526 = vrot.lane.b32.xlu1 %v429_v14, %s2823_s17  ;;  %v3608_v43 = vmax.f32 %v3000_v19, %v3204_v7 }
 0x186   :  { %654 = vrot.lane.b32.xlu2 %v3317_v55, %s2822_s30  ;;  %v3479_v0 = vpop.permute.xlu2 %690 }
 0x18d   :  { %524 = vrot.lane.b32.xlu0 %v3317_v55, %s2823_s17  ;;  %820 = vrot.lane.b32.xlu1 %v3482_v5, %s2823_s17 }
 0x18e   :  { %822 = vrot.lane.b32.xlu2 %v463_v51, %s2823_s17 }
 0x190   :  { %v3496_v42 = vpop.permute.xlu2 %566 }
 0x191   :  { %641 = vst.msk [vmem:[#allocation2 + $0x5f] sm:$0x1] %vm618_vm4, %v3496_v42 }
 0x195   :  { %656 = vrot.lane.b32.xlu0 %v429_v14, %s2822_s30  ;;  %866 = vrot.lane.b32.xlu1 %v463_v51, %s2822_s30 }
 0x196   :  { %334 = vrot.lane.b32.xlu2 %v3502_v34, %s2821_s16 }
 0x197   :  { %v555_v46 = vpop.permute.xlu1 %554  ;;  %v685_v26 = vpop.permute.xlu0 %684 }
 0x198   :  { %635 = vst.msk [vmem:[#allocation2 + $0x47] sm:$0x1] %vm618_vm4, %v555_v46  ;;  %v3509_v29 = vpop.permute.xlu2 %694 }
 0x199   :  { %765 = vst.msk [vmem:[#allocation2 + $0x46] sm:$0x3] %vm748_vm5, %v685_v26 }
 0x19d   :  { %864 = vrot.lane.b32.xlu0 %v3482_v5, %s2822_s30  ;;  %528 = vrot.lane.b32.xlu1 %v3305_v21, %s2823_s17 }
 0x19e   :  { %530 = vrot.lane.b32.xlu2 %v431_v12, %s2823_s17 }
 0x19f   :  { %v559_v49 = vpop.permute.xlu1 %558  ;;  %v557_v62 = vpop.permute.xlu0 %556 }
 0x1a0   :  { %637 = vst.msk [vmem:[#allocation2 + $0x4f] sm:$0x1] %vm618_vm4, %v559_v49  ;;  %v3520_v56 = vpop.permute.xlu2 %570  ;;  %v788_v27 = vld [vmem:[#allocation2 + $0x40] sm:$0xff] }
 0x1a1   :  { %643 = vst.msk [vmem:[#allocation2 + $0x67] sm:$0x1] %vm618_vm4, %v3520_v56  ;;  %2729 = vmatmul.msk.f32.vlgmr.msra.gmra.mxu3 %vm927_vm6, %v788_v27 }
 0x1a2   :  { %636 = vst.msk [vmem:[#allocation2 + $0x47] sm:$0xfe] %vm616_vm1, %v557_v62 }
 0x1a3   :  { %766 = vst.msk [vmem:[#allocation2 + $0x46] sm:$0xfc] %vm746_vm2, %v687_v11 }
 0x1a4   :  { %804 = vst.msk [vmem:[#allocation2 + $0x40] sm:$0xff] %vm471_vm0, %v3355_v23  ;;  %v3549_v23 = vmax.f32 %v2979_v16, %v3200_v3  ;;  %v433_v3 = vmax.f32 %v3182_v59, %v3314_v52 }
 0x1a5   :  { %844 = vst.msk [vmem:[#allocation2 + $0x3f] sm:$0xfe] %vm616_vm1, %v557_v62  ;;  %336 = vrot.lane.b32.xlu0 %v3528_v48, %s2821_s16  ;;  %660 = vrot.lane.b32.xlu1 %v431_v12, %s2822_s30 }
 0x1a6   :  { %845 = vst.msk [vmem:[#allocation2 + $0x47] sm:$0x1] %vm618_vm4, %v559_v49  ;;  %532 = vrot.lane.b32.xlu2 %v3336_v47, %s2823_s17 }
 0x1a7   :  { %888 = vst.msk [vmem:[#allocation2 + $0x3e] sm:$0xfc] %vm746_vm2, %v687_v11  ;;  %v563_v17 = vpop.permute.xlu1 %562  ;;  %v689_v4 = vpop.permute.xlu0 %688  ;;  %v3631_v11 = vmax.f32 %v3005_v20, %v3206_v8 }
 0x1a8   :  { %639 = vst.msk [vmem:[#allocation2 + $0x57] sm:$0x1] %vm618_vm4, %v563_v17  ;;  %v3542_v45 = vpop.permute.xlu2 %572 }
 0x1a9   :  { %644 = vst.msk [vmem:[#allocation2 + $0x67] sm:$0xfe] %vm616_vm1, %v3542_v45 }
 0x1aa   :  { %767 = vst.msk [vmem:[#allocation2 + $0x4e] sm:$0x3] %vm748_vm5, %v689_v4 }
 0x1ab   :  { %889 = vst.msk [vmem:[#allocation2 + $0x46] sm:$0x3] %vm748_vm5, %v689_v4 }
 0x1ad   :  { %658 = vrot.lane.b32.xlu0 %v3305_v21, %s2822_s30  ;;  %338 = vrot.lane.b32.xlu1 %v3549_v23, %s2821_s16 }
 0x1ae   :  { %340 = vrot.lane.b32.xlu2 %v3554_v57, %s2821_s16 }
 0x1af   :  { %v565_v61 = vpop.permute.xlu1 %564  ;;  %v561_v38 = vpop.permute.xlu0 %560 }
 0x1b0   :  { %640 = vst.msk [vmem:[#allocation2 + $0x57] sm:$0xfe] %vm616_vm1, %v565_v61  ;;  %v3563_v16 = vpop.permute.xlu2 %704 }
 0x1b1   :  { %770 = vst.msk [vmem:[#allocation2 + $0x56] sm:$0xfc] %vm746_vm2, %v3509_v29  ;;  %v789_v15 = vld [vmem:[#allocation2 + $0x48] sm:$0xff] }
 0x1b2   :  { %638 = vst.msk [vmem:[#allocation2 + $0x4f] sm:$0xfe] %vm616_vm1, %v561_v38  ;;  %v912_v54 = vld [vmem:[#allocation2 + $0x40] sm:$0xff]  ;;  %2730 = vmatmul.msk.f32.gmra.mxu3 %vm927_vm6, %v789_v15 }
 0x1b3   :  { %768 = vst.msk [vmem:[#allocation2 + $0x4e] sm:$0xfc] %vm746_vm2, %v3479_v0  ;;  %2712 = vmatmul.msk.f32.vlgmr.msra.gmra.mxu2 %vm927_vm6, %v912_v54  ;;  %v470_v54 = vld [vmem:[%s4699_s1 + $0x20] sm:$0xf] }
 0x1b4   :  { %1166 = vst.msk [vmem:[#allocation2 + $0x40] sm:$0xff] %vm471_vm0, %v3345_v30  ;;  %2737 = vmatpush.msk.msrb.mxu2 %vm922_vm3, %v470_v54 }
 0x1b5   :  { %1206 = vst.msk [vmem:[#allocation2 + $0x3f] sm:$0xfe] %vm616_vm1, %v561_v38  ;;  %534 = vrot.lane.b32.xlu0 %v433_v3, %s2823_s17  ;;  %664 = vrot.lane.b32.xlu1 %v433_v3, %s2822_s30 }
 0x1b6   :  { %1207 = vst.msk [vmem:[#allocation2 + $0x47] sm:$0x1] %vm618_vm4, %v563_v17  ;;  %536 = vrot.lane.b32.xlu2 %v3329_v60, %s2823_s17 }
 0x1b7   :  { %805 = vst.msk [vmem:[#allocation2 + $0x48] sm:$0xff] %vm471_vm0, %v3345_v30  ;;  %v569_v59 = vpop.permute.xlu1 %568  ;;  %v693_v52 = vpop.permute.xlu0 %692 }
 0x1b8   :  { %846 = vst.msk [vmem:[#allocation2 + $0x47] sm:$0xfe] %vm616_vm1, %v561_v38  ;;  %v3585_v18 = vpop.permute.xlu2 %706 }
 0x1b9   :  { %847 = vst.msk [vmem:[#allocation2 + $0x4f] sm:$0x1] %vm618_vm4, %v563_v17 }
 0x1ba   :  { %1250 = vst.msk [vmem:[#allocation2 + $0x3e] sm:$0xfc] %vm746_vm2, %v3479_v0 }
 0x1bb   :  { %890 = vst.msk [vmem:[#allocation2 + $0x46] sm:$0xfc] %vm746_vm2, %v3479_v0 }
 0x1bc   :  { %642 = vst.msk [vmem:[#allocation2 + $0x5f] sm:$0xfe] %vm616_vm1, %v569_v59 }
 0x1bd   :  { %769 = vst.msk [vmem:[#allocation2 + $0x56] sm:$0x3] %vm748_vm5, %v693_v52  ;;  %662 = vrot.lane.b32.xlu0 %v3336_v47, %s2822_s30  ;;  %666 = vrot.lane.b32.xlu1 %v3329_v60, %s2822_s30 }
 0x1be   :  { %891 = vst.msk [vmem:[#allocation2 + $0x4e] sm:$0x3] %vm748_vm5, %v693_v52  ;;  %668 = vrot.lane.b32.xlu2 %v435_v35, %s2822_s30 }
 0x1bf   :  { %1251 = vst.msk [vmem:[#allocation2 + $0x46] sm:$0x3] %vm748_vm5, %v693_v52  ;;  %v701_v30 = vpop.permute.xlu1 %700  ;;  %v697_v9 = vpop.permute.xlu0 %696 }
 0x1c0   :  { %773 = vst.msk [vmem:[#allocation2 + $0x66] sm:$0x3] %vm748_vm5, %v701_v30  ;;  %v521_v24 = vpop.permute.xlu2 %520 }
 0x1c1   :  { %617 = vst.msk [vmem:[#allocation2 - $0x1] sm:$0xfe] %vm616_vm1, %v521_v24 }
 0x1c2   :  { %771 = vst.msk [vmem:[#allocation2 + $0x5e] sm:$0x3] %vm748_vm5, %v697_v9 }
 0x1c4   :  { %v790_v25 = vld [vmem:[#allocation2 + $0x50] sm:$0xff] }
 0x1c5   :  { %v913_v22 = vld [vmem:[#allocation2 + $0x48] sm:$0xff]  ;;  %806 = vst.msk [vmem:[#allocation2 + $0x50] sm:$0xff] %vm471_vm0, %v3350_v41  ;;  %2731 = vmatmul.msk.f32.gmra.mxu3 %vm927_vm6, %v790_v25  ;;  %538 = vrot.lane.b32.xlu0 %v435_v35, %s2823_s17 }
 0x1c6   :  { %2713 = vmatmul.msk.f32.gmra.mxu2 %vm927_vm6, %v913_v22  ;;  %1167 = vst.msk [vmem:[#allocation2 + $0x48] sm:$0xff] %vm471_vm0, %v3350_v41  ;;  %540 = vrot.lane.b32.xlu2 %v3383_v2, %s2823_s17 }
 0x1c7   :  { %1208 = vst.msk [vmem:[#allocation2 + $0x47] sm:$0xfe] %vm616_vm1, %v565_v61  ;;  %344 = vrot.lane.b32.xlu1 %v3608_v43, %s2821_s16  ;;  %v703_v19 = vpop.permute.xlu1 %702  ;;  %v699_v7 = vpop.permute.xlu0 %698 }
 0x1c8   :  { %1209 = vst.msk [vmem:[#allocation2 + $0x4f] sm:$0x1] %vm618_vm4, %v3496_v42  ;;  %v3624_v53 = vpop.permute.xlu2 %652 }
 0x1c9   :  { %1252 = vst.msk [vmem:[#allocation2 + $0x46] sm:$0xfc] %vm746_vm2, %v3509_v29  ;;  %v791_v41 = vld [vmem:[#allocation2 + $0x58] sm:$0xff] }
 0x1ca   :  { %1253 = vst.msk [vmem:[#allocation2 + $0x4e] sm:$0x3] %vm748_vm5, %v697_v9 }
 0x1cb   :  { %848 = vst.msk [vmem:[#allocation2 + $0x4f] sm:$0xfe] %vm616_vm1, %v565_v61 }
 0x1cc   :  { %849 = vst.msk [vmem:[#allocation2 + $0x57] sm:$0x1] %vm618_vm4, %v3496_v42 }
 0x1cd   :  { %892 = vst.msk [vmem:[#allocation2 + $0x4e] sm:$0xfc] %vm746_vm2, %v3509_v29  ;;  %2732 = vmatmul.msk.f32.gmra.mxu3 %vm927_vm6, %v791_v41  ;;  %342 = vrot.lane.b32.xlu0 %v3631_v11, %s2821_s16 }
 0x1ce   :  { %893 = vst.msk [vmem:[#allocation2 + $0x56] sm:$0x3] %vm748_vm5, %v697_v9 }
 0x1cf   :  { %774 = vst.msk [vmem:[#allocation2 + $0x66] sm:$0xfc] %vm746_vm2, %v703_v19  ;;  %670 = vrot.lane.b32.xlu1 %v3383_v2, %s2822_s30  ;;  %v579_v20 = vpop.permute.xlu1 %578  ;;  %v575_v8 = vpop.permute.xlu0 %574 }
 0x1d0   :  { %772 = vst.msk [vmem:[#allocation2 + $0x5e] sm:$0xfc] %vm746_vm2, %v699_v7  ;;  %v3646_v6 = vpop.permute.xlu2 %710 }
 0x1d1   :  { %807 = vst.msk [vmem:[#allocation2 + $0x58] sm:$0xff] %vm471_vm0, %v3359_v50 }
 0x1d2   :  { %850 = vst.msk [vmem:[#allocation2 + $0x57] sm:$0xfe] %vm616_vm1, %v569_v59 }
 0x1d3   :  { %851 = vst.msk [vmem:[#allocation2 + $0x5f] sm:$0x1] %vm618_vm4, %v3520_v56 }
 0x1d4   :  { %894 = vst.msk [vmem:[#allocation2 + $0x56] sm:$0xfc] %vm746_vm2, %v699_v7 }
 0x1d5   :  { %895 = vst.msk [vmem:[#allocation2 + $0x5e] sm:$0x3] %vm748_vm5, %v701_v30  ;;  %v914_v13 = vld [vmem:[#allocation2 + $0x50] sm:$0xff] }
 0x1d6   :  { %2714 = vmatmul.msk.f32.gmra.mxu2 %vm927_vm6, %v914_v13  ;;  %1168 = vst.msk [vmem:[#allocation2 + $0x50] sm:$0xff] %vm471_vm0, %v3359_v50 }
 0x1d7   :  { %1210 = vst.msk [vmem:[#allocation2 + $0x4f] sm:$0xfe] %vm616_vm1, %v569_v59  ;;  %v792_v14 = vld [vmem:[#allocation2 + $0x60] sm:$0xff]  ;;  %v329_v0 = vpop.permute.xlu1 %328  ;;  %v577_v1 = vpop.permute.xlu0 %576 }
 0x1d8   :  { %1211 = vst.msk [vmem:[#allocation2 + $0x57] sm:$0x1] %vm618_vm4, %v3520_v56  ;;  %2733 = vmatmul.msk.f32.gmra.mxu3 %vm927_vm6, %v792_v14  ;;  %v437_v63 = vmax.f32 %v3430_v28, %v329_v0  ;;  %v333_v32 = vpop.permute.xlu2 %332 }
 0x1d9   :  { %1254 = vst.msk [vmem:[#allocation2 + $0x4e] sm:$0xfc] %vm746_vm2, %v699_v7  ;;  %v439_v51 = vmax.f32 %v3457_v31, %v333_v32 }
 0x1da   :  { %1255 = vst.msk [vmem:[#allocation2 + $0x56] sm:$0x3] %vm748_vm5, %v701_v30  ;;  %672 = vrot.lane.b32.xlu2 %v437_v63, %s2822_s30  ;;  %542 = vrot.lane.b32.xlu0 %v437_v63, %s2823_s17 }
 0x1db   :  { %647 = vst.msk [vmem:[#allocation2 + $0x77] sm:$0x1] %vm618_vm4, %v579_v20  ;;  %546 = vrot.lane.b32.xlu1 %v439_v51, %s2823_s17 }
 0x1dc   :  { %645 = vst.msk [vmem:[#allocation2 + $0x6f] sm:$0x1] %vm618_vm4, %v575_v8  ;;  %v915_v50 = vld [vmem:[#allocation2 + $0x58] sm:$0xff] }
 0x1dd   :  { %775 = vst.msk [vmem:[#allocation2 + $0x6e] sm:$0x3] %vm748_vm5, %v3563_v16 }
 0x1de   :  { %808 = vst.msk [vmem:[#allocation2 + $0x60] sm:$0xff] %vm471_vm0, %v3394_v58  ;;  %2715 = vmatmul.msk.f32.gmra.mxu2 %vm927_vm6, %v915_v50 }
 0x1df   :  { %852 = vst.msk [vmem:[#allocation2 + $0x5f] sm:$0xfe] %vm616_vm1, %v3542_v45  ;;  %v651_v28 = vpop.permute.xlu1 %650  ;;  %v709_v31 = vpop.permute.xlu0 %708 }
 0x1e0   :  { %853 = vst.msk [vmem:[#allocation2 + $0x67] sm:$0x1] %vm618_vm4, %v575_v8  ;;  %v3679_v37 = vpop.permute.xlu2 %654 }
 0x1e1   :  { %896 = vst.msk [vmem:[#allocation2 + $0x5e] sm:$0xfc] %vm746_vm2, %v703_v19 }
 0x1e2   :  { %897 = vst.msk [vmem:[#allocation2 + $0x66] sm:$0x3] %vm748_vm5, %v3563_v16 }
 0x1e3   :  { %1169 = vst.msk [vmem:[#allocation2 + $0x58] sm:$0xff] %vm471_vm0, %v3394_v58 }
 0x1e4   :  { %1212 = vst.msk [vmem:[#allocation2 + $0x57] sm:$0xfe] %vm616_vm1, %v3542_v45  ;;  %v793_v36 = vld [vmem:[#allocation2 + $0x68] sm:$0xff] }
 0x1e5   :  { %1213 = vst.msk [vmem:[#allocation2 + $0x5f] sm:$0x1] %vm618_vm4, %v575_v8  ;;  %2734 = vmatmul.msk.f32.gmra.mxu3 %vm927_vm6, %v793_v36 }
 0x1e6   :  { %1256 = vst.msk [vmem:[#allocation2 + $0x56] sm:$0xfc] %vm746_vm2, %v703_v19 }
 0x1e7   :  { %1257 = vst.msk [vmem:[#allocation2 + $0x5e] sm:$0x3] %vm748_vm5, %v3563_v16  ;;  %v583_v42 = vpop.permute.xlu1 %582  ;;  %v523_v46 = vpop.permute.xlu0 %522 }
 0x1e8   :  { %646 = vst.msk [vmem:[#allocation2 + $0x6f] sm:$0xfe] %vm616_vm1, %v577_v1  ;;  %v3694_v26 = vpop.permute.xlu2 %822 }
 0x1e9   :  { %776 = vst.msk [vmem:[#allocation2 + $0x6e] sm:$0xfc] %vm746_vm2, %v3585_v18  ;;  %v916_v58 = vld [vmem:[#allocation2 + $0x60] sm:$0xff] }
 0x1ea   :  { %809 = vst.msk [vmem:[#allocation2 + $0x68] sm:$0xff] %vm471_vm0, %v3404_v44  ;;  %2716 = vmatmul.msk.f32.gmra.mxu2 %vm927_vm6, %v916_v58 }
 0x1eb   :  { %854 = vst.msk [vmem:[#allocation2 + $0x67] sm:$0xfe] %vm616_vm1, %v577_v1 }
 0x1ec   :  { %855 = vst.msk [vmem:[#allocation2 + $0x6f] sm:$0x1] %vm618_vm4, %v579_v20 }
 0x1ed   :  { %898 = vst.msk [vmem:[#allocation2 + $0x66] sm:$0xfc] %vm746_vm2, %v3585_v18 }
 0x1ee   :  { %1170 = vst.msk [vmem:[#allocation2 + $0x60] sm:$0xff] %vm471_vm0, %v3404_v44 }
 0x1ef   :  { %1214 = vst.msk [vmem:[#allocation2 + $0x5f] sm:$0xfe] %vm616_vm1, %v577_v1  ;;  %v331_v29 = vpop.permute.xlu1 %330  ;;  %v581_v12 = vpop.permute.xlu0 %580 }
 0x1f0   :  { %1215 = vst.msk [vmem:[#allocation2 + $0x67] sm:$0x1] %vm618_vm4, %v579_v20  ;;  %v3710_v49 = vmax.f32 %v3453_v40, %v331_v29  ;;  %v335_v62 = vpop.permute.xlu2 %334 }
 0x1f1   :  { %747 = vst.msk [vmem:[#allocation2 - $0x2] sm:$0xfc] %vm746_vm2, %v651_v28  ;;  %v3714_v56 = vmax.f32 %v3502_v34, %v335_v62  ;;  %v2816_v28 = vld [vmem:[%s4698_s0 + $0x130] sm:$0xff] }
 0x1f2   :  { %1258 = vst.msk [vmem:[#allocation2 + $0x5e] sm:$0xfc] %vm746_vm2, %v3585_v18  ;;  %674 = vrot.lane.b32.xlu2 %v3710_v49, %s2822_s30  ;;  %544 = vrot.lane.b32.xlu0 %v3710_v49, %s2823_s17 }
 0x1f3   :  { %777 = vst.msk [vmem:[#allocation2 + $0x76] sm:$0x3] %vm748_vm5, %v709_v31  ;;  %548 = vrot.lane.b32.xlu1 %v3714_v56, %s2823_s17 }
 0x1f4   :  { %899 = vst.msk [vmem:[#allocation2 + $0x6e] sm:$0x3] %vm748_vm5, %v709_v31 }
 0x1f5   :  { %1259 = vst.msk [vmem:[#allocation2 + $0x66] sm:$0x3] %vm748_vm5, %v709_v31  ;;  %v3891_v31 = vmax.f32 %v2816_v28, %v3273_v10 }
 0x1f6   :  { %649 = vst.msk [vmem:[#allocation2 + $0x7f] sm:$0x1] %vm618_vm4, %v583_v42 }
 0x1f7   :  { %619 = vst.msk [vmem:[#allocation2 + $0x7] sm:$0x1] %vm618_vm4, %v523_v46  ;;  %v527_v44 = vpop.permute.xlu1 %526  ;;  %v713_v40 = vpop.permute.xlu0 %712 }
 0x1f8   :  { %749 = vst.msk [vmem:[#allocation2 + $0x6] sm:$0x3] %vm748_vm5, %v3624_v53  ;;  %v3731_v34 = vpop.permute.xlu2 %530 }
 0x1f9   :  { %478 = vst.msk [vmem:[#allocation2 + $0x30] sm:$0xff] %vm471_vm0, %v3710_v49 }
 0x1fa   :  { %v794_v27 = vld [vmem:[#allocation2 + $0x70] sm:$0xff]  ;;  %479 = vst.msk [vmem:[#allocation2 + $0x38] sm:$0xff] %vm471_vm0, %v3714_v56  ;;  %676 = vrot.lane.b32.xlu0 %v439_v51, %s2822_s30 }
 0x1fb   :  { %v917_v17 = vld [vmem:[#allocation2 + $0x68] sm:$0xff]  ;;  %2735 = vmatmul.msk.f32.gmra.mxu3 %vm927_vm6, %v794_v27  ;;  %810 = vst.msk [vmem:[#allocation2 + $0x70] sm:$0xff] %vm471_vm0, %v3413_v33 }
 0x1fc   :  { %2717 = vmatmul.msk.f32.gmra.mxu2 %vm927_vm6, %v917_v17  ;;  %1171 = vst.msk [vmem:[#allocation2 + $0x68] sm:$0xff] %vm471_vm0, %v3413_v33 }
 0x1fd   :  { %1217 = vst.msk [vmem:[#allocation2 + $0x6f] sm:$0x1] %vm618_vm4, %v583_v42 }
 0x1fe   :  { %857 = vst.msk [vmem:[#allocation2 + $0x77] sm:$0x1] %vm618_vm4, %v583_v42 }
 0x1ff   :  { %648 = vst.msk [vmem:[#allocation2 + $0x77] sm:$0xfe] %vm616_vm1, %v581_v12  ;;  %v780_v4 = vld [vmem:[#allocation2] sm:$0xff]  ;;  %v821_v45 = vpop.permute.xlu1 %820  ;;  %v525_v61 = vpop.permute.xlu0 %524 }
 0x200   :  { %778 = vst.msk [vmem:[#allocation2 + $0x76] sm:$0xfc] %vm746_vm2, %v3646_v6  ;;  %2721 = vmatmul.msk.f32.vlgmr.msra.gmra.mxu1 %vm927_vm6, %v780_v4  ;;  %v3750_v38 = vpop.permute.xlu2 %532 }
 0x201   :  { %856 = vst.msk [vmem:[#allocation2 + $0x6f] sm:$0xfe] %vm616_vm1, %v581_v12 }
 0x202   :  { %900 = vst.msk [vmem:[#allocation2 + $0x6e] sm:$0xfc] %vm746_vm2, %v3646_v6  ;;  %678 = vrot.lane.b32.xlu0 %v3714_v56, %s2822_s30 }
 0x203   :  { %1216 = vst.msk [vmem:[#allocation2 + $0x67] sm:$0xfe] %vm616_vm1, %v581_v12 }
 0x204   :  { %1260 = vst.msk [vmem:[#allocation2 + $0x66] sm:$0xfc] %vm746_vm2, %v3646_v6 }
 0x205   :  { %796 = vst.msk [vmem:[#allocation2] sm:$0xff] %vm471_vm0, %v3317_v55  ;;  %v469_v55 = vld [vmem:[%s4699_s1 + $0x18] sm:$0xff] }
 0x206   :  { %621 = vst.msk [vmem:[#allocation2 + $0xf] sm:$0x1] %vm618_vm4, %v527_v44  ;;  %1348 = vmatpush.msrb.mxu2 %v469_v55 }
 0x207   :  { %829 = vst.msk [vmem:[#allocation2 + $0x7] sm:$0x1] %vm618_vm4, %v527_v44  ;;  %v867_v33 = vpop.permute.xlu1 %866  ;;  %v657_v16 = vpop.permute.xlu0 %656 }
 0x208   :  { %623 = vst.msk [vmem:[#allocation2 + $0x17] sm:$0x1] %vm618_vm4, %v3731_v34  ;;  %v341_v15 = vpop.permute.xlu2 %340 }
 0x209   :  { %779 = vst.msk [vmem:[#allocation2 + $0x7e] sm:$0x3] %vm748_vm5, %v713_v40  ;;  %v3771_v3 = vmax.f32 %v3554_v57, %v341_v15 }
 0x20a   :  { %901 = vst.msk [vmem:[#allocation2 + $0x76] sm:$0x3] %vm748_vm5, %v713_v40 }
 0x20b   :  { %1261 = vst.msk [vmem:[#allocation2 + $0x6e] sm:$0x3] %vm748_vm5, %v713_v40  ;;  %818 = vrot.lane.b32.xlu0 %v3771_v3, %s2823_s17 }
 0x20c   :  { %624 = vst.msk [vmem:[#allocation2 + $0x17] sm:$0xfe] %vm616_vm1, %v3750_v38 }
 0x20d   :  { %620 = vst.msk [vmem:[#allocation2 + $0x7] sm:$0xfe] %vm616_vm1, %v525_v61 }
 0x20e   :  { %750 = vst.msk [vmem:[#allocation2 + $0x6] sm:$0xfc] %vm746_vm2, %v3679_v37 }
 0x20f   :  { %828 = vst.msk [vmem:[#allocation2 - $0x1] sm:$0xfe] %vm616_vm1, %v525_v61  ;;  %v529_v57 = vpop.permute.xlu1 %528  ;;  %v865_v59 = vpop.permute.xlu0 %864 }
 0x210   :  { %v795_v52 = vld [vmem:[#allocation2 + $0x78] sm:$0xff]  ;;  %872 = vst.msk [vmem:[#allocation2 - $0x2] sm:$0xfc] %vm746_vm2, %v3679_v37  ;;  %v3794_v35 = vpop.permute.xlu2 %536 }
 0x211   :  { %811 = vst.msk [vmem:[#allocation2 + $0x78] sm:$0xff] %vm471_vm0, %v3482_v5  ;;  %v918_v18 = vld [vmem:[#allocation2 + $0x70] sm:$0xff]  ;;  %2736 = vmatmul.msk.f32.gmra.mxu3 %vm927_vm6, %v795_v52 }
 0x212   :  { %858 = vst.msk [vmem:[#allocation2 + $0x77] sm:$0xfe] %vm616_vm1, %v821_v45  ;;  %2718 = vmatmul.msk.f32.gmra.mxu2 %vm927_vm6, %v918_v18 }
 0x213   :  { %859 = vst.msk [vmem:[#allocation2 + $0x7f] sm:$0x1] %vm618_vm4, %v3694_v26 }
 0x214   :  { %1172 = vst.msk [vmem:[#allocation2 + $0x70] sm:$0xff] %vm471_vm0, %v3482_v5 }
 0x215   :  { %1218 = vst.msk [vmem:[#allocation2 + $0x6f] sm:$0xfe] %vm616_vm1, %v821_v45 }
 0x216   :  { %1219 = vst.msk [vmem:[#allocation2 + $0x77] sm:$0x1] %vm618_vm4, %v3694_v26 }
 0x217   :  { %903 = vst.msk [vmem:[#allocation2 + $0x7e] sm:$0x3] %vm748_vm5, %v867_v33  ;;  %v661_v30 = vpop.permute.xlu1 %660  ;;  %v337_v9 = vpop.permute.xlu0 %336 }
 0x218   :  { %1263 = vst.msk [vmem:[#allocation2 + $0x76] sm:$0x3] %vm748_vm5, %v867_v33  ;;  %v441_v24 = vmax.f32 %v3528_v48, %v337_v9  ;;  %v3813_v5 = vpop.permute.xlu2 %668 }
 0x219   :  { %751 = vst.msk [vmem:[#allocation2 + $0xe] sm:$0x3] %vm748_vm5, %v657_v16 }
 0x21a   :  { %873 = vst.msk [vmem:[#allocation2 + $0x6] sm:$0x3] %vm748_vm5, %v657_v16  ;;  %680 = vrot.lane.b32.xlu1 %v441_v24, %s2822_s30  ;;  %550 = vrot.lane.b32.xlu2 %v441_v24, %s2823_s17 }
 0x21b   :  { %626 = vst.msk [vmem:[#allocation2 + $0x1f] sm:$0xfe] %vm616_vm1, %v3794_v35 }
 0x21c   :  { %622 = vst.msk [vmem:[#allocation2 + $0xf] sm:$0xfe] %vm616_vm1, %v529_v57 }
 0x21d   :  { %902 = vst.msk [vmem:[#allocation2 + $0x76] sm:$0xfc] %vm746_vm2, %v865_v59 }
 0x21e   :  { %1262 = vst.msk [vmem:[#allocation2 + $0x6e] sm:$0xfc] %vm746_vm2, %v865_v59 }
 0x21f   :  { %753 = vst.msk [vmem:[#allocation2 + $0x16] sm:$0x3] %vm748_vm5, %v661_v30  ;;  %v339_v48 = vpop.permute.xlu1 %338  ;;  %v659_v25 = vpop.permute.xlu0 %658 }
 0x220   :  { %v781_v22 = vld [vmem:[#allocation2 + $0x8] sm:$0xff]  ;;  %v3819_v19 = vmax.f32 %v3549_v23, %v339_v48  ;;  %752 = vst.msk [vmem:[#allocation2 + $0xe] sm:$0xfc] %vm746_vm2, %v659_v25 }
 0x221   :  { %v904_v7 = vld [vmem:[#allocation2] sm:$0xff]  ;;  %797 = vst.msk [vmem:[#allocation2 + $0x8] sm:$0xff] %vm471_vm0, %v3305_v21  ;;  %2722 = vmatmul.msk.f32.gmra.mxu1 %vm927_vm6, %v781_v22 }
 0x222   :  { %2704 = vmatmul.msk.f32.vlgmr.msra.gmra.mxu0 %vm927_vm6, %v904_v7  ;;  %1158 = vst.msk [vmem:[#allocation2] sm:$0xff] %vm471_vm0, %v3305_v21  ;;  %860 = vrot.lane.b32.xlu1 %v3819_v19, %s2822_s30  ;;  %v3839_v21 = vpop.permute.xlu2 %540 }
 0x223   :  { %1190 = vst.msk [vmem:[#allocation2 - $0x1] sm:$0xfe] %vm616_vm1, %v529_v57  ;;  %816 = vrot.lane.b32.xlu2 %v3819_v19, %s2823_s17 }
 0x224   :  { %1191 = vst.msk [vmem:[#allocation2 + $0x7] sm:$0x1] %vm618_vm4, %v3731_v34  ;;  %v919_v23 = vld [vmem:[#allocation2 + $0x78] sm:$0xff] }
 0x225   :  { %830 = vst.msk [vmem:[#allocation2 + $0x7] sm:$0xfe] %vm616_vm1, %v529_v57  ;;  %2719 = vmatmul.msk.f32.gmra.mxu2 %vm927_vm6, %v919_v23 }
 0x226   :  { %831 = vst.msk [vmem:[#allocation2 + $0xf] sm:$0x1] %vm618_vm4, %v3731_v34 }
 0x227   :  { %875 = vst.msk [vmem:[#allocation2 + $0xe] sm:$0x3] %vm748_vm5, %v661_v30  ;;  %v665_v53 = vpop.permute.xlu1 %664  ;;  %v535_v41 = vpop.permute.xlu0 %534  ;;  %v782_v20 = vld [vmem:[#allocation2 + $0x10] sm:$0xff] }
 0x228   :  { %1235 = vst.msk [vmem:[#allocation2 + $0x6] sm:$0x3] %vm748_vm5, %v661_v30  ;;  %v2824_v30 = vmov 0.0  }
 0x229   :  { %628 = vst.msk [vmem:[#allocation2 + $0x27] sm:$0xfe] %vm616_vm1, %v3839_v21  ;;  %2723 = vmatmul.msk.f32.gmra.mxu1 %vm927_vm6, %v782_v20 }
 0x22a   :  { %874 = vst.msk [vmem:[#allocation2 + $0x6] sm:$0xfc] %vm746_vm2, %v659_v25 }
 0x22b   :  { %1234 = vst.msk [vmem:[#allocation2 - $0x2] sm:$0xfc] %vm746_vm2, %v659_v25  ;;  %862 = vrot.lane.b32.xlu2 %v3771_v3, %s2822_s30 }
 0x22c   :  { %625 = vst.msk [vmem:[#allocation2 + $0x1f] sm:$0x1] %vm618_vm4, %v535_v41 }
 0x22d   :  { %755 = vst.msk [vmem:[#allocation2 + $0x1e] sm:$0x3] %vm748_vm5, %v665_v53 }
 0x22e   :  { %798 = vst.msk [vmem:[#allocation2 + $0x10] sm:$0xff] %vm471_vm0, %v3336_v47 }
 0x22f   :  { %833 = vst.msk [vmem:[#allocation2 + $0x17] sm:$0x1] %vm618_vm4, %v535_v41  ;;  %v667_v8 = vpop.permute.xlu1 %666  ;;  %v663_v6 = vpop.permute.xlu0 %662 }
 0x230   :  { %832 = vst.msk [vmem:[#allocation2 + $0xf] sm:$0xfe] %vm616_vm1, %v3750_v38 }
 0x231   :  { %v905_v13 = vld [vmem:[#allocation2 + $0x8] sm:$0xff]  ;;  %877 = vst.msk [vmem:[#allocation2 + $0x16] sm:$0x3] %vm748_vm5, %v665_v53 }
 0x232   :  { %2705 = vmatmul.msk.f32.gmra.mxu0 %vm927_vm6, %v905_v13  ;;  %1159 = vst.msk [vmem:[#allocation2 + $0x8] sm:$0xff] %vm471_vm0, %v3336_v47  ;;  %v1266_v14 = vld [vmem:[#allocation2] sm:$0xff] }
 0x233   :  { %1193 = vst.msk [vmem:[#allocation2 + $0xf] sm:$0x1] %vm618_vm4, %v535_v41  ;;  %2738 = vmatmul.msk.f32.vlgmr.msrb.gmra.mxu2 %vm927_vm6, %v1266_v14 }
 0x234   :  { %1192 = vst.msk [vmem:[#allocation2 + $0x7] sm:$0xfe] %vm616_vm1, %v3750_v38  ;;  %v673_v46 = vpop.permute.xlu2 %672 }
 0x235   :  { %1237 = vst.msk [vmem:[#allocation2 + $0xe] sm:$0x3] %vm748_vm5, %v665_v53 }
 0x236   :  { %756 = vst.msk [vmem:[#allocation2 + $0x1e] sm:$0xfc] %vm746_vm2, %v667_v8  ;;  %v3958_v40 = vpop.f32.mrf.mxu2 }
 0x237   :  { %754 = vst.msk [vmem:[#allocation2 + $0x16] sm:$0xfc] %vm746_vm2, %v663_v6  ;;  %v539_v0 = vpop.permute.xlu0 %538 }
 0x238   :  { %876 = vst.msk [vmem:[#allocation2 + $0xe] sm:$0xfc] %vm746_vm2, %v663_v6 }
 0x239   :  { %1236 = vst.msk [vmem:[#allocation2 + $0x6] sm:$0xfc] %vm746_vm2, %v663_v6  ;;  %v345_v47 = vpop.permute.xlu1 %344 }
 0x23a   :  { %v445_v1 = vmax.f32 %v3608_v43, %v345_v47  ;;  %627 = vst.msk [vmem:[#allocation2 + $0x27] sm:$0x1] %vm618_vm4, %v539_v0 }
 0x23b   :  { %757 = vst.msk [vmem:[#allocation2 + $0x26] sm:$0x3] %vm748_vm5, %v3813_v5 }
 0x23c   :  { %1180 = vrot.lane.b32.xlu1 %v445_v1, %s2823_s17  ;;  %1471 = vst.msk [vmem:[#allocation3] sm:$0xff] %vm1470_vm7, %v2824_v30 }
 0x23d   :  { %1473 = vst.msk [vmem:[#allocation3 + $0x8] sm:$0x3] %vm1472_vm8, %v2824_v30 }
 0x23e   :  { %v783_v63 = vld [vmem:[#allocation2 + $0x18] sm:$0xff]  ;;  %1474 = vst.msk [vmem:[#allocation3 + $0xa0] sm:$0xff] %vm1470_vm7, %v2824_v30 }
 0x23f   :  { %v906_v32 = vld [vmem:[#allocation2 + $0x10] sm:$0xff]  ;;  %799 = vst.msk [vmem:[#allocation2 + $0x18] sm:$0xff] %vm471_vm0, %v3329_v60  ;;  %2724 = vmatmul.msk.f32.gmra.mxu1 %vm927_vm6, %v783_v63  ;;  %v343_v51 = vpop.permute.xlu0 %342 }
 0x240   :  { %2706 = vmatmul.msk.f32.gmra.mxu0 %vm927_vm6, %v906_v32  ;;  %1160 = vst.msk [vmem:[#allocation2 + $0x10] sm:$0xff] %vm471_vm0, %v3329_v60  ;;  %v1267_v43 = vld [vmem:[#allocation2 + $0x8] sm:$0xff]  ;;  %v3882_v50 = vmax.f32 %v3631_v11, %v343_v51  ;;  %v2817_v11 = vld [vmem:[%s4698_s0 + $0x138] sm:$0x3] }
 0x241   :  { %1194 = vst.msk [vmem:[#allocation2 + $0xf] sm:$0xfe] %vm616_vm1, %v3794_v35  ;;  %2739 = vmatmul.msk.f32.gmra.mxu2 %vm927_vm6, %v1267_v43  ;;  %v671_v10 = vpop.permute.xlu1 %670  ;;  %v3912_v37 = vmax.f32 %v2817_v11, %v3298_v39 }
 0x242   :  { %1195 = vst.msk [vmem:[#allocation2 + $0x17] sm:$0x1] %vm618_vm4, %v539_v0  ;;  %1222 = vrot.lane.b32.xlu2 %v3882_v50, %s2822_s30  ;;  %1178 = vrot.lane.b32.xlu0 %v3882_v50, %s2823_s17  ;;  %v784_v60 = vld [vmem:[#allocation2 + $0x20] sm:$0xff] }
 0x243   :  { %1238 = vst.msk [vmem:[#allocation2 + $0xe] sm:$0xfc] %vm746_vm2, %v667_v8 }
 0x244   :  { %1239 = vst.msk [vmem:[#allocation2 + $0x16] sm:$0x3] %vm748_vm5, %v3813_v5  ;;  %382 = vrot.lane.b32.xlu1 %v3891_v31, %s2821_s16  ;;  %v1580_v22 = vld [vmem:[#allocation3 + $0x1] sm:$0xff] }
 0x245   :  { %834 = vst.msk [vmem:[#allocation2 + $0x17] sm:$0xfe] %vm616_vm1, %v3794_v35 }
 0x246   :  { %835 = vst.msk [vmem:[#allocation2 + $0x1f] sm:$0x1] %vm618_vm4, %v539_v0  ;;  %v4061_v0 = vld [vmem:[%s4701_s3] ss:$0 sm:$0xff] }
 0x247   :  { %878 = vst.msk [vmem:[#allocation2 + $0x16] sm:$0xfc] %vm746_vm2, %v667_v8  ;;  %2725 = vmatmul.msk.f32.gmra.mxu1 %vm927_vm6, %v784_v60  ;;  %v4054_v8 = vld [vmem:[%s4700_s2] ss:$0 sm:$0xff] }
 0x248   :  { %879 = vst.msk [vmem:[#allocation2 + $0x1e] sm:$0x3] %vm748_vm5, %v3813_v5 }
 0x249   :  { %758 = vst.msk [vmem:[#allocation2 + $0x26] sm:$0xfc] %vm746_vm2, %v671_v10  ;;  %v3969_v61 = vpop.f32.mrf.mxu2 }
 0x24a   :  { %800 = vst.msk [vmem:[#allocation2 + $0x20] sm:$0xff] %vm471_vm0, %v3383_v2  ;;  %384 = vrot.lane.b32.xlu2 %v3912_v37, %s2821_s16  ;;  %1224 = vrot.lane.b32.xlu0 %v445_v1, %s2822_s30 }
 0x24b   :  { %836 = vst.msk [vmem:[#allocation2 + $0x1f] sm:$0xfe] %vm616_vm1, %v3839_v21  ;;  %v1268_v36 = vld [vmem:[#allocation2 + $0x10] sm:$0xff] }
 0x24c   :  { %880 = vst.msk [vmem:[#allocation2 + $0x1e] sm:$0xfc] %vm746_vm2, %v671_v10  ;;  %2740 = vmatmul.msk.f32.gmra.mxu2 %vm927_vm6, %v1268_v36  ;;  %v543_v39 = vpop.permute.xlu0 %542  ;;  %v675_v44 = vpop.permute.xlu2 %674 }
 0x24d   :  { %v547_v42 = vpop.permute.xlu1 %546  ;;  %629 = vst.msk [vmem:[#allocation2 + $0x2f] sm:$0x1] %vm618_vm4, %v543_v39 }
 0x24e   :  { %631 = vst.msk [vmem:[#allocation2 + $0x37] sm:$0x1] %vm618_vm4, %v547_v42 }
 0x24f   :  { %v907_v26 = vld [vmem:[#allocation2 + $0x18] sm:$0xff]  ;;  %759 = vst.msk [vmem:[#allocation2 + $0x2e] sm:$0x3] %vm748_vm5, %v673_v46 }
 0x250   :  { %2707 = vmatmul.msk.f32.gmra.mxu0 %vm927_vm6, %v907_v26  ;;  %1161 = vst.msk [vmem:[#allocation2 + $0x18] sm:$0xff] %vm471_vm0, %v3383_v2  ;;  %v1274_v26 = vld [vmem:[#allocation2 + $0x40] sm:$0xff] }
 0x251   :  { %1196 = vst.msk [vmem:[#allocation2 + $0x17] sm:$0xfe] %vm616_vm1, %v3839_v21 }
 0x252   :  { %1240 = vst.msk [vmem:[#allocation2 + $0x16] sm:$0xfc] %vm746_vm2, %v671_v10 }
 0x253   :  { %837 = vst.msk [vmem:[#allocation2 + $0x27] sm:$0x1] %vm618_vm4, %v543_v39 }
 0x254   :  { %881 = vst.msk [vmem:[#allocation2 + $0x26] sm:$0x3] %vm748_vm5, %v673_v46 }
 0x255   :  { %1197 = vst.msk [vmem:[#allocation2 + $0x1f] sm:$0x1] %vm618_vm4, %v543_v39 }
 0x256   :  { %1241 = vst.msk [vmem:[#allocation2 + $0x1e] sm:$0x3] %vm748_vm5, %v673_v46  ;;  %v785_v58 = vld [vmem:[#allocation2 + $0x28] sm:$0xff] }
 0x257   :  { %2726 = vmatmul.msk.f32.gmra.mxu1 %vm927_vm6, %v785_v58  ;;  %801 = vst.msk [vmem:[#allocation2 + $0x28] sm:$0xff] %vm471_vm0, %v3710_v49 }
 0x258   :  { %839 = vst.msk [vmem:[#allocation2 + $0x2f] sm:$0x1] %vm618_vm4, %v547_v42 }
 0x259   :  { %v3977_v38 = vpop.f32.mrf.mxu2  ;;  %1475 = vst.msk [vmem:[#allocation3 + $0xa8] sm:$0x3] %vm1472_vm8, %v2824_v30 }
 0x25a   :  { %1477 = vst.msk [vmem:[#allocation3 + $0x90] sm:$0xff] %vm1470_vm7, %v2824_v30 }
 0x25b   :  { %v908_v2 = vld [vmem:[#allocation2 + $0x20] sm:$0xff]  ;;  %1478 = vst.msk [vmem:[#allocation3 + $0x98] sm:$0x3] %vm1472_vm8, %v2824_v30 }
 0x25c   :  { %2708 = vmatmul.msk.f32.gmra.mxu0 %vm927_vm6, %v908_v2  ;;  %1162 = vst.msk [vmem:[#allocation2 + $0x20] sm:$0xff] %vm471_vm0, %v3710_v49 }
 0x25d   :  { %1199 = vst.msk [vmem:[#allocation2 + $0x27] sm:$0x1] %vm618_vm4, %v547_v42  ;;  %v1269_v29 = vld [vmem:[#allocation2 + $0x18] sm:$0xff] }
 0x25e   :  { %2741 = vmatmul.msk.f32.gmra.mxu2 %vm927_vm6, %v1269_v29  ;;  %1479 = vst.msk [vmem:[#allocation3 + $0x130] sm:$0xff] %vm1470_vm7, %v2824_v30 }
 0x25f   :  { %1480 = vst.msk [vmem:[#allocation3 + $0x138] sm:$0x3] %vm1472_vm8, %v2824_v30 }
 0x260   :  { %1502 = vst.msk [vmem:[#allocation3 + $0x9] sm:$0x1] %vm1481_vm9, %v2824_v30  ;;  %v1588_v41 = vld [vmem:[#allocation3 + $0xa1] sm:$0xff] }
 0x261   :  { %v3979_v16 = vpop.f32.mrf.mxu2  ;;  %1482 = vst.msk [vmem:[#allocation3] sm:$0x1] %vm1481_vm9, %v2824_v30 }
 0x262   :  { %1483 = vst.msk [vmem:[#allocation3 + $0x10] sm:$0x1] %vm1481_vm9, %v2824_v30 }
 0x263   :  { %1484 = vst.msk [vmem:[#allocation3 + $0x20] sm:$0x1] %vm1481_vm9, %v2824_v30 }
 0x264   :  { %v545_v12 = vpop.permute.xlu0 %544  ;;  %1485 = vst.msk [vmem:[#allocation3 + $0x30] sm:$0x1] %vm1481_vm9, %v2824_v30 }
 0x265   :  { %v549_v62 = vpop.permute.xlu1 %548  ;;  %630 = vst.msk [vmem:[#allocation2 + $0x2f] sm:$0xfe] %vm616_vm1, %v545_v12 }
 0x266   :  { %632 = vst.msk [vmem:[#allocation2 + $0x37] sm:$0xfe] %vm616_vm1, %v549_v62 }
 0x267   :  { %760 = vst.msk [vmem:[#allocation2 + $0x2e] sm:$0xfc] %vm746_vm2, %v675_v44  ;;  %v1677_v43 = vld [vmem:[#allocation3 + $0x2] sm:$0xff] }
 0x268   :  { %838 = vst.msk [vmem:[#allocation2 + $0x27] sm:$0xfe] %vm616_vm1, %v545_v12 }
 0x269   :  { %882 = vst.msk [vmem:[#allocation2 + $0x26] sm:$0xfc] %vm746_vm2, %v675_v44 }
 0x26a   :  { %1198 = vst.msk [vmem:[#allocation2 + $0x1f] sm:$0xfe] %vm616_vm1, %v545_v12 }
 0x26b   :  { %1242 = vst.msk [vmem:[#allocation2 + $0x1e] sm:$0xfc] %vm746_vm2, %v675_v44 }
 0x26c   :  { %v677_v49 = vpop.permute.xlu0 %676  ;;  %1486 = vst.msk [vmem:[#allocation3 + $0x40] sm:$0x1] %vm1481_vm9, %v2824_v30 }
 0x26d   :  { %761 = vst.msk [vmem:[#allocation2 + $0x36] sm:$0x3] %vm748_vm5, %v677_v49  ;;  %v3987_v55 = vpop.f32.mrf.mxu2 }
 0x26e   :  { %883 = vst.msk [vmem:[#allocation2 + $0x2e] sm:$0x3] %vm748_vm5, %v677_v49 }
 0x26f   :  { %1243 = vst.msk [vmem:[#allocation2 + $0x26] sm:$0x3] %vm748_vm5, %v677_v49 }
 0x270   :  { %1487 = vst.msk [vmem:[#allocation3 + $0x50] sm:$0x1] %vm1481_vm9, %v2824_v30 }
 0x271   :  { %1488 = vst.msk [vmem:[#allocation3 + $0x60] sm:$0x1] %vm1481_vm9, %v2824_v30 }
 0x272   :  { %1489 = vst.msk [vmem:[#allocation3 + $0x70] sm:$0x1] %vm1481_vm9, %v2824_v30 }
 0x273   :  { %1490 = vst.msk [vmem:[#allocation3 + $0x80] sm:$0x1] %vm1481_vm9, %v2824_v30 }
 0x274   :  { %v551_v34 = vpop.permute.xlu2 %550  ;;  %v679_v27 = vpop.permute.xlu0 %678  ;;  %v786_v17 = vld [vmem:[#allocation2 + $0x30] sm:$0xff]  ;;  %1491 = vst.msk [vmem:[#allocation3 + $0x90] sm:$0x1] %vm1481_vm9, %v2824_v30 }
 0x275   :  { %633 = vst.msk [vmem:[#allocation2 + $0x3f] sm:$0x1] %vm618_vm4, %v551_v34  ;;  %v909_v4 = vld [vmem:[#allocation2 + $0x28] sm:$0xff]  ;;  %2727 = vmatmul.msk.f32.gmra.mxu1 %vm927_vm6, %v786_v17 }
 0x276   :  { %762 = vst.msk [vmem:[#allocation2 + $0x36] sm:$0xfc] %vm746_vm2, %v679_v27  ;;  %2709 = vmatmul.msk.f32.gmra.mxu0 %vm927_vm6, %v909_v4  ;;  %v1270_v45 = vld [vmem:[#allocation2 + $0x20] sm:$0xff] }
 0x277   :  { %1163 = vst.msk [vmem:[#allocation2 + $0x28] sm:$0xff] %vm471_vm0, %v3714_v56  ;;  %2742 = vmatmul.msk.f32.gmra.mxu2 %vm927_vm6, %v1270_v45 }
 0x278   :  { %1200 = vst.msk [vmem:[#allocation2 + $0x27] sm:$0xfe] %vm616_vm1, %v549_v62 }
 0x279   :  { %1244 = vst.msk [vmem:[#allocation2 + $0x26] sm:$0xfc] %vm746_vm2, %v679_v27 }
 0x27a   :  { %1201 = vst.msk [vmem:[#allocation2 + $0x2f] sm:$0x1] %vm618_vm4, %v551_v34 }
 0x27b   :  { %802 = vst.msk [vmem:[#allocation2 + $0x30] sm:$0xff] %vm471_vm0, %v3714_v56 }
 0x27c   :  { %840 = vst.msk [vmem:[#allocation2 + $0x2f] sm:$0xfe] %vm616_vm1, %v549_v62 }
 0x27d   :  { %841 = vst.msk [vmem:[#allocation2 + $0x37] sm:$0x1] %vm618_vm4, %v551_v34  ;;  %v817_v33 = vpop.permute.xlu2 %816  ;;  %v819_v57 = vpop.permute.xlu0 %818  ;;  %v1275_v34 = vld [vmem:[#allocation2 + $0x48] sm:$0xff] }
 0x27e   :  { %884 = vst.msk [vmem:[#allocation2 + $0x2e] sm:$0xfc] %vm746_vm2, %v679_v27  ;;  %v1110_v21 = vpop.f32.mrf.mxu1 }
 0x27f   :  { %v4000_v35 = vpop.f32.mrf.mxu2  ;;  %1492 = vst.msk [vmem:[#allocation3 + $0xa0] sm:$0x1] %vm1481_vm9, %v2824_v30 }
 0x280   :  { %1493 = vst.msk [vmem:[#allocation3 + $0xb0] sm:$0x1] %vm1481_vm9, %v2824_v30 }
 0x281   :  { %1494 = vst.msk [vmem:[#allocation3 + $0xc0] sm:$0x1] %vm1481_vm9, %v2824_v30 }
 0x282   :  { %1495 = vst.msk [vmem:[#allocation3 + $0xd0] sm:$0x1] %vm1481_vm9, %v2824_v30 }
 0x283   :  { %1496 = vst.msk [vmem:[#allocation3 + $0xe0] sm:$0x1] %vm1481_vm9, %v2824_v30 }
 0x284   :  { %1497 = vst.msk [vmem:[#allocation3 + $0xf0] sm:$0x1] %vm1481_vm9, %v2824_v30 }
 0x285   :  { %v863_v54 = vpop.permute.xlu2 %862  ;;  %1498 = vst.msk [vmem:[#allocation3 + $0x100] sm:$0x1] %vm1481_vm9, %v2824_v30 }
 0x286   :  { %1499 = vst.msk [vmem:[#allocation3 + $0x110] sm:$0x1] %vm1481_vm9, %v2824_v30 }
 0x287   :  { %1500 = vst.msk [vmem:[#allocation3 + $0x120] sm:$0x1] %vm1481_vm9, %v2824_v30 }
 0x288   :  { %1501 = vst.msk [vmem:[#allocation3 + $0x130] sm:$0x1] %vm1481_vm9, %v2824_v30 }
 0x289   :  { %1503 = vst.msk [vmem:[#allocation3 + $0x19] sm:$0x1] %vm1481_vm9, %v2824_v30 }
 0x28a   :  { %1504 = vst.msk [vmem:[#allocation3 + $0x29] sm:$0x1] %vm1481_vm9, %v2824_v30 }
 0x28b   :  { %1505 = vst.msk [vmem:[#allocation3 + $0x39] sm:$0x1] %vm1481_vm9, %v2824_v30 }
 0x28c   :  { %v681_v15 = vpop.permute.xlu1 %680  ;;  %1506 = vst.msk [vmem:[#allocation3 + $0x49] sm:$0x1] %vm1481_vm9, %v2824_v30 }
 0x28d   :  { %763 = vst.msk [vmem:[#allocation2 + $0x3e] sm:$0x3] %vm748_vm5, %v681_v15 }
 0x28e   :  { %885 = vst.msk [vmem:[#allocation2 + $0x36] sm:$0x3] %vm748_vm5, %v681_v15 }
 0x28f   :  { %1245 = vst.msk [vmem:[#allocation2 + $0x2e] sm:$0x3] %vm748_vm5, %v681_v15  ;;  %v2297_v15 = vld [vmem:[#allocation3 + $0x91] sm:$0xff] }
 0x290   :  { %1507 = vst.msk [vmem:[#allocation3 + $0x59] sm:$0x1] %vm1481_vm9, %v2824_v30 }
 0x291   :  { %1508 = vst.msk [vmem:[#allocation3 + $0x69] sm:$0x1] %vm1481_vm9, %v2824_v30 }
 0x292   :  { %1509 = vst.msk [vmem:[#allocation3 + $0x79] sm:$0x1] %vm1481_vm9, %v2824_v30 }
 0x293   :  { %1510 = vst.msk [vmem:[#allocation3 + $0x89] sm:$0x1] %vm1481_vm9, %v2824_v30 }
 0x294   :  { %v787_v56 = vld [vmem:[#allocation2 + $0x38] sm:$0xff]  ;;  %v861_v52 = vpop.permute.xlu1 %860  ;;  %1511 = vst.msk [vmem:[#allocation3 + $0x99] sm:$0x1] %vm1481_vm9, %v2824_v30 }
 0x295   :  { %803 = vst.msk [vmem:[#allocation2 + $0x38] sm:$0xff] %vm471_vm0, %v3819_v19  ;;  %v910_v3 = vld [vmem:[#allocation2 + $0x30] sm:$0xff]  ;;  %2728 = vmatmul.msk.f32.gmra.mxu1 %vm927_vm6, %v787_v56  ;;  %v4019_v25 = vpop.f32.mrf.mxu2 }
 0x296   :  { %842 = vst.msk [vmem:[#allocation2 + $0x37] sm:$0xfe] %vm616_vm1, %v817_v33  ;;  %2710 = vmatmul.msk.f32.gmra.mxu0 %vm927_vm6, %v910_v3  ;;  %v1271_v59 = vld [vmem:[#allocation2 + $0x28] sm:$0xff]  ;;  %v1276_v56 = vld [vmem:[#allocation2 + $0x50] sm:$0xff] }
 0x297   :  { %843 = vst.msk [vmem:[#allocation2 + $0x3f] sm:$0x1] %vm618_vm4, %v819_v57  ;;  %2743 = vmatmul.msk.f32.gmra.mxu2 %vm927_vm6, %v1271_v59 }
 0x298   :  { %886 = vst.msk [vmem:[#allocation2 + $0x36] sm:$0xfc] %vm746_vm2, %v861_v52 }
 0x299   :  { %887 = vst.msk [vmem:[#allocation2 + $0x3e] sm:$0x3] %vm748_vm5, %v863_v54 }
 0x29a   :  { %1164 = vst.msk [vmem:[#allocation2 + $0x30] sm:$0xff] %vm471_vm0, %v3819_v19 }
 0x29b   :  { %1202 = vst.msk [vmem:[#allocation2 + $0x2f] sm:$0xfe] %vm616_vm1, %v817_v33  ;;  %v2393_v27 = vld [vmem:[#allocation3 + $0x92] sm:$0xff] }
 0x29c   :  { %1203 = vst.msk [vmem:[#allocation2 + $0x37] sm:$0x1] %vm618_vm4, %v819_v57  ;;  %v1223_v18 = vpop.permute.xlu2 %1222 }
 0x29d   :  { %1246 = vst.msk [vmem:[#allocation2 + $0x2e] sm:$0xfc] %vm746_vm2, %v861_v52 }
 0x29e   :  { %1247 = vst.msk [vmem:[#allocation2 + $0x36] sm:$0x3] %vm748_vm5, %v863_v54  ;;  %v1113_v28 = vpop.f32.mrf.mxu1 }
 0x29f   :  { %v995_v23 = vpop.f32.mrf.mxu0  ;;  %1512 = vst.msk [vmem:[#allocation3 + $0xa9] sm:$0x1] %vm1481_vm9, %v2824_v30 }
 0x2a0   :  { %v911_v9 = vld [vmem:[#allocation2 + $0x38] sm:$0xff]  ;;  %v1111_v20 = vadd.f32 %v1110_v21, %v995_v23  ;;  %1513 = vst.msk [vmem:[#allocation3 + $0xb9] sm:$0x1] %vm1481_vm9, %v2824_v30  ;;  %v1278_v21 = vld [vmem:[#allocation2 + $0x60] sm:$0xff] }
 0x2a1   :  { %2711 = vmatmul.msk.f32.gmra.mxu0 %vm927_vm6, %v911_v9  ;;  %1165 = vst.msk [vmem:[#allocation2 + $0x38] sm:$0xff] %vm471_vm0, %v3882_v50 }
 0x2a2   :  { %1514 = vst.msk [vmem:[#allocation3 + $0xc9] sm:$0x1] %vm1481_vm9, %v2824_v30 }
 0x2a3   :  { %1515 = vst.msk [vmem:[#allocation3 + $0xd9] sm:$0x1] %vm1481_vm9, %v2824_v30 }
 0x2a4   :  { %v385_v24 = vpop.permute.xlu2 %384  ;;  %1516 = vst.msk [vmem:[#allocation3 + $0xe9] sm:$0x1] %vm1481_vm9, %v2824_v30 }
 0x2a5   :  { %v1272_v5 = vld [vmem:[#allocation2 + $0x30] sm:$0xff]  ;;  %v465_v48 = vmax.f32 %v3912_v37, %v385_v24  ;;  %1517 = vst.msk [vmem:[#allocation3 + $0xf9] sm:$0x1] %vm1481_vm9, %v2824_v30 }
 0x2a6   :  { %2744 = vmatmul.msk.f32.gmra.mxu2 %vm927_vm6, %v1272_v5  ;;  %v1116_v58 = vpop.f32.mrf.mxu1  ;;  %1518 = vst.msk [vmem:[#allocation3 + $0x109] sm:$0x1] %vm1481_vm9, %v2824_v30  ;;  %v1685_v4 = vld [vmem:[#allocation3 + $0xa2] sm:$0xff] }
 0x2a7   :  { %1184 = vrot.lane.b32.xlu1 %v465_v48, %s2823_s17  ;;  %1519 = vst.msk [vmem:[#allocation3 + $0x119] sm:$0x1] %vm1481_vm9, %v2824_v30 }
 0x2a8   :  { %v4035_v19 = vpop.f32.mrf.mxu2  ;;  %1520 = vst.msk [vmem:[#allocation3 + $0x129] sm:$0x1] %vm1481_vm9, %v2824_v30 }
 0x2a9   :  { %1521 = vst.msk [vmem:[#allocation3 + $0x139] sm:$0x1] %vm1481_vm9, %v2824_v30 }
 0x2ae   :  { %v1181_v7 = vpop.permute.xlu1 %1180 }
 0x2af   :  { %1205 = vst.msk [vmem:[#allocation2 + $0x3f] sm:$0x1] %vm618_vm4, %v1181_v7  ;;  %1612 = vrot.lane.b32.xlu1 %v1580_v22, %s2822_s30  ;;  %v998_v50 = vpop.f32.mrf.mxu0 }
 0x2b4   :  { %v1179_v53 = vpop.permute.xlu0 %1178 }
 0x2b5   :  { %1204 = vst.msk [vmem:[#allocation2 + $0x37] sm:$0xfe] %vm616_vm1, %v1179_v53 }
 0x2b6   :  { %v1350_v6 = vpop.f32.mrf.mxu2  ;;  %v383_v13 = vpop.permute.xlu1 %382  ;;  %1248 = vst.msk [vmem:[#allocation2 + $0x36] sm:$0xfc] %vm746_vm2, %v1223_v18 }
 0x2b7   :  { %v1398_v14 = vadd.f32 %v1350_v6, %v1111_v20  ;;  %v464_v47 = vmax.f32 %v3891_v31, %v383_v13  ;;  %1628 = vrot.lane.b32.xlu1 %v1588_v41, %s2822_s30  ;;  %v1114_v31 = vadd.f32 %v1113_v28, %v998_v50  ;;  %v1279_v20 = vld [vmem:[#allocation2 + $0x68] sm:$0xff]  ;;  %v1548_v28 = vld [vmem:[#allocation3] sm:$0xff] }
 0x2b8   :  { %1564 = vst.msk [vmem:[#allocation4] sm:$0xff] %vm1470_vm7, %v1548_v28 }
 0x2b9   :  { %v1418_v1 = vmul.f32 %v4054_v8, %v1398_v14  ;;  %1173 = vst.msk [vmem:[#allocation2 + $0x78] sm:$0xff] %vm471_vm0, %v464_v47  ;;  %1226 = vrot.lane.b32.xlu2 %v464_v47, %s2822_s30  ;;  %1182 = vrot.lane.b32.xlu0 %v464_v47, %s2823_s17 }
 0x2bb   :  { %v1438_v63 = vadd.f32 %v4061_v0, %v1418_v1 }
 0x2bc   :  { %v1225_v32 = vpop.permute.xlu0 %1224  ;;  %v1119_v59 = vpop.f32.mrf.mxu1 }
 0x2bd   :  { %v1454_v51 = vmax.f32 %v1438_v63, 0.0  ;;  %1249 = vst.msk [vmem:[#allocation2 + $0x3e] sm:$0x3] %vm748_vm5, %v1225_v32  ;;  %v1001_v39 = vpop.f32.mrf.mxu0  ;;  %v1280_v32 = vld [vmem:[#allocation2 + $0x70] sm:$0xff] }
 0x2be   :  { %v1117_v2 = vadd.f32 %v1116_v58, %v1001_v39 }
 0x2bf   :  { %1523 = vst.msk [vmem:[#allocation3 + $0x11] sm:$0xff] %vm1470_vm7, %v1454_v51 }
 0x2c1   :  { %1709 = vrot.lane.b32.xlu2 %v1677_v43, %s2825_s12  ;;  %1228 = vrot.lane.b32.xlu0 %v465_v48, %s2822_s30  ;;  %v1277_v48 = vld [vmem:[#allocation2 + $0x58] sm:$0xff] }
 0x2c4   :  { %v1353_v60 = vpop.f32.mrf.mxu2  ;;  %v1273_v10 = vld [vmem:[#allocation2 + $0x38] sm:$0xff]  ;;  %v1122_v13 = vpop.f32.mrf.mxu1 }
 0x2c5   :  { %v1399_v11 = vadd.f32 %v1353_v60, %v1114_v31  ;;  %2745 = vmatmul.msk.f32.gmra.mxu2 %vm927_vm6, %v1273_v10 }
 0x2c6   :  { %v1678_v46 = vld [vmem:[#allocation3 + $0x12] sm:$0xff] }
 0x2c7   :  { %v1419_v37 = vmul.f32 %v4054_v8, %v1399_v11  ;;  %1711 = vrot.lane.b32.xlu1 %v1678_v46, %s2825_s12  ;;  %v4148_v33 = vld [vmem:[#allocation3 + $0x10] sm:$0xff]  ;;  %v1556_v11 = vld [vmem:[#allocation3 + $0xa0] sm:$0xff] }
 0x2c8   :  { %1565 = vst.msk [vmem:[#allocation4 + $0x8] sm:$0xff] %vm1470_vm7, %v4148_v33  ;;  %v1581_v57 = vld [vmem:[#allocation3 + $0x11] sm:$0xff] }
 0x2c9   :  { %v1439_v36 = vadd.f32 %v4061_v0, %v1419_v37  ;;  %2432 = vrot.lane.b32.xlu0 %v2393_v27, %s2825_s12  ;;  %1725 = vrot.lane.b32.xlu2 %v1685_v4, %s2825_s12  ;;  %1572 = vst.msk [vmem:[#allocation4 + $0x40] sm:$0xff] %vm1470_vm7, %v1556_v11 }
 0x2cb   :  { %v1455_v42 = vmax.f32 %v1439_v36, 0.0 }
 0x2cd   :  { %1524 = vst.msk [vmem:[#allocation3 + $0x21] sm:$0xff] %vm1470_vm7, %v1455_v42  ;;  %2746 = vmatmul.msk.f32.gmra.mxu2 %vm927_vm6, %v1274_v26  ;;  %v1004_v3 = vpop.f32.mrf.mxu0 }
 0x2ce   :  { %v1120_v52 = vadd.f32 %v1119_v59, %v1004_v3  ;;  %v1540_v3 = vld [vmem:[%s4702_s4 + $0x8] sm:$0xff] }
 0x2cf   :  { %v1356_v29 = vpop.f32.mrf.mxu2 }
 0x2d0   :  { %v1400_v12 = vadd.f32 %v1356_v29, %v1117_v2 }
 0x2d1   :  { %1614 = vrot.lane.b32.xlu0 %v1581_v57, %s2822_s30  ;;  %2336 = vrot.lane.b32.xlu2 %v2297_v15, %s2822_s30  ;;  %v1541_v15 = vld [vmem:[%s4702_s4 + $0x10] sm:$0xff] }
 0x2d2   :  { %v1420_v62 = vmul.f32 %v4054_v8, %v1400_v12  ;;  %2205 = vmatpush.msrb.mxu0 %v1541_v15 }
 0x2d4   :  { %v1440_v44 = vadd.f32 %v4061_v0, %v1420_v62  ;;  %v1582_v49 = vld [vmem:[#allocation3 + $0x21] sm:$0xff]  ;;  %v1125_v36 = vpop.f32.mrf.mxu1  ;;  %2206 = vmatpush.msrb.mxu0 %v1540_v3 }
 0x2d5   :  { %1616 = vrot.lane.b32.xlu1 %v1582_v49, %s2822_s30  ;;  %2747 = vmatmul.msk.f32.gmra.mxu2 %vm927_vm6, %v1275_v34  ;;  %v4144_v45 = vld [vmem:[#allocation3 + $0x20] sm:$0xff] }
 0x2d6   :  { %v1456_v17 = vmax.f32 %v1440_v44, 0.0  ;;  %1566 = vst.msk [vmem:[#allocation4 + $0x10] sm:$0xff] %vm1470_vm7, %v4144_v45  ;;  %v1919_v54 = vld [vmem:[#allocation3 + $0x22] sm:$0xff] }
 0x2d8   :  { %1525 = vst.msk [vmem:[#allocation3 + $0x31] sm:$0xff] %vm1470_vm7, %v1456_v17 }
 0x2d9   :  { %1950 = vrot.lane.b32.xlu0 %v1678_v46, %s2825_s12  ;;  %1854 = vrot.lane.b32.xlu2 %v1581_v57, %s2822_s30  ;;  %v1007_v6 = vpop.f32.mrf.mxu0 }
 0x2da   :  { %v1123_v14 = vadd.f32 %v1122_v13, %v1007_v6  ;;  %v1542_v13 = vld [vmem:[%s4702_s4 + $0x18] sm:$0xff] }
 0x2dd   :  { %1952 = vrot.lane.b32.xlu1 %v1919_v54, %s2825_s12  ;;  %2748 = vmatmul.msk.f32.gmra.mxu2 %vm927_vm6, %v1276_v56 }
 0x2df   :  { %v4159_v18 = vld [vmem:[#allocation3 + $0x30] sm:$0xff] }
 0x2e0   :  { %1567 = vst.msk [vmem:[#allocation4 + $0x18] sm:$0xff] %vm1470_vm7, %v4159_v18  ;;  %v1583_v5 = vld [vmem:[#allocation3 + $0x31] sm:$0xff] }
 0x2e1   :  { %v1359_v30 = vpop.f32.mrf.mxu2  ;;  %v1920_v23 = vld [vmem:[#allocation3 + $0x32] sm:$0xff]  ;;  %1856 = vrot.lane.b32.xlu0 %v1582_v49, %s2822_s30  ;;  %1713 = vrot.lane.b32.xlu2 %v1919_v54, %s2825_s12 }
 0x2e2   :  { %v1401_v9 = vadd.f32 %v1359_v30, %v1120_v52 }
 0x2e4   :  { %v1421_v24 = vmul.f32 %v4054_v8, %v1401_v9 }
 0x2e5   :  { %1618 = vrot.lane.b32.xlu1 %v1583_v5, %s2822_s30  ;;  %2749 = vmatmul.msk.f32.gmra.mxu2 %vm927_vm6, %v1277_v48 }
 0x2e6   :  { %v1441_v22 = vadd.f32 %v4061_v0, %v1421_v24 }
 0x2e8   :  { %v1457_v7 = vmax.f32 %v1441_v22, 0.0  ;;  %v1539_v22 = vld [vmem:[%s4702_s4] sm:$0xff] }
 0x2e9   :  { %2418 = vrot.lane.b32.xlu0 %v1919_v54, %s2825_s12  ;;  %2322 = vrot.lane.b32.xlu2 %v1582_v49, %s2822_s30 }
 0x2ea   :  { %1526 = vst.msk [vmem:[#allocation3 + $0x41] sm:$0xff] %vm1470_vm7, %v1457_v7  ;;  %2207 = vmatpush.msrb.mxu0 %v1539_v22 }
 0x2ed   :  { %1954 = vrot.lane.b32.xlu1 %v1920_v23, %s2825_s12  ;;  %2750 = vmatmul.msk.f32.gmra.mxu2 %vm927_vm6, %v1278_v21 }
 0x2f1   :  { %v4174_v53 = vld [vmem:[#allocation3 + $0x40] sm:$0xff]  ;;  %1858 = vrot.lane.b32.xlu0 %v1583_v5, %s2822_s30  ;;  %1715 = vrot.lane.b32.xlu2 %v1920_v23, %s2825_s12 }
 0x2f2   :  { %1568 = vst.msk [vmem:[#allocation4 + $0x20] sm:$0xff] %vm1470_vm7, %v4174_v53  ;;  %v1584_v41 = vld [vmem:[#allocation3 + $0x41] sm:$0xff]  ;;  %v1128_v34 = vpop.f32.mrf.mxu1 }
 0x2f3   :  { %v1921_v63 = vld [vmem:[#allocation3 + $0x42] sm:$0xff]  ;;  %v1010_v37 = vpop.f32.mrf.mxu0 }
 0x2f4   :  { %v1126_v39 = vadd.f32 %v1125_v36, %v1010_v37  ;;  %v1547_v36 = vld [vmem:[%s4702_s4 + $0x40] sm:$0xff] }
 0x2f5   :  { %1620 = vrot.lane.b32.xlu1 %v1584_v41, %s2822_s30  ;;  %2751 = vmatmul.msk.f32.gmra.mxu2 %vm927_vm6, %v1279_v20  ;;  %v1543_v20 = vld [vmem:[%s4702_s4 + $0x20] sm:$0xff] }
 0x2f6   :  { %2559 = vmatpush.msrb.mxu1 %v1547_v36 }
 0x2f9   :  { %2420 = vrot.lane.b32.xlu0 %v1920_v23, %s2825_s12  ;;  %2324 = vrot.lane.b32.xlu2 %v1583_v5, %s2822_s30 }
 0x2fa   :  { %v1362_v47 = vpop.f32.mrf.mxu2 }
 0x2fb   :  { %v1402_v1 = vadd.f32 %v1362_v47, %v1123_v14 }
 0x2fd   :  { %1956 = vrot.lane.b32.xlu1 %v1921_v63, %s2825_s12  ;;  %v1422_v51 = vmul.f32 %v4054_v8, %v1402_v1  ;;  %2752 = vmatmul.msk.f32.gmra.mxu2 %vm927_vm6, %v1280_v32 }
 0x2ff   :  { %v1442_v43 = vadd.f32 %v4061_v0, %v1422_v51  ;;  %v1134_v51 = vpop.f32.mrf.mxu3 }
 0x301   :  { %v1458_v50 = vmax.f32 %v1442_v43, 0.0  ;;  %1860 = vrot.lane.b32.xlu0 %v1584_v41, %s2822_s30  ;;  %1717 = vrot.lane.b32.xlu2 %v1921_v63, %s2825_s12 }
 0x303   :  { %1527 = vst.msk [vmem:[#allocation3 + $0x51] sm:$0xff] %vm1470_vm7, %v1458_v50 }
 0x309   :  { %2422 = vrot.lane.b32.xlu0 %v1921_v63, %s2825_s12  ;;  %2326 = vrot.lane.b32.xlu2 %v1584_v41, %s2822_s30  ;;  %v1544_v41 = vld [vmem:[%s4702_s4 + $0x28] sm:$0xff] }
 0x30a   :  { %v1585_v31 = vld [vmem:[#allocation3 + $0x51] sm:$0xff]  ;;  %2092 = vmatpush.msrb.mxu3 %v1544_v41 }
 0x30b   :  { %v4192_v60 = vld [vmem:[#allocation3 + $0x50] sm:$0xff]  ;;  %1622 = vrot.lane.b32.xlu1 %v1585_v31, %s2822_s30 }
 0x30c   :  { %1569 = vst.msk [vmem:[#allocation4 + $0x28] sm:$0xff] %vm1470_vm7, %v4192_v60  ;;  %v1682_v10 = vld [vmem:[#allocation3 + $0x52] sm:$0xff]  ;;  %2093 = vmatpush.msrb.mxu3 %v1543_v20 }
 0x30e   :  { %2094 = vmatpush.msrb.mxu3 %v1542_v13 }
 0x311   :  { %1862 = vrot.lane.b32.xlu0 %v1585_v31, %s2822_s30  ;;  %1719 = vrot.lane.b32.xlu2 %v1682_v10, %s2825_s12 }
 0x312   :  { %v1131_v32 = vpop.f32.mrf.mxu1 }
 0x313   :  { %1958 = vrot.lane.b32.xlu1 %v1682_v10, %s2825_s12  ;;  %v1227_v42 = vpop.permute.xlu2 %1226  ;;  %v1013_v49 = vpop.f32.mrf.mxu0 }
 0x314   :  { %v1129_v27 = vadd.f32 %v1128_v34, %v1013_v49 }
 0x319   :  { %v1185_v46 = vpop.permute.xlu1 %1184  ;;  %2424 = vrot.lane.b32.xlu0 %v1682_v10, %s2825_s12  ;;  %2328 = vrot.lane.b32.xlu2 %v1585_v31, %s2822_s30 }
 0x31a   :  { %v1365_v26 = vpop.f32.mrf.mxu2  ;;  %1221 = vst.msk [vmem:[#allocation2 + $0x7f] sm:$0x1] %vm618_vm4, %v1185_v46  ;;  %v1545_v46 = vld [vmem:[%s4702_s4 + $0x30] sm:$0xff] }
 0x31b   :  { %v1403_v58 = vadd.f32 %v1365_v26, %v1126_v39  ;;  %v1710_v44 = vpop.permute.xlu2 %1709  ;;  %v1546_v39 = vld [vmem:[%s4702_s4 + $0x38] sm:$0xff]  ;;  %v1135_v26 = vadd.f32 %v1134_v51, %v3958_v40 }
 0x31c   :  { %2560 = vmatpush.msrb.mxu1 %v1546_v39 }
 0x31d   :  { %v1423_v2 = vmul.f32 %v4054_v8, %v1403_v58  ;;  %v1137_v58 = vpop.f32.mrf.mxu3 }
 0x31e   :  { %v1016_v63 = vpop.f32.mrf.mxu0  ;;  %2561 = vmatpush.msrb.mxu1 %v1545_v46 }
 0x31f   :  { %v1443_v29 = vadd.f32 %v4061_v0, %v1423_v2  ;;  %v1132_v43 = vadd.f32 %v1131_v32, %v1016_v63 }
 0x321   :  { %v1459_v12 = vmax.f32 %v1443_v29, 0.0  ;;  %v1613_v62 = vpop.permute.xlu1 %1612 }
 0x322   :  { %1661 = vst.msk [vmem:[#allocation4] sm:$0xff] %vm1660_vm10, %v1613_v62 }
 0x323   :  { %1528 = vst.msk [vmem:[#allocation3 + $0x61] sm:$0xff] %vm1470_vm7, %v1459_v12  ;;  %v1726_v48 = vpop.permute.xlu2 %1725 }
 0x324   :  { %1758 = vst.msk [vmem:[#allocation4] sm:$0xff] %vm1757_vm11, %v1710_v44 }
 0x329   :  { %v1368_v17 = vpop.f32.mrf.mxu2  ;;  %v1629_v4 = vpop.permute.xlu1 %1628 }
 0x32a   :  { %v1404_v54 = vadd.f32 %v1368_v17, %v1129_v27  ;;  %1669 = vst.msk [vmem:[#allocation4 + $0x40] sm:$0xff] %vm1660_vm10, %v1629_v4  ;;  %v1827_v56 = vld [vmem:[#allocation3 + $0x61] sm:$0xff]  ;;  %v1138_v17 = vadd.f32 %v1137_v58, %v3969_v61  ;;  %v1140_v4 = vpop.f32.mrf.mxu3 }
 0x32b   :  { %1624 = vrot.lane.b32.xlu1 %v1827_v56, %s2822_s30  ;;  %v1183_v57 = vpop.permute.xlu0 %1182  ;;  %v1774_v59 = vld [vmem:[#allocation4] sm:$0xff]  ;;  %1864 = vrot.lane.b32.xlu0 %v1827_v56, %s2822_s30  ;;  %1766 = vst.msk [vmem:[#allocation4 + $0x40] sm:$0xff] %vm1757_vm11, %v1726_v48  ;;  %v1141_v48 = vadd.f32 %v1140_v4, %v3977_v38 }
 0x32c   :  { %v1424_v52 = vmul.f32 %v4054_v8, %v1404_v54  ;;  %v1683_v30 = vld [vmem:[#allocation3 + $0x62] sm:$0xff]  ;;  %1220 = vst.msk [vmem:[#allocation2 + $0x77] sm:$0xfe] %vm616_vm1, %v1183_v57  ;;  %2770 = vmatmul.msk.f32.vlgmr.msrb.gmra.mxu0 %vm2030_vm12, %v1774_v59 }
 0x32d   :  { %v4223_v9 = vld [vmem:[#allocation3 + $0x60] sm:$0xff]  ;;  %1264 = vst.msk [vmem:[#allocation2 + $0x76] sm:$0xfc] %vm746_vm2, %v1227_v42  ;;  %1721 = vrot.lane.b32.xlu2 %v1683_v30, %s2825_s12 }
 0x32e   :  { %v1444_v24 = vadd.f32 %v4061_v0, %v1424_v52  ;;  %1806 = vst.msk [vmem:[#allocation4] sm:$0xff] %vm1470_vm7, %v4148_v33  ;;  %v4243_v33 = vpop.permute.xlu2 %2336 }
 0x32f   :  { %1570 = vst.msk [vmem:[#allocation4 + $0x30] sm:$0xff] %vm1470_vm7, %v4223_v9 }
 0x330   :  { %v1460_v5 = vmax.f32 %v1444_v24, 0.0 }
 0x332   :  { %1529 = vst.msk [vmem:[#allocation3 + $0x71] sm:$0xff] %vm1470_vm7, %v1460_v5 }
 0x333   :  { %1960 = vrot.lane.b32.xlu1 %v1683_v30, %s2825_s12  ;;  %v1229_v7 = vpop.permute.xlu0 %1228  ;;  %2426 = vrot.lane.b32.xlu0 %v1683_v30, %s2825_s12 }
 0x334   :  { %1265 = vst.msk [vmem:[#allocation2 + $0x7e] sm:$0x3] %vm748_vm5, %v1229_v7 }
 0x335   :  { %2330 = vrot.lane.b32.xlu2 %v1827_v56, %s2822_s30 }
 0x336   :  { %v1855_v1 = vpop.permute.xlu2 %1854 }
 0x337   :  { %1902 = vst.msk [vmem:[#allocation4] sm:$0xff] %vm1660_vm10, %v1855_v1 }
 0x339   :  { %v4245_v23 = vld [vmem:[#allocation3 + $0x70] sm:$0xff]  ;;  %v1712_v47 = vpop.permute.xlu1 %1711 }
 0x33a   :  { %v1828_v21 = vld [vmem:[#allocation3 + $0x71] sm:$0xff]  ;;  %1571 = vst.msk [vmem:[#allocation4 + $0x38] sm:$0xff] %vm1470_vm7, %v4245_v23 }
 0x33b   :  { %1626 = vrot.lane.b32.xlu1 %v1828_v21, %s2822_s30  ;;  %v1281_v6 = vld [vmem:[#allocation2 + $0x78] sm:$0xff]  ;;  %1866 = vrot.lane.b32.xlu0 %v1828_v21, %s2822_s30  ;;  %v4266_v28 = vpop.permute.xlu0 %2432 }
 0x33c   :  { %2753 = vmatmul.msk.f32.gmra.mxu2 %vm927_vm6, %v1281_v6  ;;  %v1684_v14 = vld [vmem:[#allocation3 + $0x72] sm:$0xff] }
 0x33d   :  { %1723 = vrot.lane.b32.xlu2 %v1684_v14, %s2825_s12 }
 0x33e   :  { %v1714_v10 = vpop.permute.xlu2 %1713 }
 0x343   :  { %1962 = vrot.lane.b32.xlu1 %v1684_v14, %s2825_s12  ;;  %2428 = vrot.lane.b32.xlu0 %v1684_v14, %s2825_s12  ;;  %v1615_v12 = vpop.permute.xlu0 %1614  ;;  %v1143_v14 = vpop.f32.mrf.mxu3 }
 0x344   :  { %1662 = vst.msk [vmem:[#allocation4 + $0x8] sm:$0xff] %vm1660_vm10, %v1615_v12 }
 0x345   :  { %2332 = vrot.lane.b32.xlu2 %v1828_v21, %s2822_s30  ;;  %1759 = vst.msk [vmem:[#allocation4 + $0x8] sm:$0xff] %vm1757_vm11, %v1712_v47 }
 0x346   :  { %v2323_v44 = vpop.permute.xlu2 %2322 }
 0x347   :  { %v1617_v50 = vpop.permute.xlu1 %1616 }
 0x348   :  { %1663 = vst.msk [vmem:[#allocation4 + $0x10] sm:$0xff] %vm1660_vm10, %v1617_v50  ;;  %v1371_v31 = vpop.f32.mrf.mxu2 }
 0x349   :  { %v1405_v11 = vadd.f32 %v1371_v31, %v1132_v43  ;;  %1760 = vst.msk [vmem:[#allocation4 + $0x10] sm:$0xff] %vm1757_vm11, %v1714_v10  ;;  %v1144_v43 = vadd.f32 %v1143_v14, %v3979_v16 }
 0x34b   :  { %v1425_v37 = vmul.f32 %v4054_v8, %v1405_v11  ;;  %v1951_v56 = vpop.permute.xlu0 %1950  ;;  %v1146_v46 = vpop.f32.mrf.mxu3 }
 0x34c   :  { %1998 = vst.msk [vmem:[#allocation4] sm:$0xff] %vm1757_vm11, %v1951_v56  ;;  %v1775_v59 = vld [vmem:[#allocation4 + $0x8] sm:$0xff]  ;;  %v1147_v58 = vadd.f32 %v1146_v46, %v3987_v55 }
 0x34d   :  { %v1445_v42 = vadd.f32 %v4061_v0, %v1425_v37  ;;  %2771 = vmatmul.msk.f32.gmra.mxu0 %vm2030_vm12, %v1775_v59  ;;  %1807 = vst.msk [vmem:[#allocation4 + $0x8] sm:$0xff] %vm1470_vm7, %v4144_v45 }
 0x34e   :  { %v1716_v57 = vpop.permute.xlu2 %1715 }
 0x34f   :  { %v1953_v2 = vpop.permute.xlu1 %1952  ;;  %v1461_v29 = vmax.f32 %v1445_v42, 0.0  ;;  %v4332_v42 = vld [vmem:[#allocation4 + $0x40] sm:$0xff] }
 0x350   :  { %v1374_v62 = vpop.f32.mrf.mxu2  ;;  %v1776_v34 = vld [vmem:[#allocation4 + $0x10] sm:$0xff] }
 0x351   :  { %v1406_v49 = vadd.f32 %v1374_v62, %v1135_v26  ;;  %1530 = vst.msk [vmem:[#allocation3 + $0x81] sm:$0xff] %vm1470_vm7, %v1461_v29 }
 0x352   :  { %1808 = vst.msk [vmem:[#allocation4 + $0x10] sm:$0xff] %vm1470_vm7, %v4159_v18 }
 0x353   :  { %v1426_v27 = vmul.f32 %v4054_v8, %v1406_v49  ;;  %v1857_v21 = vpop.permute.xlu0 %1856  ;;  %v2014_v41 = vld [vmem:[#allocation4] sm:$0xff] }
 0x354   :  { %1903 = vst.msk [vmem:[#allocation4 + $0x8] sm:$0xff] %vm1660_vm10, %v1857_v21  ;;  %2754 = vmatmul.msk.f32.vlgmr.msrb.gmra.mxu3 %vm2030_vm12, %v2014_v41 }
 0x355   :  { %v1446_v40 = vadd.f32 %v4061_v0, %v1426_v27  ;;  %1999 = vst.msk [vmem:[#allocation4 + $0x8] sm:$0xff] %vm1757_vm11, %v1953_v2  ;;  %2772 = vmatmul.msk.f32.gmra.mxu0 %vm2030_vm12, %v1776_v34 }
 0x356   :  { %v2325_v6 = vpop.permute.xlu2 %2324  ;;  %2274 = vst.msk [vmem:[#allocation4] sm:$0xff] %vm1470_vm7, %v4144_v45 }
 0x357   :  { %v1619_v15 = vpop.permute.xlu1 %1618  ;;  %v1462_v54 = vmax.f32 %v1446_v40, 0.0  ;;  %2370 = vst.msk [vmem:[#allocation4] sm:$0xff] %vm1660_vm10, %v2323_v44 }
 0x358   :  { %1664 = vst.msk [vmem:[#allocation4 + $0x18] sm:$0xff] %vm1660_vm10, %v1619_v15  ;;  %v1377_v3 = vpop.f32.mrf.mxu2  ;;  %v2296_v30 = vld [vmem:[#allocation3 + $0x81] sm:$0xff]  ;;  %v1149_v15 = vpop.f32.mrf.mxu3 }
 0x359   :  { %v1407_v52 = vadd.f32 %v1377_v3, %v1138_v17  ;;  %1761 = vst.msk [vmem:[#allocation4 + $0x18] sm:$0xff] %vm1757_vm11, %v1716_v57  ;;  %v1925_v24 = vld [vmem:[#allocation3 + $0x82] sm:$0xff]  ;;  %2334 = vrot.lane.b32.xlu2 %v2296_v30, %s2822_s30  ;;  %1868 = vrot.lane.b32.xlu0 %v2296_v30, %s2822_s30 }
 0x35a   :  { %1531 = vst.msk [vmem:[#allocation3 + $0xb1] sm:$0xff] %vm1470_vm7, %v1462_v54  ;;  %1964 = vrot.lane.b32.xlu1 %v1925_v24, %s2825_s12  ;;  %v1150_v54 = vadd.f32 %v1149_v15, %v4000_v35  ;;  %v2264_v15 = vld [vmem:[#allocation3 + $0x80] sm:$0xff] }
 0x35b   :  { %v1427_v61 = vmul.f32 %v4054_v8, %v1407_v52  ;;  %v2419_v31 = vpop.permute.xlu0 %2418 }
 0x35c   :  { %2466 = vst.msk [vmem:[#allocation4] sm:$0xff] %vm1757_vm11, %v2419_v31  ;;  %v2015_v11 = vld [vmem:[#allocation4 + $0x8] sm:$0xff] }
 0x35d   :  { %v1447_v5 = vadd.f32 %v4061_v0, %v1427_v61  ;;  %2755 = vmatmul.msk.f32.gmra.mxu3 %vm2030_vm12, %v2015_v11  ;;  %2275 = vst.msk [vmem:[#allocation4 + $0x8] sm:$0xff] %vm1470_vm7, %v4159_v18 }
 0x35e   :  { %v1718_v45 = vpop.permute.xlu2 %1717  ;;  %2371 = vst.msk [vmem:[#allocation4 + $0x8] sm:$0xff] %vm1660_vm10, %v2325_v6 }
 0x35f   :  { %v4303_v22 = vpop.permute.xlu1 %1954  ;;  %v1463_v7 = vmax.f32 %v1447_v5, 0.0 }
 0x360   :  { %v1380_v20 = vpop.f32.mrf.mxu2  ;;  %v1777_v38 = vld [vmem:[#allocation4 + $0x18] sm:$0xff] }
 0x361   :  { %v1408_v13 = vadd.f32 %v1380_v20, %v1141_v48  ;;  %v1686_v47 = vld [vmem:[#allocation3 + $0xb2] sm:$0xff]  ;;  %1532 = vst.msk [vmem:[#allocation3 + $0xc1] sm:$0xff] %vm1470_vm7, %v1463_v7  ;;  %2430 = vrot.lane.b32.xlu0 %v1925_v24, %s2825_s12  ;;  %2773 = vmatmul.msk.f32.gmra.mxu0 %vm2030_vm12, %v1777_v38 }
 0x362   :  { %v1589_v1 = vld [vmem:[#allocation3 + $0xb1] sm:$0xff]  ;;  %1727 = vrot.lane.b32.xlu2 %v1686_v47, %s2825_s12  ;;  %1809 = vst.msk [vmem:[#allocation4 + $0x18] sm:$0xff] %vm1470_vm7, %v4174_v53 }
 0x363   :  { %v1428_v63 = vmul.f32 %v4054_v8, %v1408_v13  ;;  %1630 = vrot.lane.b32.xlu1 %v1589_v1, %s2822_s30  ;;  %v1557_v32 = vld [vmem:[#allocation3 + $0xb0] sm:$0xff]  ;;  %v1859_v29 = vpop.permute.xlu0 %1858  ;;  %v2482_v12 = vld [vmem:[#allocation4] sm:$0xff] }
 0x364   :  { %1573 = vst.msk [vmem:[#allocation4 + $0x48] sm:$0xff] %vm1470_vm7, %v1557_v32  ;;  %2786 = vmatmul.msk.f32.vlgmr.msrb.gmra.mxu1 %vm2030_vm12, %v2482_v12 }
 0x365   :  { %v1448_v51 = vadd.f32 %v4061_v0, %v1428_v63  ;;  %1814 = vst.msk [vmem:[#allocation4 + $0x40] sm:$0xff] %vm1470_vm7, %v1557_v32 }
 0x366   :  { %1904 = vst.msk [vmem:[#allocation4 + $0x10] sm:$0xff] %vm1660_vm10, %v1859_v29  ;;  %v2327_v49 = vpop.permute.xlu2 %2326 }
 0x367   :  { %v1621_v50 = vpop.permute.xlu1 %1620  ;;  %v1464_v37 = vmax.f32 %v1448_v51, 0.0  ;;  %2000 = vst.msk [vmem:[#allocation4 + $0x10] sm:$0xff] %vm1757_vm11, %v4303_v22 }
 0x368   :  { %1665 = vst.msk [vmem:[#allocation4 + $0x20] sm:$0xff] %vm1660_vm10, %v1621_v50  ;;  %v1383_v10 = vpop.f32.mrf.mxu2  ;;  %v1687_v16 = vld [vmem:[#allocation3 + $0xc2] sm:$0xff] }
 0x369   :  { %v1409_v36 = vadd.f32 %v1383_v10, %v1144_v43  ;;  %1762 = vst.msk [vmem:[#allocation4 + $0x20] sm:$0xff] %vm1757_vm11, %v1718_v45  ;;  %1870 = vrot.lane.b32.xlu0 %v1589_v1, %s2822_s30  ;;  %v4336_v26 = vld [vmem:[#allocation3 + $0xc0] sm:$0xff] }
 0x36a   :  { %1729 = vrot.lane.b32.xlu2 %v1687_v16, %s2825_s12  ;;  %1533 = vst.msk [vmem:[#allocation3 + $0xd1] sm:$0xff] %vm1470_vm7, %v1464_v37  ;;  %v1831_v34 = vld [vmem:[#allocation3 + $0xc1] sm:$0xff] }
 0x36b   :  { %v1429_v39 = vmul.f32 %v4054_v8, %v1409_v36  ;;  %1966 = vrot.lane.b32.xlu1 %v1686_v47, %s2825_s12  ;;  %1574 = vst.msk [vmem:[#allocation4 + $0x50] sm:$0xff] %vm1470_vm7, %v4336_v26  ;;  %v2421_v56 = vpop.permute.xlu0 %2420 }
 0x36c   :  { %2467 = vst.msk [vmem:[#allocation4 + $0x8] sm:$0xff] %vm1757_vm11, %v2421_v56 }
 0x36d   :  { %v1449_v18 = vadd.f32 %v4061_v0, %v1429_v39 }
 0x36e   :  { %v2016_v59 = vld [vmem:[#allocation4 + $0x10] sm:$0xff]  ;;  %v1720_v35 = vpop.permute.xlu2 %1719 }
 0x36f   :  { %v1465_v2 = vmax.f32 %v1449_v18, 0.0  ;;  %v1957_v17 = vpop.permute.xlu1 %1956  ;;  %2756 = vmatmul.msk.f32.gmra.mxu3 %vm2030_vm12, %v2016_v59  ;;  %2276 = vst.msk [vmem:[#allocation4 + $0x10] sm:$0xff] %vm1470_vm7, %v4174_v53  ;;  %v1152_v53 = vpop.f32.mrf.mxu3 }
 0x370   :  { %v1386_v62 = vpop.f32.mrf.mxu2  ;;  %v1778_v55 = vld [vmem:[#allocation4 + $0x20] sm:$0xff]  ;;  %2372 = vst.msk [vmem:[#allocation4 + $0x10] sm:$0xff] %vm1660_vm10, %v2327_v49  ;;  %v1153_v22 = vadd.f32 %v1152_v53, %v4019_v25 }
 0x371   :  { %v1410_v44 = vadd.f32 %v1386_v62, %v1147_v58  ;;  %1534 = vst.msk [vmem:[#allocation3 + $0xe1] sm:$0xff] %vm1470_vm7, %v1465_v2  ;;  %2774 = vmatmul.msk.f32.gmra.mxu0 %vm2030_vm12, %v1778_v55  ;;  %1872 = vrot.lane.b32.xlu0 %v1831_v34, %s2822_s30  ;;  %v4356_v40 = vld [vmem:[#allocation3 + $0xd0] sm:$0xff] }
 0x372   :  { %2338 = vrot.lane.b32.xlu2 %v1831_v34, %s2822_s30  ;;  %1810 = vst.msk [vmem:[#allocation4 + $0x20] sm:$0xff] %vm1470_vm7, %v4192_v60  ;;  %v1688_v30 = vld [vmem:[#allocation3 + $0xd2] sm:$0xff] }
 0x373   :  { %v1430_v27 = vmul.f32 %v4054_v8, %v1410_v44  ;;  %1632 = vrot.lane.b32.xlu1 %v1831_v34, %s2822_s30  ;;  %1575 = vst.msk [vmem:[#allocation4 + $0x58] sm:$0xff] %vm1470_vm7, %v4356_v40  ;;  %v1861_v21 = vpop.permute.xlu0 %1860  ;;  %v2483_v41 = vld [vmem:[#allocation4 + $0x8] sm:$0xff]  ;;  %v1832_v13 = vld [vmem:[#allocation3 + $0xd1] sm:$0xff] }
 0x374   :  { %1905 = vst.msk [vmem:[#allocation4 + $0x18] sm:$0xff] %vm1660_vm10, %v1861_v21  ;;  %2787 = vmatmul.msk.f32.gmra.mxu1 %vm2030_vm12, %v2483_v41 }
 0x375   :  { %v1450_v4 = vadd.f32 %v4061_v0, %v1430_v27  ;;  %2001 = vst.msk [vmem:[#allocation4 + $0x18] sm:$0xff] %vm1757_vm11, %v1957_v17 }
 0x376   :  { %v2329_v1 = vpop.permute.xlu2 %2328 }
 0x377   :  { %v1466_v3 = vmax.f32 %v1450_v4, 0.0 }
 0x378   :  { %v1389_v57 = vpop.f32.mrf.mxu2  ;;  %v4366_v24 = vld [vmem:[#allocation3 + $0xe0] sm:$0xff] }
 0x379   :  { %v1411_v52 = vadd.f32 %v1389_v57, %v1150_v54  ;;  %1535 = vst.msk [vmem:[#allocation3 + $0xf1] sm:$0xff] %vm1470_vm7, %v1466_v3  ;;  %2434 = vrot.lane.b32.xlu0 %v1687_v16, %s2825_s12  ;;  %v1689_v51 = vld [vmem:[#allocation3 + $0xe2] sm:$0xff]  ;;  %v1155_v57 = vpop.f32.mrf.mxu3 }
 0x37a   :  { %1731 = vrot.lane.b32.xlu2 %v1688_v30, %s2825_s12  ;;  %1576 = vst.msk [vmem:[#allocation4 + $0x60] sm:$0xff] %vm1470_vm7, %v4366_v24  ;;  %v1833_v10 = vld [vmem:[#allocation3 + $0xe1] sm:$0xff] }
 0x37b   :  { %v1431_v61 = vmul.f32 %v4054_v8, %v1411_v52  ;;  %1968 = vrot.lane.b32.xlu1 %v1687_v16, %s2825_s12  ;;  %v1156_v52 = vadd.f32 %v1155_v57, %v4035_v19 }
 0x37c   :  { %v2017_v32 = vld [vmem:[#allocation4 + $0x18] sm:$0xff] }
 0x37d   :  { %v1451_v5 = vadd.f32 %v4061_v0, %v1431_v61  ;;  %v1623_v48 = vpop.permute.xlu1 %1622  ;;  %2757 = vmatmul.msk.f32.gmra.mxu3 %vm2030_vm12, %v2017_v32  ;;  %2277 = vst.msk [vmem:[#allocation4 + $0x18] sm:$0xff] %vm1470_vm7, %v4192_v60 }
 0x37e   :  { %1666 = vst.msk [vmem:[#allocation4 + $0x28] sm:$0xff] %vm1660_vm10, %v1623_v48  ;;  %v2818_v48 = vld [vmem:[%s4700_s2] ss:$0 sm:$0xff] }
 0x37f   :  { %v1467_v7 = vmax.f32 %v1451_v5, 0.0  ;;  %1763 = vst.msk [vmem:[#allocation4 + $0x28] sm:$0xff] %vm1757_vm11, %v1720_v35 }
 0x380   :  { %v1392_v20 = vpop.f32.mrf.mxu2  ;;  %v4387_v25 = vld [vmem:[#allocation3 + $0xf0] sm:$0xff]  ;;  %2373 = vst.msk [vmem:[#allocation4 + $0x18] sm:$0xff] %vm1660_vm10, %v2329_v1 }
 0x381   :  { %v1412_v6 = vadd.f32 %v1392_v20, %v1153_v22  ;;  %1536 = vst.msk [vmem:[#allocation3 + $0x101] sm:$0xff] %vm1470_vm7, %v1467_v7  ;;  %1874 = vrot.lane.b32.xlu0 %v1832_v13, %s2822_s30  ;;  %v1690_v16 = vld [vmem:[#allocation3 + $0xf2] sm:$0xff]  ;;  %v2819_v22 = vld [vmem:[%s4701_s3] ss:$0 sm:$0xff] }
 0x382   :  { %2340 = vrot.lane.b32.xlu2 %v1832_v13, %s2822_s30  ;;  %1577 = vst.msk [vmem:[#allocation4 + $0x68] sm:$0xff] %vm1470_vm7, %v4387_v25 }
 0x383   :  { %v1432_v14 = vmul.f32 %v4054_v8, %v1412_v6  ;;  %1634 = vrot.lane.b32.xlu1 %v1832_v13, %s2822_s30  ;;  %v2423_v8 = vpop.permute.xlu0 %2422 }
 0x384   :  { %2468 = vst.msk [vmem:[#allocation4 + $0x10] sm:$0xff] %vm1757_vm11, %v2423_v8 }
 0x385   :  { %v1452_v47 = vadd.f32 %v4061_v0, %v1432_v14  ;;  %v1959_v50 = vpop.permute.xlu1 %1958 }
 0x386   :  { %v1779_v38 = vld [vmem:[#allocation4 + $0x28] sm:$0xff] }
 0x387   :  { %2775 = vmatmul.msk.f32.gmra.mxu0 %vm2030_vm12, %v1779_v38  ;;  %1811 = vst.msk [vmem:[#allocation4 + $0x28] sm:$0xff] %vm1470_vm7, %v4223_v9  ;;  %v1468_v63 = vmax.f32 %v1452_v47, 0.0  ;;  %v1722_v0 = vpop.permute.xlu2 %1721  ;;  %v2265_v38 = vld [vmem:[#allocation3 + $0x90] sm:$0xff] }
 0x388   :  { %v4400_v43 = vld [vmem:[#allocation3 + $0x100] sm:$0xff] }
 0x389   :  { %1537 = vst.msk [vmem:[#allocation3 + $0x111] sm:$0xff] %vm1470_vm7, %v1468_v63  ;;  %2436 = vrot.lane.b32.xlu0 %v1688_v30, %s2825_s12  ;;  %v1691_v62 = vld [vmem:[#allocation3 + $0x102] sm:$0xff]  ;;  %v2401_v63 = vld [vmem:[#allocation3 + $0x132] sm:$0xff] }
 0x38a   :  { %1733 = vrot.lane.b32.xlu2 %v1689_v51, %s2825_s12  ;;  %1578 = vst.msk [vmem:[#allocation4 + $0x70] sm:$0xff] %vm1470_vm7, %v4400_v43  ;;  %v1835_v17 = vld [vmem:[#allocation3 + $0x101] sm:$0xff] }
 0x38b   :  { %1970 = vrot.lane.b32.xlu1 %v1688_v30, %s2825_s12  ;;  %v1863_v31 = vpop.permute.xlu0 %1862  ;;  %v2484_v60 = vld [vmem:[#allocation4 + $0x10] sm:$0xff] }
 0x38c   :  { %1906 = vst.msk [vmem:[#allocation4 + $0x20] sm:$0xff] %vm1660_vm10, %v1863_v31  ;;  %2788 = vmatmul.msk.f32.gmra.mxu1 %vm2030_vm12, %v2484_v60 }
 0x38d   :  { %2002 = vst.msk [vmem:[#allocation4 + $0x20] sm:$0xff] %vm1757_vm11, %v1959_v50 }
 0x38f   :  { %v2331_v37 = vpop.permute.xlu2 %2330 }
 0x390   :  { %v4414_v45 = vld [vmem:[#allocation3 + $0x110] sm:$0xff] }
 0x391   :  { %1876 = vrot.lane.b32.xlu0 %v1833_v10, %s2822_s30  ;;  %1579 = vst.msk [vmem:[#allocation4 + $0x78] sm:$0xff] %vm1470_vm7, %v4414_v45  ;;  %v1692_v3 = vld [vmem:[#allocation3 + $0x112] sm:$0xff] }
 0x392   :  { %2342 = vrot.lane.b32.xlu2 %v1833_v10, %s2822_s30  ;;  %v1836_v53 = vld [vmem:[#allocation3 + $0x111] sm:$0xff] }
 0x393   :  { %1636 = vrot.lane.b32.xlu1 %v1833_v10, %s2822_s30  ;;  %v2425_v11 = vpop.permute.xlu0 %2424 }
 0x394   :  { %2469 = vst.msk [vmem:[#allocation4 + $0x18] sm:$0xff] %vm1757_vm11, %v2425_v11  ;;  %v2018_v36 = vld [vmem:[#allocation4 + $0x20] sm:$0xff]  ;;  %v2305_v11 = vld [vmem:[#allocation3 + $0x131] sm:$0xff] }
 0x395   :  { %2278 = vst.msk [vmem:[#allocation4 + $0x20] sm:$0xff] %vm1470_vm7, %v4223_v9  ;;  %2758 = vmatmul.msk.f32.gmra.mxu3 %vm2030_vm12, %v2018_v36  ;;  %v1834_v9 = vld [vmem:[#allocation3 + $0xf1] sm:$0xff] }
 0x396   :  { %2374 = vst.msk [vmem:[#allocation4 + $0x20] sm:$0xff] %vm1660_vm10, %v2331_v37 }
 0x397   :  { %v1724_v2 = vpop.permute.xlu2 %1723 }
 0x399   :  { %2438 = vrot.lane.b32.xlu0 %v1689_v51, %s2825_s12 }
 0x39a   :  { %1735 = vrot.lane.b32.xlu2 %v1690_v16, %s2825_s12 }
 0x39b   :  { %1972 = vrot.lane.b32.xlu1 %v1689_v51, %s2825_s12  ;;  %v2485_v46 = vld [vmem:[#allocation4 + $0x18] sm:$0xff] }
 0x39c   :  { %2789 = vmatmul.msk.f32.gmra.mxu1 %vm2030_vm12, %v2485_v46  ;;  %v4513_v46 = vld [vmem:[%s4703_s5] ss:$0 sm:$0xff] }
 0x39d   :  { %v1625_v39 = vpop.permute.xlu1 %1624  ;;  %v1865_v18 = vpop.permute.xlu0 %1864 }
 0x39e   :  { %1667 = vst.msk [vmem:[#allocation4 + $0x30] sm:$0xff] %vm1660_vm10, %v1625_v39 }
 0x39f   :  { %1764 = vst.msk [vmem:[#allocation4 + $0x30] sm:$0xff] %vm1757_vm11, %v1722_v0  ;;  %v2333_v34 = vpop.permute.xlu2 %2332 }
 0x3a0   :  { %1907 = vst.msk [vmem:[#allocation4 + $0x28] sm:$0xff] %vm1660_vm10, %v1865_v18 }
 0x3a1   :  { %1878 = vrot.lane.b32.xlu0 %v1834_v9, %s2822_s30 }
 0x3a2   :  { %2344 = vrot.lane.b32.xlu2 %v1834_v9, %s2822_s30 }
 0x3a3   :  { %1638 = vrot.lane.b32.xlu1 %v1834_v9, %s2822_s30 }
 0x3a5   :  { %v1961_v58 = vpop.permute.xlu1 %1960  ;;  %v2427_v12 = vpop.permute.xlu0 %2426 }
 0x3a6   :  { %2003 = vst.msk [vmem:[#allocation4 + $0x28] sm:$0xff] %vm1757_vm11, %v1961_v58  ;;  %v1780_v29 = vld [vmem:[#allocation4 + $0x30] sm:$0xff] }
 0x3a7   :  { %2776 = vmatmul.msk.f32.gmra.mxu0 %vm2030_vm12, %v1780_v29  ;;  %1812 = vst.msk [vmem:[#allocation4 + $0x30] sm:$0xff] %vm1470_vm7, %v4245_v23 }
 0x3a8   :  { %2470 = vst.msk [vmem:[#allocation4 + $0x20] sm:$0xff] %vm1757_vm11, %v2427_v12 }
 0x3a9   :  { %2440 = vrot.lane.b32.xlu0 %v1690_v16, %s2825_s12 }
 0x3aa   :  { %1737 = vrot.lane.b32.xlu2 %v1691_v62, %s2825_s12 }
 0x3ab   :  { %1974 = vrot.lane.b32.xlu1 %v1690_v16, %s2825_s12  ;;  %v2209_v16 = vpop.f32.mrf.mxu0 }
 0x3ad   :  { %v1627_v44 = vpop.permute.xlu1 %1626  ;;  %v2019_v49 = vld [vmem:[#allocation4 + $0x28] sm:$0xff]  ;;  %v1867_v55 = vpop.permute.xlu0 %1866 }
 0x3ae   :  { %1668 = vst.msk [vmem:[#allocation4 + $0x38] sm:$0xff] %vm1660_vm10, %v1627_v44  ;;  %2759 = vmatmul.msk.f32.gmra.mxu3 %vm2030_vm12, %v2019_v49 }
 0x3af   :  { %1765 = vst.msk [vmem:[#allocation4 + $0x38] sm:$0xff] %vm1757_vm11, %v1724_v2  ;;  %v2486_v27 = vld [vmem:[#allocation4 + $0x20] sm:$0xff] }
 0x3b0   :  { %2279 = vst.msk [vmem:[#allocation4 + $0x28] sm:$0xff] %vm1470_vm7, %v4245_v23  ;;  %2790 = vmatmul.msk.f32.gmra.mxu1 %vm2030_vm12, %v2486_v27 }
 0x3b1   :  { %1908 = vst.msk [vmem:[#allocation4 + $0x30] sm:$0xff] %vm1660_vm10, %v1867_v55  ;;  %1880 = vrot.lane.b32.xlu0 %v1835_v17, %s2822_s30 }
 0x3b2   :  { %2375 = vst.msk [vmem:[#allocation4 + $0x28] sm:$0xff] %vm1660_vm10, %v2333_v34  ;;  %2346 = vrot.lane.b32.xlu2 %v1835_v17, %s2822_s30 }
 0x3b3   :  { %1640 = vrot.lane.b32.xlu1 %v1835_v17, %s2822_s30  ;;  %v2335_v23 = vpop.permute.xlu2 %2334 }
 0x3b5   :  { %v1963_v4 = vpop.permute.xlu1 %1962  ;;  %v2429_v56 = vpop.permute.xlu0 %2428 }
 0x3b6   :  { %2004 = vst.msk [vmem:[#allocation4 + $0x30] sm:$0xff] %vm1757_vm11, %v1963_v4  ;;  %v1781_v54 = vld [vmem:[#allocation4 + $0x38] sm:$0xff] }
 0x3b7   :  { %2777 = vmatmul.msk.f32.gmra.mxu0 %vm2030_vm12, %v1781_v54  ;;  %1813 = vst.msk [vmem:[#allocation4 + $0x38] sm:$0xff] %vm1470_vm7, %v2264_v15 }
 0x3b8   :  { %2471 = vst.msk [vmem:[#allocation4 + $0x28] sm:$0xff] %vm1757_vm11, %v2429_v56 }
 0x3b9   :  { %2442 = vrot.lane.b32.xlu0 %v1691_v62, %s2825_s12 }
 0x3ba   :  { %1739 = vrot.lane.b32.xlu2 %v1692_v3, %s2825_s12 }
 0x3bb   :  { %1976 = vrot.lane.b32.xlu1 %v1691_v62, %s2825_s12 }
 0x3bc   :  { %v1728_v5 = vpop.permute.xlu2 %1727 }
 0x3bd   :  { %v2020_v59 = vld [vmem:[#allocation4 + $0x30] sm:$0xff] }
 0x3be   :  { %2280 = vst.msk [vmem:[#allocation4 + $0x30] sm:$0xff] %vm1470_vm7, %v2264_v15  ;;  %2760 = vmatmul.msk.f32.gmra.mxu3 %vm2030_vm12, %v2020_v59 }
 0x3bf   :  { %2376 = vst.msk [vmem:[#allocation4 + $0x30] sm:$0xff] %vm1660_vm10, %v2335_v23  ;;  %v1395_v30 = vpop.f32.mrf.mxu2  ;;  %2778 = vmatmul.msk.f32.gmra.mxu0 %vm2030_vm12, %v4332_v42  ;;  %v2487_v61 = vld [vmem:[#allocation4 + $0x28] sm:$0xff] }
 0x3c0   :  { %v1413_v35 = vadd.f32 %v1395_v30, %v1156_v52  ;;  %2791 = vmatmul.msk.f32.gmra.mxu1 %vm2030_vm12, %v2487_v61 }
 0x3c1   :  { %1882 = vrot.lane.b32.xlu0 %v1836_v53, %s2822_s30 }
 0x3c2   :  { %v1433_v19 = vmul.f32 %v2818_v48, %v1413_v35  ;;  %2348 = vrot.lane.b32.xlu2 %v1836_v53, %s2822_s30 }
 0x3c3   :  { %1642 = vrot.lane.b32.xlu1 %v1836_v53, %s2822_s30 }
 0x3c4   :  { %v1453_v42 = vadd.f32 %v2819_v22, %v1433_v19  ;;  %v1730_v21 = vpop.permute.xlu2 %1729 }
 0x3c6   :  { %v1469_v7 = vmax.f32 %v1453_v42, 0.0 }
 0x3c8   :  { %1538 = vst.msk [vmem:[#allocation3 + $0x121] sm:$0xff] %vm1470_vm7, %v1469_v7 }
 0x3c9   :  { %2444 = vrot.lane.b32.xlu0 %v1692_v3, %s2825_s12 }
 0x3ca   :  { %v2212_v15 = vpop.f32.mrf.mxu0 }
 0x3cb   :  { %1978 = vrot.lane.b32.xlu1 %v1692_v3, %s2825_s12  ;;  %v1869_v20 = vpop.permute.xlu0 %1868 }
 0x3cc   :  { %v1965_v41 = vpop.permute.xlu1 %1964  ;;  %1909 = vst.msk [vmem:[#allocation4 + $0x38] sm:$0xff] %vm1660_vm10, %v1869_v20  ;;  %v2339_v47 = vpop.permute.xlu2 %2338 }
 0x3cd   :  { %2005 = vst.msk [vmem:[#allocation4 + $0x38] sm:$0xff] %vm1757_vm11, %v1965_v41 }
 0x3cf   :  { %v1933_v6 = vld [vmem:[#allocation3 + $0x122] sm:$0xff] }
 0x3d0   :  { %1980 = vrot.lane.b32.xlu2 %v1933_v6, %s2825_s12  ;;  %v2304_v13 = vld [vmem:[#allocation3 + $0x121] sm:$0xff] }
 0x3d1   :  { %2350 = vrot.lane.b32.xlu0 %v2304_v13, %s2822_s30 }
 0x3d2   :  { %v2215_v42 = vpop.f32.mrf.mxu0 }
 0x3d3   :  { %1884 = vrot.lane.b32.xlu1 %v2304_v13, %s2822_s30  ;;  %v2431_v1 = vpop.permute.xlu0 %2430 }
 0x3d4   :  { %v2021_v8 = vld [vmem:[#allocation4 + $0x38] sm:$0xff]  ;;  %2472 = vst.msk [vmem:[#allocation4 + $0x30] sm:$0xff] %vm1757_vm11, %v2431_v1  ;;  %v1732_v31 = vpop.permute.xlu2 %1731 }
 0x3d5   :  { %v1631_v14 = vpop.permute.xlu1 %1630  ;;  %2761 = vmatmul.msk.f32.gmra.mxu3 %vm2030_vm12, %v2021_v8  ;;  %2281 = vst.msk [vmem:[#allocation4 + $0x38] sm:$0xff] %vm1470_vm7, %v2265_v38 }
 0x3d6   :  { %1670 = vst.msk [vmem:[#allocation4 + $0x48] sm:$0xff] %vm1660_vm10, %v1631_v14 }
 0x3d7   :  { %1767 = vst.msk [vmem:[#allocation4 + $0x48] sm:$0xff] %vm1757_vm11, %v1728_v5  ;;  %v2096_v37 = vpop.f32.mrf.mxu3 }
 0x3d8   :  { %2377 = vst.msk [vmem:[#allocation4 + $0x38] sm:$0xff] %vm1660_vm10, %v4243_v33  ;;  %2352 = vrot.lane.b32.xlu2 %v2305_v11, %s2822_s30  ;;  %v2210_v39 = vadd.f32 %v2209_v16, %v2096_v37 }
 0x3d9   :  { %2473 = vst.msk [vmem:[#allocation4 + $0x38] sm:$0xff] %vm1757_vm11, %v4266_v28  ;;  %2448 = vrot.lane.b32.xlu0 %v2401_v63, %s2825_s12 }
 0x3db   :  { %2446 = vrot.lane.b32.xlu1 %v1933_v6, %s2825_s12  ;;  %v1871_v51 = vpop.permute.xlu0 %1870  ;;  %v2488_v50 = vld [vmem:[#allocation4 + $0x30] sm:$0xff] }
 0x3dc   :  { %1910 = vst.msk [vmem:[#allocation4 + $0x40] sm:$0xff] %vm1660_vm10, %v1871_v51  ;;  %2792 = vmatmul.msk.f32.gmra.mxu1 %vm2030_vm12, %v2488_v50  ;;  %v2341_v36 = vpop.permute.xlu2 %2340 }
 0x3dd   :  { %v1967_v32 = vpop.permute.xlu1 %1966 }
 0x3de   :  { %v1783_v0 = vld [vmem:[#allocation4 + $0x48] sm:$0xff]  ;;  %2006 = vst.msk [vmem:[#allocation4 + $0x40] sm:$0xff] %vm1757_vm11, %v1967_v32 }
 0x3df   :  { %2779 = vmatmul.msk.f32.gmra.mxu0 %vm2030_vm12, %v1783_v0  ;;  %1815 = vst.msk [vmem:[#allocation4 + $0x48] sm:$0xff] %vm1470_vm7, %v4336_v26  ;;  %v2218_v0 = vpop.f32.mrf.mxu0 }
 0x3e0   :  { %v2489_v60 = vld [vmem:[#allocation4 + $0x38] sm:$0xff]  ;;  %v2099_v4 = vpop.f32.mrf.mxu3 }
 0x3e1   :  { %v2563_v9 = vpop.f32.mrf.mxu1  ;;  %v2213_v54 = vadd.f32 %v2212_v15, %v2099_v4 }
 0x3e2   :  { %v2611_v2 = vadd.f32 %v2563_v9, %v2210_v39 }
 0x3e3   :  { %v1873_v28 = vpop.permute.xlu0 %1872 }
 0x3e4   :  { %1911 = vst.msk [vmem:[#allocation4 + $0x48] sm:$0xff] %vm1660_vm10, %v1873_v28  ;;  %2793 = vmatmul.msk.f32.gmra.mxu1 %vm2030_vm12, %v2489_v60  ;;  %v2631_v12 = vmul.f32 %v4513_v46, %v2611_v2  ;;  %v1734_v44 = vpop.permute.xlu2 %1733 }
 0x3e5   :  { %v1633_v33 = vpop.permute.xlu1 %1632  ;;  %v2022_v10 = vld [vmem:[#allocation4 + $0x40] sm:$0xff] }
 0x3e6   :  { %1671 = vst.msk [vmem:[#allocation4 + $0x50] sm:$0xff] %vm1660_vm10, %v1633_v33  ;;  %2762 = vmatmul.msk.f32.gmra.mxu3 %vm2030_vm12, %v2022_v10 }
 0x3e7   :  { %1768 = vst.msk [vmem:[#allocation4 + $0x50] sm:$0xff] %vm1757_vm11, %v1730_v21 }
 0x3e8   :  { %2282 = vst.msk [vmem:[#allocation4 + $0x40] sm:$0xff] %vm1470_vm7, %v4336_v26  ;;  %v4519_v26 = vld [vmem:[%s4704_s6] ss:$0 sm:$0xff] }
 0x3e9   :  { %2378 = vst.msk [vmem:[#allocation4 + $0x40] sm:$0xff] %vm1660_vm10, %v2339_v47  ;;  %v2651_v62 = vadd.f32 %v4519_v26, %v2631_v12 }
 0x3eb   :  { %v2435_v29 = vpop.permute.xlu0 %2434  ;;  %v2667_v49 = vmax.f32 %v2651_v62, 0.0 }
 0x3ec   :  { %2474 = vst.msk [vmem:[#allocation4 + $0x40] sm:$0xff] %vm1757_vm11, %v2435_v29  ;;  %v2343_v56 = vpop.permute.xlu2 %2342 }
 0x3ed   :  { %v1969_v18 = vpop.permute.xlu1 %1968  ;;  %2683 = vst.msk [vmem:[%s4705_s7] sm:$0xff] %vm1470_vm7, %v2667_v49 }
 0x3ee   :  { %2007 = vst.msk [vmem:[#allocation4 + $0x48] sm:$0xff] %vm1757_vm11, %v1969_v18  ;;  %v1784_v58 = vld [vmem:[#allocation4 + $0x50] sm:$0xff]  ;;  %v2221_v29 = vpop.f32.mrf.mxu0 }
 0x3ef   :  { %2780 = vmatmul.msk.f32.gmra.mxu0 %vm2030_vm12, %v1784_v58  ;;  %1816 = vst.msk [vmem:[#allocation4 + $0x50] sm:$0xff] %vm1470_vm7, %v4356_v40 }
 0x3f1   :  { %v2566_v3 = vpop.f32.mrf.mxu1 }
 0x3f2   :  { %v2612_v57 = vadd.f32 %v2566_v3, %v2213_v54  ;;  %v2102_v22 = vpop.f32.mrf.mxu3 }
 0x3f3   :  { %v1875_v27 = vpop.permute.xlu0 %1874  ;;  %v2490_v17 = vld [vmem:[#allocation4 + $0x40] sm:$0xff]  ;;  %v2216_v7 = vadd.f32 %v2215_v42, %v2102_v22 }
 0x3f4   :  { %2794 = vmatmul.msk.f32.gmra.mxu1 %vm2030_vm12, %v2490_v17  ;;  %1912 = vst.msk [vmem:[#allocation4 + $0x50] sm:$0xff] %vm1660_vm10, %v1875_v27  ;;  %v2632_v30 = vmul.f32 %v4513_v46, %v2612_v57  ;;  %v1736_v53 = vpop.permute.xlu2 %1735 }
 0x3f5   :  { %v1635_v34 = vpop.permute.xlu1 %1634  ;;  %v2023_v55 = vld [vmem:[#allocation4 + $0x48] sm:$0xff] }
 0x3f6   :  { %1672 = vst.msk [vmem:[#allocation4 + $0x58] sm:$0xff] %vm1660_vm10, %v1635_v34  ;;  %2763 = vmatmul.msk.f32.gmra.mxu3 %vm2030_vm12, %v2023_v55 }
 0x3f7   :  { %1769 = vst.msk [vmem:[#allocation4 + $0x58] sm:$0xff] %vm1757_vm11, %v1732_v31 }
 0x3f8   :  { %2283 = vst.msk [vmem:[#allocation4 + $0x48] sm:$0xff] %vm1470_vm7, %v4356_v40  ;;  %v2652_v40 = vadd.f32 %v4519_v26, %v2632_v30 }
 0x3f9   :  { %2379 = vst.msk [vmem:[#allocation4 + $0x48] sm:$0xff] %vm1660_vm10, %v2341_v36 }
 0x3fa   :  { %v2668_v61 = vmax.f32 %v2652_v40, 0.0 }
 0x3fb   :  { %v2437_v59 = vpop.permute.xlu0 %2436 }
 0x3fc   :  { %2475 = vst.msk [vmem:[#allocation4 + $0x48] sm:$0xff] %vm1757_vm11, %v2437_v59 }
 0x3fd   :  { %v1971_v23 = vpop.permute.xlu1 %1970  ;;  %2684 = vst.msk [vmem:[%s4705_s7 + $0x8] sm:$0xff] %vm1470_vm7, %v2668_v61 }
 0x3fe   :  { %2008 = vst.msk [vmem:[#allocation4 + $0x50] sm:$0xff] %vm1757_vm11, %v1971_v23  ;;  %v1785_v52 = vld [vmem:[#allocation4 + $0x58] sm:$0xff] }
 0x3ff   :  { %2781 = vmatmul.msk.f32.gmra.mxu0 %vm2030_vm12, %v1785_v52  ;;  %1817 = vst.msk [vmem:[#allocation4 + $0x58] sm:$0xff] %vm1470_vm7, %v4366_v24 }
 0x400   :  { %v2105_v51 = vpop.f32.mrf.mxu3 }
 0x401   :  { %v2219_v31 = vadd.f32 %v2218_v0, %v2105_v51 }
 0x403   :  { %v1877_v48 = vpop.permute.xlu0 %1876  ;;  %v2491_v19 = vld [vmem:[#allocation4 + $0x48] sm:$0xff] }
 0x404   :  { %2795 = vmatmul.msk.f32.gmra.mxu1 %vm2030_vm12, %v2491_v19  ;;  %1913 = vst.msk [vmem:[#allocation4 + $0x58] sm:$0xff] %vm1660_vm10, %v1877_v48  ;;  %v2224_v59 = vpop.f32.mrf.mxu0  ;;  %v1805_v48 = vld [vmem:[#allocation3 + $0x120] sm:$0xff] }
 0x405   :  { %v1637_v35 = vpop.permute.xlu1 %1636  ;;  %v2024_v5 = vld [vmem:[#allocation4 + $0x50] sm:$0xff] }
 0x406   :  { %1673 = vst.msk [vmem:[#allocation4 + $0x60] sm:$0xff] %vm1660_vm10, %v1637_v35  ;;  %2764 = vmatmul.msk.f32.gmra.mxu3 %vm2030_vm12, %v2024_v5 }
 0x407   :  { %1770 = vst.msk [vmem:[#allocation4 + $0x60] sm:$0xff] %vm1757_vm11, %v1734_v44 }
 0x408   :  { %2284 = vst.msk [vmem:[#allocation4 + $0x50] sm:$0xff] %vm1470_vm7, %v4366_v24  ;;  %v2345_v24 = vpop.permute.xlu2 %2344 }
 0x409   :  { %2380 = vst.msk [vmem:[#allocation4 + $0x50] sm:$0xff] %vm1660_vm10, %v2343_v56  ;;  %v2569_v41 = vpop.f32.mrf.mxu1 }
 0x40a   :  { %v2613_v20 = vadd.f32 %v2569_v41, %v2216_v7 }
 0x40b   :  { %v2439_v6 = vpop.permute.xlu0 %2438 }
 0x40c   :  { %2476 = vst.msk [vmem:[#allocation4 + $0x50] sm:$0xff] %vm1757_vm11, %v2439_v6  ;;  %v2633_v14 = vmul.f32 %v4513_v46, %v2613_v20  ;;  %v2273_v6 = vld [vmem:[#allocation3 + $0x130] sm:$0xff] }
 0x40d   :  { %v1973_v21 = vpop.permute.xlu1 %1972 }
 0x40e   :  { %2009 = vst.msk [vmem:[#allocation4 + $0x58] sm:$0xff] %vm1757_vm11, %v1973_v21  ;;  %v1786_v13 = vld [vmem:[#allocation4 + $0x60] sm:$0xff]  ;;  %v2653_v47 = vadd.f32 %v4519_v26, %v2633_v14 }
 0x40f   :  { %2782 = vmatmul.msk.f32.gmra.mxu0 %vm2030_vm12, %v1786_v13  ;;  %1818 = vst.msk [vmem:[#allocation4 + $0x60] sm:$0xff] %vm1470_vm7, %v4387_v25 }
 0x410   :  { %v2669_v1 = vmax.f32 %v2653_v47, 0.0  ;;  %v1738_v50 = vpop.permute.xlu2 %1737 }
 0x412   :  { %2685 = vst.msk [vmem:[%s4705_s7 + $0x10] sm:$0xff] %vm1470_vm7, %v2669_v1 }
 0x413   :  { %v1879_v63 = vpop.permute.xlu0 %1878  ;;  %v2492_v32 = vld [vmem:[#allocation4 + $0x50] sm:$0xff] }
 0x414   :  { %2796 = vmatmul.msk.f32.gmra.mxu1 %vm2030_vm12, %v2492_v32  ;;  %1914 = vst.msk [vmem:[#allocation4 + $0x60] sm:$0xff] %vm1660_vm10, %v1879_v63 }
 0x415   :  { %v1639_v38 = vpop.permute.xlu1 %1638  ;;  %v2025_v8 = vld [vmem:[#allocation4 + $0x58] sm:$0xff] }
 0x416   :  { %1674 = vst.msk [vmem:[#allocation4 + $0x68] sm:$0xff] %vm1660_vm10, %v1639_v38  ;;  %2765 = vmatmul.msk.f32.gmra.mxu3 %vm2030_vm12, %v2025_v8 }
 0x417   :  { %1771 = vst.msk [vmem:[#allocation4 + $0x68] sm:$0xff] %vm1757_vm11, %v1736_v53 }
 0x418   :  { %2285 = vst.msk [vmem:[#allocation4 + $0x58] sm:$0xff] %vm1470_vm7, %v4387_v25  ;;  %v2347_v18 = vpop.permute.xlu2 %2346  ;;  %v2108_v2 = vpop.f32.mrf.mxu3 }
 0x419   :  { %2381 = vst.msk [vmem:[#allocation4 + $0x58] sm:$0xff] %vm1660_vm10, %v2345_v24  ;;  %v2572_v28 = vpop.f32.mrf.mxu1  ;;  %v2222_v12 = vadd.f32 %v2221_v29, %v2108_v2 }
 0x41a   :  { %v2614_v60 = vadd.f32 %v2572_v28, %v2219_v31 }
 0x41b   :  { %v2441_v10 = vpop.permute.xlu0 %2440 }
 0x41c   :  { %2477 = vst.msk [vmem:[#allocation4 + $0x58] sm:$0xff] %vm1757_vm11, %v2441_v10  ;;  %v2634_v37 = vmul.f32 %v4513_v46, %v2614_v60 }
 0x41d   :  { %v1975_v33 = vpop.permute.xlu1 %1974 }
 0x41e   :  { %2010 = vst.msk [vmem:[#allocation4 + $0x60] sm:$0xff] %vm1757_vm11, %v1975_v33  ;;  %v1787_v11 = vld [vmem:[#allocation4 + $0x68] sm:$0xff]  ;;  %v2654_v25 = vadd.f32 %v4519_v26, %v2634_v37 }
 0x41f   :  { %2783 = vmatmul.msk.f32.gmra.mxu0 %vm2030_vm12, %v1787_v11  ;;  %1819 = vst.msk [vmem:[#allocation4 + $0x68] sm:$0xff] %vm1470_vm7, %v4400_v43 }
 0x420   :  { %v2670_v36 = vmax.f32 %v2654_v25, 0.0  ;;  %v1740_v27 = vpop.permute.xlu2 %1739 }
 0x422   :  { %2686 = vst.msk [vmem:[%s4705_s7 + $0x18] sm:$0xff] %vm1470_vm7, %v2670_v36 }
 0x423   :  { %v1881_v9 = vpop.permute.xlu0 %1880  ;;  %v2493_v58 = vld [vmem:[#allocation4 + $0x58] sm:$0xff] }
 0x424   :  { %2797 = vmatmul.msk.f32.gmra.mxu1 %vm2030_vm12, %v2493_v58  ;;  %1915 = vst.msk [vmem:[#allocation4 + $0x68] sm:$0xff] %vm1660_vm10, %v1881_v9  ;;  %v2227_v38 = vpop.f32.mrf.mxu0 }
 0x425   :  { %v1641_v16 = vpop.permute.xlu1 %1640  ;;  %v2026_v39 = vld [vmem:[#allocation4 + $0x60] sm:$0xff] }
 0x426   :  { %1675 = vst.msk [vmem:[#allocation4 + $0x70] sm:$0xff] %vm1660_vm10, %v1641_v16  ;;  %2766 = vmatmul.msk.f32.gmra.mxu3 %vm2030_vm12, %v2026_v39 }
 0x427   :  { %1772 = vst.msk [vmem:[#allocation4 + $0x70] sm:$0xff] %vm1757_vm11, %v1738_v50 }
 0x428   :  { %2286 = vst.msk [vmem:[#allocation4 + $0x60] sm:$0xff] %vm1470_vm7, %v4400_v43  ;;  %v2349_v3 = vpop.permute.xlu2 %2348 }
 0x429   :  { %2382 = vst.msk [vmem:[#allocation4 + $0x60] sm:$0xff] %vm1660_vm10, %v2347_v18 }
 0x42b   :  { %v2443_v34 = vpop.permute.xlu0 %2442 }
 0x42c   :  { %2478 = vst.msk [vmem:[#allocation4 + $0x60] sm:$0xff] %vm1757_vm11, %v2443_v34 }
 0x42d   :  { %v1977_v62 = vpop.permute.xlu1 %1976  ;;  %v2575_v44 = vpop.f32.mrf.mxu1 }
 0x42e   :  { %2011 = vst.msk [vmem:[#allocation4 + $0x68] sm:$0xff] %vm1757_vm11, %v1977_v62  ;;  %v2615_v49 = vadd.f32 %v2575_v44, %v2222_v12  ;;  %v1788_v55 = vld [vmem:[#allocation4 + $0x70] sm:$0xff] }
 0x42f   :  { %2784 = vmatmul.msk.f32.gmra.mxu0 %vm2030_vm12, %v1788_v55  ;;  %1820 = vst.msk [vmem:[#allocation4 + $0x70] sm:$0xff] %vm1470_vm7, %v4414_v45 }
 0x430   :  { %v2635_v17 = vmul.f32 %v4513_v46, %v2615_v49  ;;  %v1981_v7 = vpop.permute.xlu2 %1980 }
 0x431   :  { %v2111_v57 = vpop.f32.mrf.mxu3 }
 0x432   :  { %v2655_v43 = vadd.f32 %v4519_v26, %v2635_v17  ;;  %v2225_v52 = vadd.f32 %v2224_v59, %v2111_v57 }
 0x433   :  { %v1883_v23 = vpop.permute.xlu0 %1882  ;;  %v2494_v56 = vld [vmem:[#allocation4 + $0x60] sm:$0xff] }
 0x434   :  { %v2671_v4 = vmax.f32 %v2655_v43, 0.0  ;;  %2798 = vmatmul.msk.f32.gmra.mxu1 %vm2030_vm12, %v2494_v56  ;;  %1916 = vst.msk [vmem:[#allocation4 + $0x70] sm:$0xff] %vm1660_vm10, %v1883_v23  ;;  %v2230_v33 = vpop.f32.mrf.mxu0 }
 0x435   :  { %v1643_v15 = vpop.permute.xlu1 %1642  ;;  %v2027_v54 = vld [vmem:[#allocation4 + $0x68] sm:$0xff] }
 0x436   :  { %1676 = vst.msk [vmem:[#allocation4 + $0x78] sm:$0xff] %vm1660_vm10, %v1643_v15  ;;  %2767 = vmatmul.msk.f32.gmra.mxu3 %vm2030_vm12, %v2027_v54 }
 0x437   :  { %2687 = vst.msk [vmem:[%s4705_s7 + $0x20] sm:$0xff] %vm1470_vm7, %v2671_v4 }
 0x438   :  { %1773 = vst.msk [vmem:[#allocation4 + $0x78] sm:$0xff] %vm1757_vm11, %v1740_v27  ;;  %v2353_v13 = vpop.permute.xlu2 %2352 }
 0x439   :  { %2287 = vst.msk [vmem:[#allocation4 + $0x68] sm:$0xff] %vm1470_vm7, %v4414_v45 }
 0x43a   :  { %2383 = vst.msk [vmem:[#allocation4 + $0x68] sm:$0xff] %vm1660_vm10, %v2349_v3 }
 0x43b   :  { %v2445_v35 = vpop.permute.xlu0 %2444 }
 0x43c   :  { %2479 = vst.msk [vmem:[#allocation4 + $0x68] sm:$0xff] %vm1757_vm11, %v2445_v35  ;;  %v2233_v39 = vpop.f32.mrf.mxu0 }
 0x43d   :  { %v1979_v30 = vpop.permute.xlu1 %1978  ;;  %v2578_v40 = vpop.f32.mrf.mxu1 }
 0x43e   :  { %2012 = vst.msk [vmem:[#allocation4 + $0x70] sm:$0xff] %vm1757_vm11, %v1979_v30  ;;  %v2616_v61 = vadd.f32 %v2578_v40, %v2225_v52 }
 0x43f   :  { %v1789_v5 = vld [vmem:[#allocation4 + $0x78] sm:$0xff] }
 0x440   :  { %2785 = vmatmul.msk.f32.gmra.mxu0 %vm2030_vm12, %v1789_v5  ;;  %v2636_v19 = vmul.f32 %v4513_v46, %v2616_v61  ;;  %1821 = vst.msk [vmem:[#allocation4 + $0x78] sm:$0xff] %vm1470_vm7, %v1805_v48 }
 0x441   :  { %v2114_v1 = vpop.f32.mrf.mxu3 }
 0x442   :  { %v2656_v45 = vadd.f32 %v4519_v26, %v2636_v19  ;;  %v2228_v63 = vadd.f32 %v2227_v38, %v2114_v1 }
 0x443   :  { %v2351_v21 = vpop.permute.xlu0 %2350  ;;  %v2495_v41 = vld [vmem:[#allocation4 + $0x68] sm:$0xff] }
 0x444   :  { %v2672_v53 = vmax.f32 %v2656_v45, 0.0  ;;  %2799 = vmatmul.msk.f32.gmra.mxu1 %vm2030_vm12, %v2495_v41 }
 0x445   :  { %v1885_v22 = vpop.permute.xlu1 %1884  ;;  %v2028_v42 = vld [vmem:[#allocation4 + $0x70] sm:$0xff] }
 0x446   :  { %1917 = vst.msk [vmem:[#allocation4 + $0x78] sm:$0xff] %vm1660_vm10, %v1885_v22  ;;  %2768 = vmatmul.msk.f32.gmra.mxu3 %vm2030_vm12, %v2028_v42 }
 0x447   :  { %2688 = vst.msk [vmem:[%s4705_s7 + $0x28] sm:$0xff] %vm1470_vm7, %v2672_v53 }
 0x448   :  { %2013 = vst.msk [vmem:[#allocation4 + $0x78] sm:$0xff] %vm1757_vm11, %v1981_v7 }
 0x449   :  { %2288 = vst.msk [vmem:[#allocation4 + $0x70] sm:$0xff] %vm1470_vm7, %v1805_v48 }
 0x44a   :  { %2384 = vst.msk [vmem:[#allocation4 + $0x70] sm:$0xff] %vm1660_vm10, %v2351_v21 }
 0x44b   :  { %v2449_v24 = vpop.permute.xlu0 %2448 }
 0x44d   :  { %v2447_v20 = vpop.permute.xlu1 %2446 }
 0x44e   :  { %2480 = vst.msk [vmem:[#allocation4 + $0x70] sm:$0xff] %vm1757_vm11, %v2447_v20 }
 0x44f   :  { %v2029_v14 = vld [vmem:[#allocation4 + $0x78] sm:$0xff] }
 0x450   :  { %2769 = vmatmul.msk.f32.gmra.mxu3 %vm2030_vm12, %v2029_v14  ;;  %2289 = vst.msk [vmem:[#allocation4 + $0x78] sm:$0xff] %vm1470_vm7, %v2273_v6 }
 0x451   :  { %2385 = vst.msk [vmem:[#allocation4 + $0x78] sm:$0xff] %vm1660_vm10, %v2353_v13 }
 0x452   :  { %2481 = vst.msk [vmem:[#allocation4 + $0x78] sm:$0xff] %vm1757_vm11, %v2449_v24 }
 0x455   :  { %v2496_v47 = vld [vmem:[#allocation4 + $0x70] sm:$0xff] }
 0x456   :  { %2800 = vmatmul.msk.f32.gmra.mxu1 %vm2030_vm12, %v2496_v47 }
 0x458   :  { %v2117_v50 = vpop.f32.mrf.mxu3 }
 0x459   :  { %v2497_v8 = vld [vmem:[#allocation4 + $0x78] sm:$0xff]  ;;  %v2581_v32 = vpop.f32.mrf.mxu1  ;;  %v2231_v28 = vadd.f32 %v2230_v33, %v2117_v50 }
 0x45a   :  { %v2617_v51 = vadd.f32 %v2581_v32, %v2228_v63 }
 0x45c   :  { %v2637_v0 = vmul.f32 %v4513_v46, %v2617_v51  ;;  %v2236_v44 = vpop.f32.mrf.mxu0 }
 0x45e   :  { %2801 = vmatmul.msk.f32.gmra.mxu1 %vm2030_vm12, %v2497_v8  ;;  %v2657_v31 = vadd.f32 %v4519_v26, %v2637_v0 }
 0x460   :  { %v2673_v60 = vmax.f32 %v2657_v31, 0.0 }
 0x461   :  { %v2584_v10 = vpop.f32.mrf.mxu1 }
 0x462   :  { %2689 = vst.msk [vmem:[%s4705_s7 + $0x30] sm:$0xff] %vm1470_vm7, %v2673_v60  ;;  %v2618_v11 = vadd.f32 %v2584_v10, %v2231_v28 }
 0x464   :  { %v2638_v37 = vmul.f32 %v4513_v46, %v2618_v11 }
 0x466   :  { %v2658_v25 = vadd.f32 %v4519_v26, %v2638_v37 }
 0x468   :  { %v2674_v36 = vmax.f32 %v2658_v25, 0.0 }
 0x469   :  { %v2120_v16 = vpop.f32.mrf.mxu3 }
 0x46a   :  { %2690 = vst.msk [vmem:[%s4705_s7 + $0x38] sm:$0xff] %vm1470_vm7, %v2674_v36  ;;  %v2234_v18 = vadd.f32 %v2233_v39, %v2120_v16 }
 0x46c   :  { %v2239_v15 = vpop.f32.mrf.mxu0 }
 0x471   :  { %v2587_v9 = vpop.f32.mrf.mxu1 }
 0x472   :  { %v2619_v58 = vadd.f32 %v2587_v9, %v2234_v18 }
 0x474   :  { %v2639_v2 = vmul.f32 %v4513_v46, %v2619_v58 }
 0x476   :  { %v2659_v29 = vadd.f32 %v4519_v26, %v2639_v2 }
 0x478   :  { %v2675_v12 = vmax.f32 %v2659_v29, 0.0 }
 0x479   :  { %v2123_v62 = vpop.f32.mrf.mxu3 }
 0x47a   :  { %2691 = vst.msk [vmem:[%s4705_s7 + $0x40] sm:$0xff] %vm1470_vm7, %v2675_v12  ;;  %v2237_v49 = vadd.f32 %v2236_v44, %v2123_v62 }
 0x47c   :  { %v2242_v30 = vpop.f32.mrf.mxu0 }
 0x481   :  { %v2590_v34 = vpop.f32.mrf.mxu1 }
 0x482   :  { %v2620_v55 = vadd.f32 %v2590_v34, %v2237_v49 }
 0x484   :  { %v2640_v27 = vmul.f32 %v4513_v46, %v2620_v55 }
 0x486   :  { %v2660_v17 = vadd.f32 %v4519_v26, %v2640_v27 }
 0x488   :  { %v2676_v43 = vmax.f32 %v2660_v17, 0.0 }
 0x489   :  { %v2126_v4 = vpop.f32.mrf.mxu3 }
 0x48a   :  { %2692 = vst.msk [vmem:[%s4705_s7 + $0x48] sm:$0xff] %vm1470_vm7, %v2676_v43  ;;  %v2240_v54 = vadd.f32 %v2239_v15, %v2126_v4 }
 0x48c   :  { %v2245_v53 = vpop.f32.mrf.mxu0 }
 0x491   :  { %v2593_v23 = vpop.f32.mrf.mxu1 }
 0x492   :  { %v2621_v56 = vadd.f32 %v2593_v23, %v2240_v54 }
 0x494   :  { %v2641_v3 = vmul.f32 %v4513_v46, %v2621_v56 }
 0x496   :  { %v2661_v57 = vadd.f32 %v4519_v26, %v2641_v3 }
 0x498   :  { %v2677_v59 = vmax.f32 %v2661_v57, 0.0 }
 0x499   :  { %v2129_v52 = vpop.f32.mrf.mxu3 }
 0x49a   :  { %2693 = vst.msk [vmem:[%s4705_s7 + $0x50] sm:$0xff] %vm1470_vm7, %v2677_v59  ;;  %v2243_v40 = vadd.f32 %v2242_v30, %v2129_v52 }
 0x49c   :  { %v2248_v13 = vpop.f32.mrf.mxu0 }
 0x4a1   :  { %v2596_v61 = vpop.f32.mrf.mxu1 }
 0x4a2   :  { %v2622_v35 = vadd.f32 %v2596_v61, %v2243_v40 }
 0x4a4   :  { %v2642_v5 = vmul.f32 %v4513_v46, %v2622_v35 }
 0x4a6   :  { %v2662_v48 = vadd.f32 %v4519_v26, %v2642_v5 }
 0x4a8   :  { %v2678_v19 = vmax.f32 %v2662_v48, 0.0 }
 0x4a9   :  { %v2132_v45 = vpop.f32.mrf.mxu3 }
 0x4aa   :  { %2694 = vst.msk [vmem:[%s4705_s7 + $0x58] sm:$0xff] %vm1470_vm7, %v2678_v19  ;;  %v2246_v22 = vadd.f32 %v2245_v53, %v2132_v45 }
 0x4ac   :  { %v2251_v32 = vpop.f32.mrf.mxu0 }
 0x4b1   :  { %v2599_v42 = vpop.f32.mrf.mxu1 }
 0x4b2   :  { %v2623_v7 = vadd.f32 %v2599_v42, %v2246_v22 }
 0x4b4   :  { %v2643_v21 = vmul.f32 %v4513_v46, %v2623_v7 }
 0x4b6   :  { %v2663_v41 = vadd.f32 %v4519_v26, %v2643_v21 }
 0x4b8   :  { %v2679_v20 = vmax.f32 %v2663_v41, 0.0 }
 0x4b9   :  { %v2135_v6 = vpop.f32.mrf.mxu3 }
 0x4ba   :  { %2695 = vst.msk [vmem:[%s4705_s7 + $0x60] sm:$0xff] %vm1470_vm7, %v2679_v20  ;;  %v2249_v14 = vadd.f32 %v2248_v13, %v2135_v6 }
 0x4bd   :  { %v2254_v60 = vpop.f32.mrf.mxu0 }
 0x4c1   :  { %v2602_v24 = vpop.f32.mrf.mxu1 }
 0x4c2   :  { %v2624_v47 = vadd.f32 %v2602_v24, %v2249_v14 }
 0x4c4   :  { %v2644_v1 = vmul.f32 %v4513_v46, %v2624_v47 }
 0x4c6   :  { %v2664_v38 = vadd.f32 %v4519_v26, %v2644_v1 }
 0x4c8   :  { %v2680_v8 = vmax.f32 %v2664_v38, 0.0 }
 0x4c9   :  { %v2138_v63 = vpop.f32.mrf.mxu3 }
 0x4ca   :  { %2696 = vst.msk [vmem:[%s4705_s7 + $0x68] sm:$0xff] %vm1470_vm7, %v2680_v8  ;;  %v2252_v51 = vadd.f32 %v2251_v32, %v2138_v63 }
 0x4d3   :  { %v2605_v0 = vpop.f32.mrf.mxu1  ;;  %v2141_v33 = vpop.f32.mrf.mxu3 }
 0x4d4   :  { %v2625_v50 = vadd.f32 %v2605_v0, %v2252_v51  ;;  %v2255_v10 = vadd.f32 %v2254_v60, %v2141_v33 }
 0x4d6   :  { %v2645_v31 = vmul.f32 %v4513_v46, %v2625_v50 }
 0x4d8   :  { %v2665_v28 = vadd.f32 %v4519_v26, %v2645_v31 }
 0x4da   :  { %v2681_v11 = vmax.f32 %v2665_v28, 0.0 }
 0x4db   :  { %v2608_v37 = vpop.f32.mrf.mxu1 }
 0x4dc   :  { %2697 = vst.msk [vmem:[%s4705_s7 + $0x70] sm:$0xff] %vm1470_vm7, %v2681_v11  ;;  %v2626_v25 = vadd.f32 %v2608_v37, %v2255_v10 }
 0x4de   :  { %v2646_v36 = vmul.f32 %v4513_v46, %v2626_v25 }
 0x4e0   :  { %v2666_v16 = vadd.f32 %v4519_v26, %v2646_v36 }
 0x4e2   :  { %v2682_v39 = vmax.f32 %v2666_v16, 0.0 }
 0x4e4   :  { %2698 = vst.msk [vmem:[%s4705_s7 + $0x78] sm:$0xff] %vm1470_vm7, %v2682_v39 }

</bundles_post_ra>
